<compile_context>
chip_gen: v7x
topology: tpu7x:2x2x1
jax: 0.10.0
libtpu: 0.0.40
codegen_flags: <defaults>
</compile_context>

<pallas_src>
import functools

import jax
import jax.numpy as jnp
from jax.experimental import pallas as pl
from jax.experimental.pallas import tpu as pltpu

_LANE = 128


def _round_up(x, m):
    return ((x + m - 1) // m) * m


# ----------------------------------------------------------------------------
# Fused kernel: Conv(1x1) -> Conv(3x3,p=1) -> Conv(1x1) -> Conv(3x3,p=1)
#               -> Conv(1x1), each followed by folded BN + LeakyReLU(0.1).
# One grid step == one image; everything stays in VMEM between layers.
# ----------------------------------------------------------------------------
def _convblocks_kernel(x_ref,
                       w0_ref, b0_ref, w1_ref, b1_ref, w2_ref, b2_ref,
                       w3_ref, b3_ref, w4_ref, b4_ref,
                       o_ref,
                       act_ref, pad_ref, *, HB):
    """x_ref/o_ref: (1, H, W, Cp) channel-padded NHWC image.
    wK_ref: (k*k, Cp, Cp) folded conv weight; bK_ref: (1, Cp) folded BN bias.
    act_ref: (H*W, Cp) f32 resident activation; pad_ref: (H+2, W+2, Cp) f32."""
    H, W, Cp = x_ref.shape[1], x_ref.shape[2], x_ref.shape[3]
    assert H % HB == 0
    NB = H // HB            # row bands per image
    BM = HB * W             # spatial positions per band

    def leaky(y):
        return jnp.maximum(y, 0.1 * y)            # LeakyReLU(0.1)

    # --- band accessors -------------------------------------------------
    def read_x(t):
        r0 = t * HB
        return x_ref[0, r0:r0 + HB, :, :].reshape(BM, Cp)

    def read_act(t):
        return act_ref[t * BM:(t + 1) * BM, :]

    def write_act(t, y):
        act_ref[t * BM:(t + 1) * BM, :] = y

    def write_out(t, y):
        r0 = t * HB
        o_ref[0, r0:r0 + HB, :, :] = y.reshape(HB, W, Cp).astype(o_ref.dtype)

    # --- layer helpers ----------------------------------------------------
    def conv1x1(read_band, write_band, w_ref, b_ref):
        w = w_ref[0]
        b = b_ref[...]
        for t in range(NB):                       # static unroll, band-sized vregs
            a = read_band(t)                      # (BM, Cp)
            y = jnp.dot(a, w, preferred_element_type=jnp.float32) + b
            write_band(t, leaky(y))

    def conv3x3(w_ref, b_ref, write_band):
        # Stage the current activation into the padded buffer's interior.
        # (The border was zeroed once below and is never written again.)
        for t in range(NB):
            r0 = t * HB
            pad_ref[1 + r0:1 + r0 + HB, 1:W + 1, :] = read_act(t).reshape(HB, W, Cp)
        b = b_ref[...]
        for t in range(NB):
            r0 = t * HB
            acc = None                            # register accumulation
            for i in range(3):
                for j in range(3):
                    tap = pad_ref[r0 + i:r0 + i + HB, j:j + W, :].reshape(BM, Cp)
                    p = jnp.dot(tap, w_ref[i * 3 + j],
                                preferred_element_type=jnp.float32)
                    acc = p if acc is None else acc + p
            write_band(t, leaky(acc + b))         # bias added once per band

    # Zero the padded staging buffer; its border stays zero for both 3x3
    # layers.  Done every grid step (grid axis is "parallel": each core owns
    # its own scratch, so gating on program_id would be unsafe).
    pad_ref[...] = jnp.zeros_like(pad_ref)

    conv1x1(read_x,   write_act, w0_ref, b0_ref)   # Conv(c1,  c2,  k=1)
    conv3x3(w1_ref, b1_ref, write_act)             # Conv(c2,  2c2, k=3, p=1)
    conv1x1(read_act, write_act, w2_ref, b2_ref)   # Conv(2c2, c2,  k=1)
    conv3x3(w3_ref, b3_ref, write_act)             # Conv(c2,  2c2, k=3, p=1)
    conv1x1(read_act, write_out, w4_ref, b4_ref)   # Conv(2c2, c2,  k=1)


# ----------------------------------------------------------------------------
# Parameter containers (mirror the PyTorch module; BN folded for inference)
# ----------------------------------------------------------------------------
class ConvBNLeaky:
    """One Conv2d(c1,c2,k,p,bias=False) + BatchNorm2d + LeakyReLU(0.1)."""

    def __init__(self, key, c1, c2, k=1, p=0, act=True):
        self.c1, self.c2, self.k, self.p, self.act = c1, c2, k, p, act
        kw, kg, kb, km, kv = jax.random.split(key, 5)
        bound = (1.0 / (c1 * k * k)) ** 0.5
        self.weight = jax.random.uniform(kw, (c2, c1, k, k), jnp.float32,
                                         -bound, bound)
        self.gamma = 1.0 + 0.1 * jax.random.normal(kg, (c2,), jnp.float32)
        self.beta = 0.1 * jax.random.normal(kb, (c2,), jnp.float32)
        self.running_mean = 0.1 * jax.random.normal(km, (c2,), jnp.float32)
        self.running_var = 1.0 + 0.1 * jax.random.uniform(kv, (c2,), jnp.float32)
        self.eps = 1e-5

    def folded(self, c1p, c2p):
        """BN (inference) folded into a (k*k, c1p, c2p) weight and (1, c2p) bias,
        zero-padded so padded channels stay exactly zero through LeakyReLU."""
        scale = self.gamma / jnp.sqrt(self.running_var + self.eps)
        bias = self.beta - self.running_mean * scale
        wf = self.weight * scale[:, None, None, None]            # (c2,c1,k,k)
        wf = jnp.transpose(wf, (2, 3, 1, 0)).reshape(self.k * self.k,
                                                     self.c1, self.c2)
        wp = jnp.zeros((self.k * self.k, c1p, c2p), jnp.float32)
        wp = wp.at[:, :self.c1, :self.c2].set(wf)
        bp = jnp.zeros((1, c2p), jnp.float32).at[0, :self.c2].set(bias)
        return wp, bp


class ConvBlocksPallas:
    """ConvBlocks(c1, c2): Conv(c1,c2,1) -> Conv(c2,2c2,3,p=1) -> Conv(2c2,c2,1)
    -> Conv(c2,2c2,3,p=1) -> Conv(2c2,c2,1).  NCHW in / NCHW out."""

    def __init__(self, c1, c2, key=None):
        if key is None:
            key = jax.random.PRNGKey(0)
        c_ = c2 * 2
        ks = jax.random.split(key, 5)
        self.c1, self.c2 = c1, c2
        self.layers = [
            ConvBNLeaky(ks[0], c1, c2, k=1, p=0),
            ConvBNLeaky(ks[1], c2, c_, k=3, p=1),
            ConvBNLeaky(ks[2], c_, c2, k=1, p=0),
            ConvBNLeaky(ks[3], c2, c_, k=3, p=1),
            ConvBNLeaky(ks[4], c_, c2, k=1, p=0),
        ]
        # Single lane-dense padded channel width shared by all layers.
        self.cp = _round_up(max(c1, c2, c_), _LANE)
        self.params = []
        for m in self.layers:
            w, b = m.folded(self.cp, self.cp)
            self.params += [w, b]
        self._fwd = jax.jit(self._forward)

    def _forward(self, x_nchw, *params):
        N, C, H, W = x_nchw.shape
        Cp = self.cp
        x = jnp.transpose(x_nchw, (0, 2, 3, 1))                   # NCHW -> NHWC
        if Cp != C:
            x = jnp.pad(x, ((0, 0), (0, 0), (0, 0), (0, Cp - C)))

        HB = 8 if H % 8 == 0 else H                               # row-band size
        kernel = functools.partial(_convblocks_kernel, HB=HB)

        wb_specs = []
        for m in self.layers:
            kk = m.k * m.k
            wb_specs.append(pl.BlockSpec((kk, Cp, Cp), lambda n: (0, 0, 0)))
            wb_specs.append(pl.BlockSpec((1, Cp), lambda n: (0, 0)))

        out = pl.pallas_call(
            kernel,
            out_shape=jax.ShapeDtypeStruct((N, H, W, Cp), jnp.float32),
            grid_spec=pltpu.PrefetchScalarGridSpec(
                num_scalar_prefetch=0,
                grid=(N,),
                in_specs=[pl.BlockSpec((1, H, W, Cp),
                                       lambda n: (n, 0, 0, 0))] + wb_specs,
                out_specs=pl.BlockSpec((1, H, W, Cp), lambda n: (n, 0, 0, 0)),
                scratch_shapes=[
                    pltpu.VMEM((H * W, Cp), jnp.float32),          # activation
                    pltpu.VMEM((H + 2, W + 2, Cp), jnp.float32),   # padded 3x3 in
                ],
            ),
            compiler_params=pltpu.CompilerParams(
                dimension_semantics=("parallel",),
                vmem_limit_bytes=32 * 1024 * 1024,
            ),
        )(x, *params)

        out = out[..., :self.c2]                                   # drop chan pad
        return jnp.transpose(out, (0, 3, 1, 2))                    # NHWC -> NCHW

    def __call__(self, x_nchw):
        return self._fwd(x_nchw, *self.params)


# ----------------------------------------------------------------------------
# Pure-JAX reference (unfolded conv + BN + LeakyReLU) for the sanity check
# ----------------------------------------------------------------------------
def _reference(block, x_nchw):
    y = x_nchw
    for m in block.layers:
        y = jax.lax.conv_general_dilated(
            y, m.weight, window_strides=(1, 1),
            padding=[(m.p, m.p), (m.p, m.p)],
            dimension_numbers=("NCHW", "OIHW", "NCHW"),
            precision=jax.lax.Precision.HIGHEST)
        scale = (m.gamma / jnp.sqrt(m.running_var + m.eps)).reshape(1, -1, 1, 1)
        bias = (m.beta - m.running_mean * m.gamma /
                jnp.sqrt(m.running_var + m.eps)).reshape(1, -1, 1, 1)
        y = y * scale + bias
        if m.act:
            y = jnp.where(y > 0, y, 0.1 * y)
    return y


if __name__ == "__main__":
    # Small shapes mirroring ConvBlocks usage: batch=2, c1=4, c2=8, spatial=16.
    c1, c2 = 4, 8
    block = ConvBlocksPallas(c1, c2, key=jax.random.PRNGKey(1))

    x = jax.random.normal(jax.random.PRNGKey(0), (2, c1, 16, 16), jnp.float32)

    out = jax.block_until_ready(block(x))

    ref = _reference(block, x)
    assert out.shape == ref.shape == (2, c2, 16, 16), out.shape
    err = float(jnp.max(jnp.abs(out - ref)))
    assert jnp.allclose(out, ref, atol=5e-3, rtol=5e-3), f"max abs err {err}"

    print("KERNEL_OK")
</pallas_src>

<mosaic_0001>
module attributes {stable_mosaic.version = 11 : i64} {
  func.func @_convblocks_kernel(%arg0: i32, %arg1: memref<1x16x16x128xf32, #tpu.memory_space<vmem>>, %arg2: memref<1x128x128xf32, #tpu.memory_space<vmem>>, %arg3: memref<1x128xf32, #tpu.memory_space<vmem>>, %arg4: memref<9x128x128xf32, #tpu.memory_space<vmem>>, %arg5: memref<1x128xf32, #tpu.memory_space<vmem>>, %arg6: memref<1x128x128xf32, #tpu.memory_space<vmem>>, %arg7: memref<1x128xf32, #tpu.memory_space<vmem>>, %arg8: memref<9x128x128xf32, #tpu.memory_space<vmem>>, %arg9: memref<1x128xf32, #tpu.memory_space<vmem>>, %arg10: memref<1x128x128xf32, #tpu.memory_space<vmem>>, %arg11: memref<1x128xf32, #tpu.memory_space<vmem>>, %arg12: memref<1x16x16x128xf32, #tpu.memory_space<vmem>>, %arg13: memref<256x128xf32, #tpu.memory_space<vmem>>, %arg14: memref<18x18x128xf32, #tpu.memory_space<vmem>>) attributes {dimension_semantics = [#tpu.dimension_semantics<parallel>], iteration_bounds = array<i64: 2>, scalar_prefetch = 0 : i64, scratch_operands = 2 : i64, tpu.core_type = #tpu.core_type<tc>, window_params = [{transform_indices = @transform_0, window_bounds = array<i64: 1, 16, 16, 128>}, {pipeline_mode = #tpu.pipeline_mode<synchronous>, transform_indices = @transform_1, window_bounds = array<i64: 1, 128, 128>}, {pipeline_mode = #tpu.pipeline_mode<synchronous>, transform_indices = @transform_2, window_bounds = array<i64: 1, 128>}, {pipeline_mode = #tpu.pipeline_mode<synchronous>, transform_indices = @transform_3, window_bounds = array<i64: 9, 128, 128>}, {pipeline_mode = #tpu.pipeline_mode<synchronous>, transform_indices = @transform_4, window_bounds = array<i64: 1, 128>}, {pipeline_mode = #tpu.pipeline_mode<synchronous>, transform_indices = @transform_5, window_bounds = array<i64: 1, 128, 128>}, {pipeline_mode = #tpu.pipeline_mode<synchronous>, transform_indices = @transform_6, window_bounds = array<i64: 1, 128>}, {pipeline_mode = #tpu.pipeline_mode<synchronous>, transform_indices = @transform_7, window_bounds = array<i64: 9, 128, 128>}, {pipeline_mode = #tpu.pipeline_mode<synchronous>, transform_indices = @transform_8, window_bounds = array<i64: 1, 128>}, {pipeline_mode = #tpu.pipeline_mode<synchronous>, transform_indices = @transform_9, window_bounds = array<i64: 1, 128, 128>}, {pipeline_mode = #tpu.pipeline_mode<synchronous>, transform_indices = @transform_10, window_bounds = array<i64: 1, 128>}, {transform_indices = @transform_11, window_bounds = array<i64: 1, 16, 16, 128>}]} {
    %cst = arith.constant 0.000000e+00 : f32
    %0 = vector.broadcast %cst : f32 to vector<18x18x128xf32>
    %c0 = arith.constant 0 : index
    %c0_0 = arith.constant 0 : index
    %c0_1 = arith.constant 0 : index
    %1 = vector.load %arg14[%c0, %c0_0, %c0_1] : memref<18x18x128xf32, #tpu.memory_space<vmem>>, vector<18x18x128xf32>
    tpu.vector_store %arg14[%c0, %c0_0, %c0_1], %0 {strides = array<i32>} : memref<18x18x128xf32, #tpu.memory_space<vmem>>, vector<18x18x128xf32>,
    %c0_2 = arith.constant 0 : index
    %c0_3 = arith.constant 0 : index
    %c0_4 = arith.constant 0 : index
    %2 = vector.load %arg2[%c0_2, %c0_3, %c0_4] : memref<1x128x128xf32, #tpu.memory_space<vmem>>, vector<1x128x128xf32>
    %3 = vector.shape_cast %2 : vector<1x128x128xf32> to vector<128x128xf32>
    %c0_5 = arith.constant 0 : index
    %c0_6 = arith.constant 0 : index
    %4 = vector.load %arg3[%c0_5, %c0_6] : memref<1x128xf32, #tpu.memory_space<vmem>>, vector<1x128xf32>
    %c0_7 = arith.constant 0 : index
    %c0_8 = arith.constant 0 : index
    %c0_9 = arith.constant 0 : index
    %c0_10 = arith.constant 0 : index
    %5 = vector.load %arg1[%c0_7, %c0_8, %c0_9, %c0_10] : memref<1x16x16x128xf32, #tpu.memory_space<vmem>>, vector<1x8x16x128xf32>
    %6 = vector.shape_cast %5 : vector<1x8x16x128xf32> to vector<8x16x128xf32>
    %7 = vector.shape_cast %6 : vector<8x16x128xf32> to vector<128x128xf32>
    %cst_11 = arith.constant dense<0.000000e+00> : vector<128x128xf32>
    %8 = tpu.matmul %7, %3, %cst_11 {dimension_numbers = #tpu.dot_dimension_numbers<[1], [0], [0], [1], [0, 0, 1, 1], [], []>} : vector<128x128xf32>, vector<128x128xf32>, vector<128x128xf32> -> vector<128x128xf32>
    %9 = vector.broadcast %4 : vector<1x128xf32> to vector<128x128xf32>
    %10 = arith.addf %8, %9 : vector<128x128xf32>
    %cst_12 = arith.constant 1.000000e-01 : f32
    %11 = vector.broadcast %cst_12 : f32 to vector<128x128xf32>
    %12 = arith.mulf %11, %10 : vector<128x128xf32>
    %13 = arith.maximumf %10, %12 : vector<128x128xf32>
    %c0_13 = arith.constant 0 : index
    %c0_14 = arith.constant 0 : index
    %14 = vector.load %arg13[%c0_13, %c0_14] : memref<256x128xf32, #tpu.memory_space<vmem>>, vector<128x128xf32>
    tpu.vector_store %arg13[%c0_13, %c0_14], %13 {strides = array<i32>} : memref<256x128xf32, #tpu.memory_space<vmem>>, vector<128x128xf32>,
    %c0_15 = arith.constant 0 : index
    %c8 = arith.constant 8 : index
    %c0_16 = arith.constant 0 : index
    %c0_17 = arith.constant 0 : index
    %15 = vector.load %arg1[%c0_15, %c8, %c0_16, %c0_17] : memref<1x16x16x128xf32, #tpu.memory_space<vmem>>, vector<1x8x16x128xf32>
    %16 = vector.shape_cast %15 : vector<1x8x16x128xf32> to vector<8x16x128xf32>
    %17 = vector.shape_cast %16 : vector<8x16x128xf32> to vector<128x128xf32>
    %cst_18 = arith.constant dense<0.000000e+00> : vector<128x128xf32>
    %18 = tpu.matmul %17, %3, %cst_18 {dimension_numbers = #tpu.dot_dimension_numbers<[1], [0], [0], [1], [0, 0, 1, 1], [], []>} : vector<128x128xf32>, vector<128x128xf32>, vector<128x128xf32> -> vector<128x128xf32>
    %19 = vector.broadcast %4 : vector<1x128xf32> to vector<128x128xf32>
    %20 = arith.addf %18, %19 : vector<128x128xf32>
    %cst_19 = arith.constant 1.000000e-01 : f32
    %21 = vector.broadcast %cst_19 : f32 to vector<128x128xf32>
    %22 = arith.mulf %21, %20 : vector<128x128xf32>
    %23 = arith.maximumf %20, %22 : vector<128x128xf32>
    %c128 = arith.constant 128 : index
    %c0_20 = arith.constant 0 : index
    %24 = vector.load %arg13[%c128, %c0_20] : memref<256x128xf32, #tpu.memory_space<vmem>>, vector<128x128xf32>
    tpu.vector_store %arg13[%c128, %c0_20], %23 {strides = array<i32>} : memref<256x128xf32, #tpu.memory_space<vmem>>, vector<128x128xf32>,
    %c0_21 = arith.constant 0 : index
    %c0_22 = arith.constant 0 : index
    %25 = vector.load %arg13[%c0_21, %c0_22] : memref<256x128xf32, #tpu.memory_space<vmem>>, vector<128x128xf32>
    %26 = vector.shape_cast %25 : vector<128x128xf32> to vector<8x16x128xf32>
    %c1 = arith.constant 1 : index
    %c1_23 = arith.constant 1 : index
    %c0_24 = arith.constant 0 : index
    %27 = vector.load %arg14[%c1, %c1_23, %c0_24] : memref<18x18x128xf32, #tpu.memory_space<vmem>>, vector<8x16x128xf32>
    tpu.vector_store %arg14[%c1, %c1_23, %c0_24], %26 {strides = array<i32>} : memref<18x18x128xf32, #tpu.memory_space<vmem>>, vector<8x16x128xf32>,
    %c128_25 = arith.constant 128 : index
    %c0_26 = arith.constant 0 : index
    %28 = vector.load %arg13[%c128_25, %c0_26] : memref<256x128xf32, #tpu.memory_space<vmem>>, vector<128x128xf32>
    %29 = vector.shape_cast %28 : vector<128x128xf32> to vector<8x16x128xf32>
    %c9 = arith.constant 9 : index
    %c1_27 = arith.constant 1 : index
    %c0_28 = arith.constant 0 : index
    %30 = vector.load %arg14[%c9, %c1_27, %c0_28] : memref<18x18x128xf32, #tpu.memory_space<vmem>>, vector<8x16x128xf32>
    tpu.vector_store %arg14[%c9, %c1_27, %c0_28], %29 {strides = array<i32>} : memref<18x18x128xf32, #tpu.memory_space<vmem>>, vector<8x16x128xf32>,
    %c0_29 = arith.constant 0 : index
    %c0_30 = arith.constant 0 : index
    %31 = vector.load %arg5[%c0_29, %c0_30] : memref<1x128xf32, #tpu.memory_space<vmem>>, vector<1x128xf32>
    %c0_31 = arith.constant 0 : index
    %c0_32 = arith.constant 0 : index
    %c0_33 = arith.constant 0 : index
    %32 = vector.load %arg14[%c0_31, %c0_32, %c0_33] : memref<18x18x128xf32, #tpu.memory_space<vmem>>, vector<8x16x128xf32>
    %33 = vector.shape_cast %32 : vector<8x16x128xf32> to vector<128x128xf32>
    %c0_34 = arith.constant 0 : index
    %c0_35 = arith.constant 0 : index
    %c0_36 = arith.constant 0 : index
    %34 = vector.load %arg4[%c0_34, %c0_35, %c0_36] : memref<9x128x128xf32, #tpu.memory_space<vmem>>, vector<1x128x128xf32>
    %35 = vector.shape_cast %34 : vector<1x128x128xf32> to vector<128x128xf32>
    %cst_37 = arith.constant dense<0.000000e+00> : vector<128x128xf32>
    %36 = tpu.matmul %33, %35, %cst_37 {dimension_numbers = #tpu.dot_dimension_numbers<[1], [0], [0], [1], [0, 0, 1, 1], [], []>} : vector<128x128xf32>, vector<128x128xf32>, vector<128x128xf32> -> vector<128x128xf32>
    %c0_38 = arith.constant 0 : index
    %c1_39 = arith.constant 1 : index
    %c0_40 = arith.constant 0 : index
    %37 = vector.load %arg14[%c0_38, %c1_39, %c0_40] : memref<18x18x128xf32, #tpu.memory_space<vmem>>, vector<8x16x128xf32>
    %38 = vector.shape_cast %37 : vector<8x16x128xf32> to vector<128x128xf32>
    %c1_41 = arith.constant 1 : index
    %c0_42 = arith.constant 0 : index
    %c0_43 = arith.constant 0 : index
    %39 = vector.load %arg4[%c1_41, %c0_42, %c0_43] : memref<9x128x128xf32, #tpu.memory_space<vmem>>, vector<1x128x128xf32>
    %40 = vector.shape_cast %39 : vector<1x128x128xf32> to vector<128x128xf32>
    %cst_44 = arith.constant dense<0.000000e+00> : vector<128x128xf32>
    %41 = tpu.matmul %38, %40, %cst_44 {dimension_numbers = #tpu.dot_dimension_numbers<[1], [0], [0], [1], [0, 0, 1, 1], [], []>} : vector<128x128xf32>, vector<128x128xf32>, vector<128x128xf32> -> vector<128x128xf32>
    %42 = arith.addf %36, %41 : vector<128x128xf32>
    %c0_45 = arith.constant 0 : index
    %c2 = arith.constant 2 : index
    %c0_46 = arith.constant 0 : index
    %43 = vector.load %arg14[%c0_45, %c2, %c0_46] : memref<18x18x128xf32, #tpu.memory_space<vmem>>, vector<8x16x128xf32>
    %44 = vector.shape_cast %43 : vector<8x16x128xf32> to vector<128x128xf32>
    %c2_47 = arith.constant 2 : index
    %c0_48 = arith.constant 0 : index
    %c0_49 = arith.constant 0 : index
    %45 = vector.load %arg4[%c2_47, %c0_48, %c0_49] : memref<9x128x128xf32, #tpu.memory_space<vmem>>, vector<1x128x128xf32>
    %46 = vector.shape_cast %45 : vector<1x128x128xf32> to vector<128x128xf32>
    %cst_50 = arith.constant dense<0.000000e+00> : vector<128x128xf32>
    %47 = tpu.matmul %44, %46, %cst_50 {dimension_numbers = #tpu.dot_dimension_numbers<[1], [0], [0], [1], [0, 0, 1, 1], [], []>} : vector<128x128xf32>, vector<128x128xf32>, vector<128x128xf32> -> vector<128x128xf32>
    %48 = arith.addf %42, %47 : vector<128x128xf32>
    %c1_51 = arith.constant 1 : index
    %c0_52 = arith.constant 0 : index
    %c0_53 = arith.constant 0 : index
    %49 = vector.load %arg14[%c1_51, %c0_52, %c0_53] : memref<18x18x128xf32, #tpu.memory_space<vmem>>, vector<8x16x128xf32>
    %50 = vector.shape_cast %49 : vector<8x16x128xf32> to vector<128x128xf32>
    %c3 = arith.constant 3 : index
    %c0_54 = arith.constant 0 : index
    %c0_55 = arith.constant 0 : index
    %51 = vector.load %arg4[%c3, %c0_54, %c0_55] : memref<9x128x128xf32, #tpu.memory_space<vmem>>, vector<1x128x128xf32>
    %52 = vector.shape_cast %51 : vector<1x128x128xf32> to vector<128x128xf32>
    %cst_56 = arith.constant dense<0.000000e+00> : vector<128x128xf32>
    %53 = tpu.matmul %50, %52, %cst_56 {dimension_numbers = #tpu.dot_dimension_numbers<[1], [0], [0], [1], [0, 0, 1, 1], [], []>} : vector<128x128xf32>, vector<128x128xf32>, vector<128x128xf32> -> vector<128x128xf32>
    %54 = arith.addf %48, %53 : vector<128x128xf32>
    %c1_57 = arith.constant 1 : index
    %c1_58 = arith.constant 1 : index
    %c0_59 = arith.constant 0 : index
    %55 = vector.load %arg14[%c1_57, %c1_58, %c0_59] : memref<18x18x128xf32, #tpu.memory_space<vmem>>, vector<8x16x128xf32>
    %56 = vector.shape_cast %55 : vector<8x16x128xf32> to vector<128x128xf32>
    %c4 = arith.constant 4 : index
    %c0_60 = arith.constant 0 : index
    %c0_61 = arith.constant 0 : index
    %57 = vector.load %arg4[%c4, %c0_60, %c0_61] : memref<9x128x128xf32, #tpu.memory_space<vmem>>, vector<1x128x128xf32>
    %58 = vector.shape_cast %57 : vector<1x128x128xf32> to vector<128x128xf32>
    %cst_62 = arith.constant dense<0.000000e+00> : vector<128x128xf32>
    %59 = tpu.matmul %56, %58, %cst_62 {dimension_numbers = #tpu.dot_dimension_numbers<[1], [0], [0], [1], [0, 0, 1, 1], [], []>} : vector<128x128xf32>, vector<128x128xf32>, vector<128x128xf32> -> vector<128x128xf32>
    %60 = arith.addf %54, %59 : vector<128x128xf32>
    %c1_63 = arith.constant 1 : index
    %c2_64 = arith.constant 2 : index
    %c0_65 = arith.constant 0 : index
    %61 = vector.load %arg14[%c1_63, %c2_64, %c0_65] : memref<18x18x128xf32, #tpu.memory_space<vmem>>, vector<8x16x128xf32>
    %62 = vector.shape_cast %61 : vector<8x16x128xf32> to vector<128x128xf32>
    %c5 = arith.constant 5 : index
    %c0_66 = arith.constant 0 : index
    %c0_67 = arith.constant 0 : index
    %63 = vector.load %arg4[%c5, %c0_66, %c0_67] : memref<9x128x128xf32, #tpu.memory_space<vmem>>, vector<1x128x128xf32>
    %64 = vector.shape_cast %63 : vector<1x128x128xf32> to vector<128x128xf32>
    %cst_68 = arith.constant dense<0.000000e+00> : vector<128x128xf32>
    %65 = tpu.matmul %62, %64, %cst_68 {dimension_numbers = #tpu.dot_dimension_numbers<[1], [0], [0], [1], [0, 0, 1, 1], [], []>} : vector<128x128xf32>, vector<128x128xf32>, vector<128x128xf32> -> vector<128x128xf32>
    %66 = arith.addf %60, %65 : vector<128x128xf32>
    %c2_69 = arith.constant 2 : index
    %c0_70 = arith.constant 0 : index
    %c0_71 = arith.constant 0 : index
    %67 = vector.load %arg14[%c2_69, %c0_70, %c0_71] : memref<18x18x128xf32, #tpu.memory_space<vmem>>, vector<8x16x128xf32>
    %68 = vector.shape_cast %67 : vector<8x16x128xf32> to vector<128x128xf32>
    %c6 = arith.constant 6 : index
    %c0_72 = arith.constant 0 : index
    %c0_73 = arith.constant 0 : index
    %69 = vector.load %arg4[%c6, %c0_72, %c0_73] : memref<9x128x128xf32, #tpu.memory_space<vmem>>, vector<1x128x128xf32>
    %70 = vector.shape_cast %69 : vector<1x128x128xf32> to vector<128x128xf32>
    %cst_74 = arith.constant dense<0.000000e+00> : vector<128x128xf32>
    %71 = tpu.matmul %68, %70, %cst_74 {dimension_numbers = #tpu.dot_dimension_numbers<[1], [0], [0], [1], [0, 0, 1, 1], [], []>} : vector<128x128xf32>, vector<128x128xf32>, vector<128x128xf32> -> vector<128x128xf32>
    %72 = arith.addf %66, %71 : vector<128x128xf32>
    %c2_75 = arith.constant 2 : index
    %c1_76 = arith.constant 1 : index
    %c0_77 = arith.constant 0 : index
    %73 = vector.load %arg14[%c2_75, %c1_76, %c0_77] : memref<18x18x128xf32, #tpu.memory_space<vmem>>, vector<8x16x128xf32>
    %74 = vector.shape_cast %73 : vector<8x16x128xf32> to vector<128x128xf32>
    %c7 = arith.constant 7 : index
    %c0_78 = arith.constant 0 : index
    %c0_79 = arith.constant 0 : index
    %75 = vector.load %arg4[%c7, %c0_78, %c0_79] : memref<9x128x128xf32, #tpu.memory_space<vmem>>, vector<1x128x128xf32>
    %76 = vector.shape_cast %75 : vector<1x128x128xf32> to vector<128x128xf32>
    %cst_80 = arith.constant dense<0.000000e+00> : vector<128x128xf32>
    %77 = tpu.matmul %74, %76, %cst_80 {dimension_numbers = #tpu.dot_dimension_numbers<[1], [0], [0], [1], [0, 0, 1, 1], [], []>} : vector<128x128xf32>, vector<128x128xf32>, vector<128x128xf32> -> vector<128x128xf32>
    %78 = arith.addf %72, %77 : vector<128x128xf32>
    %c2_81 = arith.constant 2 : index
    %c2_82 = arith.constant 2 : index
    %c0_83 = arith.constant 0 : index
    %79 = vector.load %arg14[%c2_81, %c2_82, %c0_83] : memref<18x18x128xf32, #tpu.memory_space<vmem>>, vector<8x16x128xf32>
    %80 = vector.shape_cast %79 : vector<8x16x128xf32> to vector<128x128xf32>
    %c8_84 = arith.constant 8 : index
    %c0_85 = arith.constant 0 : index
    %c0_86 = arith.constant 0 : index
    %81 = vector.load %arg4[%c8_84, %c0_85, %c0_86] : memref<9x128x128xf32, #tpu.memory_space<vmem>>, vector<1x128x128xf32>
    %82 = vector.shape_cast %81 : vector<1x128x128xf32> to vector<128x128xf32>
    %cst_87 = arith.constant dense<0.000000e+00> : vector<128x128xf32>
    %83 = tpu.matmul %80, %82, %cst_87 {dimension_numbers = #tpu.dot_dimension_numbers<[1], [0], [0], [1], [0, 0, 1, 1], [], []>} : vector<128x128xf32>, vector<128x128xf32>, vector<128x128xf32> -> vector<128x128xf32>
    %84 = arith.addf %78, %83 : vector<128x128xf32>
    %85 = vector.broadcast %31 : vector<1x128xf32> to vector<128x128xf32>
    %86 = arith.addf %84, %85 : vector<128x128xf32>
    %cst_88 = arith.constant 1.000000e-01 : f32
    %87 = vector.broadcast %cst_88 : f32 to vector<128x128xf32>
    %88 = arith.mulf %87, %86 : vector<128x128xf32>
    %89 = arith.maximumf %86, %88 : vector<128x128xf32>
    %c0_89 = arith.constant 0 : index
    %c0_90 = arith.constant 0 : index
    %90 = vector.load %arg13[%c0_89, %c0_90] : memref<256x128xf32, #tpu.memory_space<vmem>>, vector<128x128xf32>
    tpu.vector_store %arg13[%c0_89, %c0_90], %89 {strides = array<i32>} : memref<256x128xf32, #tpu.memory_space<vmem>>, vector<128x128xf32>,
    %c8_91 = arith.constant 8 : index
    %c0_92 = arith.constant 0 : index
    %c0_93 = arith.constant 0 : index
    %91 = vector.load %arg14[%c8_91, %c0_92, %c0_93] : memref<18x18x128xf32, #tpu.memory_space<vmem>>, vector<8x16x128xf32>
    %92 = vector.shape_cast %91 : vector<8x16x128xf32> to vector<128x128xf32>
    %c0_94 = arith.constant 0 : index
    %c0_95 = arith.constant 0 : index
    %c0_96 = arith.constant 0 : index
    %93 = vector.load %arg4[%c0_94, %c0_95, %c0_96] : memref<9x128x128xf32, #tpu.memory_space<vmem>>, vector<1x128x128xf32>
    %94 = vector.shape_cast %93 : vector<1x128x128xf32> to vector<128x128xf32>
    %cst_97 = arith.constant dense<0.000000e+00> : vector<128x128xf32>
    %95 = tpu.matmul %92, %94, %cst_97 {dimension_numbers = #tpu.dot_dimension_numbers<[1], [0], [0], [1], [0, 0, 1, 1], [], []>} : vector<128x128xf32>, vector<128x128xf32>, vector<128x128xf32> -> vector<128x128xf32>
    %c8_98 = arith.constant 8 : index
    %c1_99 = arith.constant 1 : index
    %c0_100 = arith.constant 0 : index
    %96 = vector.load %arg14[%c8_98, %c1_99, %c0_100] : memref<18x18x128xf32, #tpu.memory_space<vmem>>, vector<8x16x128xf32>
    %97 = vector.shape_cast %96 : vector<8x16x128xf32> to vector<128x128xf32>
    %c1_101 = arith.constant 1 : index
    %c0_102 = arith.constant 0 : index
    %c0_103 = arith.constant 0 : index
    %98 = vector.load %arg4[%c1_101, %c0_102, %c0_103] : memref<9x128x128xf32, #tpu.memory_space<vmem>>, vector<1x128x128xf32>
    %99 = vector.shape_cast %98 : vector<1x128x128xf32> to vector<128x128xf32>
    %cst_104 = arith.constant dense<0.000000e+00> : vector<128x128xf32>
    %100 = tpu.matmul %97, %99, %cst_104 {dimension_numbers = #tpu.dot_dimension_numbers<[1], [0], [0], [1], [0, 0, 1, 1], [], []>} : vector<128x128xf32>, vector<128x128xf32>, vector<128x128xf32> -> vector<128x128xf32>
    %101 = arith.addf %95, %100 : vector<128x128xf32>
    %c8_105 = arith.constant 8 : index
    %c2_106 = arith.constant 2 : index
    %c0_107 = arith.constant 0 : index
    %102 = vector.load %arg14[%c8_105, %c2_106, %c0_107] : memref<18x18x128xf32, #tpu.memory_space<vmem>>, vector<8x16x128xf32>
    %103 = vector.shape_cast %102 : vector<8x16x128xf32> to vector<128x128xf32>
    %c2_108 = arith.constant 2 : index
    %c0_109 = arith.constant 0 : index
    %c0_110 = arith.constant 0 : index
    %104 = vector.load %arg4[%c2_108, %c0_109, %c0_110] : memref<9x128x128xf32, #tpu.memory_space<vmem>>, vector<1x128x128xf32>
    %105 = vector.shape_cast %104 : vector<1x128x128xf32> to vector<128x128xf32>
    %cst_111 = arith.constant dense<0.000000e+00> : vector<128x128xf32>
    %106 = tpu.matmul %103, %105, %cst_111 {dimension_numbers = #tpu.dot_dimension_numbers<[1], [0], [0], [1], [0, 0, 1, 1], [], []>} : vector<128x128xf32>, vector<128x128xf32>, vector<128x128xf32> -> vector<128x128xf32>
    %107 = arith.addf %101, %106 : vector<128x128xf32>
    %c9_112 = arith.constant 9 : index
    %c0_113 = arith.constant 0 : index
    %c0_114 = arith.constant 0 : index
    %108 = vector.load %arg14[%c9_112, %c0_113, %c0_114] : memref<18x18x128xf32, #tpu.memory_space<vmem>>, vector<8x16x128xf32>
    %109 = vector.shape_cast %108 : vector<8x16x128xf32> to vector<128x128xf32>
    %c3_115 = arith.constant 3 : index
    %c0_116 = arith.constant 0 : index
    %c0_117 = arith.constant 0 : index
    %110 = vector.load %arg4[%c3_115, %c0_116, %c0_117] : memref<9x128x128xf32, #tpu.memory_space<vmem>>, vector<1x128x128xf32>
    %111 = vector.shape_cast %110 : vector<1x128x128xf32> to vector<128x128xf32>
    %cst_118 = arith.constant dense<0.000000e+00> : vector<128x128xf32>
    %112 = tpu.matmul %109, %111, %cst_118 {dimension_numbers = #tpu.dot_dimension_numbers<[1], [0], [0], [1], [0, 0, 1, 1], [], []>} : vector<128x128xf32>, vector<128x128xf32>, vector<128x128xf32> -> vector<128x128xf32>
    %113 = arith.addf %107, %112 : vector<128x128xf32>
    %c9_119 = arith.constant 9 : index
    %c1_120 = arith.constant 1 : index
    %c0_121 = arith.constant 0 : index
    %114 = vector.load %arg14[%c9_119, %c1_120, %c0_121] : memref<18x18x128xf32, #tpu.memory_space<vmem>>, vector<8x16x128xf32>
    %115 = vector.shape_cast %114 : vector<8x16x128xf32> to vector<128x128xf32>
    %c4_122 = arith.constant 4 : index
    %c0_123 = arith.constant 0 : index
    %c0_124 = arith.constant 0 : index
    %116 = vector.load %arg4[%c4_122, %c0_123, %c0_124] : memref<9x128x128xf32, #tpu.memory_space<vmem>>, vector<1x128x128xf32>
    %117 = vector.shape_cast %116 : vector<1x128x128xf32> to vector<128x128xf32>
    %cst_125 = arith.constant dense<0.000000e+00> : vector<128x128xf32>
    %118 = tpu.matmul %115, %117, %cst_125 {dimension_numbers = #tpu.dot_dimension_numbers<[1], [0], [0], [1], [0, 0, 1, 1], [], []>} : vector<128x128xf32>, vector<128x128xf32>, vector<128x128xf32> -> vector<128x128xf32>
    %119 = arith.addf %113, %118 : vector<128x128xf32>
    %c9_126 = arith.constant 9 : index
    %c2_127 = arith.constant 2 : index
    %c0_128 = arith.constant 0 : index
    %120 = vector.load %arg14[%c9_126, %c2_127, %c0_128] : memref<18x18x128xf32, #tpu.memory_space<vmem>>, vector<8x16x128xf32>
    %121 = vector.shape_cast %120 : vector<8x16x128xf32> to vector<128x128xf32>
    %c5_129 = arith.constant 5 : index
    %c0_130 = arith.constant 0 : index
    %c0_131 = arith.constant 0 : index
    %122 = vector.load %arg4[%c5_129, %c0_130, %c0_131] : memref<9x128x128xf32, #tpu.memory_space<vmem>>, vector<1x128x128xf32>
    %123 = vector.shape_cast %122 : vector<1x128x128xf32> to vector<128x128xf32>
    %cst_132 = arith.constant dense<0.000000e+00> : vector<128x128xf32>
    %124 = tpu.matmul %121, %123, %cst_132 {dimension_numbers = #tpu.dot_dimension_numbers<[1], [0], [0], [1], [0, 0, 1, 1], [], []>} : vector<128x128xf32>, vector<128x128xf32>, vector<128x128xf32> -> vector<128x128xf32>
    %125 = arith.addf %119, %124 : vector<128x128xf32>
    %c10 = arith.constant 10 : index
    %c0_133 = arith.constant 0 : index
    %c0_134 = arith.constant 0 : index
    %126 = vector.load %arg14[%c10, %c0_133, %c0_134] : memref<18x18x128xf32, #tpu.memory_space<vmem>>, vector<8x16x128xf32>
    %127 = vector.shape_cast %126 : vector<8x16x128xf32> to vector<128x128xf32>
    %c6_135 = arith.constant 6 : index
    %c0_136 = arith.constant 0 : index
    %c0_137 = arith.constant 0 : index
    %128 = vector.load %arg4[%c6_135, %c0_136, %c0_137] : memref<9x128x128xf32, #tpu.memory_space<vmem>>, vector<1x128x128xf32>
    %129 = vector.shape_cast %128 : vector<1x128x128xf32> to vector<128x128xf32>
    %cst_138 = arith.constant dense<0.000000e+00> : vector<128x128xf32>
    %130 = tpu.matmul %127, %129, %cst_138 {dimension_numbers = #tpu.dot_dimension_numbers<[1], [0], [0], [1], [0, 0, 1, 1], [], []>} : vector<128x128xf32>, vector<128x128xf32>, vector<128x128xf32> -> vector<128x128xf32>
    %131 = arith.addf %125, %130 : vector<128x128xf32>
    %c10_139 = arith.constant 10 : index
    %c1_140 = arith.constant 1 : index
    %c0_141 = arith.constant 0 : index
    %132 = vector.load %arg14[%c10_139, %c1_140, %c0_141] : memref<18x18x128xf32, #tpu.memory_space<vmem>>, vector<8x16x128xf32>
    %133 = vector.shape_cast %132 : vector<8x16x128xf32> to vector<128x128xf32>
    %c7_142 = arith.constant 7 : index
    %c0_143 = arith.constant 0 : index
    %c0_144 = arith.constant 0 : index
    %134 = vector.load %arg4[%c7_142, %c0_143, %c0_144] : memref<9x128x128xf32, #tpu.memory_space<vmem>>, vector<1x128x128xf32>
    %135 = vector.shape_cast %134 : vector<1x128x128xf32> to vector<128x128xf32>
    %cst_145 = arith.constant dense<0.000000e+00> : vector<128x128xf32>
    %136 = tpu.matmul %133, %135, %cst_145 {dimension_numbers = #tpu.dot_dimension_numbers<[1], [0], [0], [1], [0, 0, 1, 1], [], []>} : vector<128x128xf32>, vector<128x128xf32>, vector<128x128xf32> -> vector<128x128xf32>
    %137 = arith.addf %131, %136 : vector<128x128xf32>
    %c10_146 = arith.constant 10 : index
    %c2_147 = arith.constant 2 : index
    %c0_148 = arith.constant 0 : index
    %138 = vector.load %arg14[%c10_146, %c2_147, %c0_148] : memref<18x18x128xf32, #tpu.memory_space<vmem>>, vector<8x16x128xf32>
    %139 = vector.shape_cast %138 : vector<8x16x128xf32> to vector<128x128xf32>
    %c8_149 = arith.constant 8 : index
    %c0_150 = arith.constant 0 : index
    %c0_151 = arith.constant 0 : index
    %140 = vector.load %arg4[%c8_149, %c0_150, %c0_151] : memref<9x128x128xf32, #tpu.memory_space<vmem>>, vector<1x128x128xf32>
    %141 = vector.shape_cast %140 : vector<1x128x128xf32> to vector<128x128xf32>
    %cst_152 = arith.constant dense<0.000000e+00> : vector<128x128xf32>
    %142 = tpu.matmul %139, %141, %cst_152 {dimension_numbers = #tpu.dot_dimension_numbers<[1], [0], [0], [1], [0, 0, 1, 1], [], []>} : vector<128x128xf32>, vector<128x128xf32>, vector<128x128xf32> -> vector<128x128xf32>
    %143 = arith.addf %137, %142 : vector<128x128xf32>
    %144 = vector.broadcast %31 : vector<1x128xf32> to vector<128x128xf32>
    %145 = arith.addf %143, %144 : vector<128x128xf32>
    %cst_153 = arith.constant 1.000000e-01 : f32
    %146 = vector.broadcast %cst_153 : f32 to vector<128x128xf32>
    %147 = arith.mulf %146, %145 : vector<128x128xf32>
    %148 = arith.maximumf %145, %147 : vector<128x128xf32>
    %c128_154 = arith.constant 128 : index
    %c0_155 = arith.constant 0 : index
    %149 = vector.load %arg13[%c128_154, %c0_155] : memref<256x128xf32, #tpu.memory_space<vmem>>, vector<128x128xf32>
    tpu.vector_store %arg13[%c128_154, %c0_155], %148 {strides = array<i32>} : memref<256x128xf32, #tpu.memory_space<vmem>>, vector<128x128xf32>,
    %c0_156 = arith.constant 0 : index
    %c0_157 = arith.constant 0 : index
    %c0_158 = arith.constant 0 : index
    %150 = vector.load %arg6[%c0_156, %c0_157, %c0_158] : memref<1x128x128xf32, #tpu.memory_space<vmem>>, vector<1x128x128xf32>
    %151 = vector.shape_cast %150 : vector<1x128x128xf32> to vector<128x128xf32>
    %c0_159 = arith.constant 0 : index
    %c0_160 = arith.constant 0 : index
    %152 = vector.load %arg7[%c0_159, %c0_160] : memref<1x128xf32, #tpu.memory_space<vmem>>, vector<1x128xf32>
    %c0_161 = arith.constant 0 : index
    %c0_162 = arith.constant 0 : index
    %153 = vector.load %arg13[%c0_161, %c0_162] : memref<256x128xf32, #tpu.memory_space<vmem>>, vector<128x128xf32>
    %cst_163 = arith.constant dense<0.000000e+00> : vector<128x128xf32>
    %154 = tpu.matmul %153, %151, %cst_163 {dimension_numbers = #tpu.dot_dimension_numbers<[1], [0], [0], [1], [0, 0, 1, 1], [], []>} : vector<128x128xf32>, vector<128x128xf32>, vector<128x128xf32> -> vector<128x128xf32>
    %155 = vector.broadcast %152 : vector<1x128xf32> to vector<128x128xf32>
    %156 = arith.addf %154, %155 : vector<128x128xf32>
    %cst_164 = arith.constant 1.000000e-01 : f32
    %157 = vector.broadcast %cst_164 : f32 to vector<128x128xf32>
    %158 = arith.mulf %157, %156 : vector<128x128xf32>
    %159 = arith.maximumf %156, %158 : vector<128x128xf32>
    %c0_165 = arith.constant 0 : index
    %c0_166 = arith.constant 0 : index
    %160 = vector.load %arg13[%c0_165, %c0_166] : memref<256x128xf32, #tpu.memory_space<vmem>>, vector<128x128xf32>
    tpu.vector_store %arg13[%c0_165, %c0_166], %159 {strides = array<i32>} : memref<256x128xf32, #tpu.memory_space<vmem>>, vector<128x128xf32>,
    %c128_167 = arith.constant 128 : index
    %c0_168 = arith.constant 0 : index
    %161 = vector.load %arg13[%c128_167, %c0_168] : memref<256x128xf32, #tpu.memory_space<vmem>>, vector<128x128xf32>
    %cst_169 = arith.constant dense<0.000000e+00> : vector<128x128xf32>
    %162 = tpu.matmul %161, %151, %cst_169 {dimension_numbers = #tpu.dot_dimension_numbers<[1], [0], [0], [1], [0, 0, 1, 1], [], []>} : vector<128x128xf32>, vector<128x128xf32>, vector<128x128xf32> -> vector<128x128xf32>
    %163 = vector.broadcast %152 : vector<1x128xf32> to vector<128x128xf32>
    %164 = arith.addf %162, %163 : vector<128x128xf32>
    %cst_170 = arith.constant 1.000000e-01 : f32
    %165 = vector.broadcast %cst_170 : f32 to vector<128x128xf32>
    %166 = arith.mulf %165, %164 : vector<128x128xf32>
    %167 = arith.maximumf %164, %166 : vector<128x128xf32>
    %c128_171 = arith.constant 128 : index
    %c0_172 = arith.constant 0 : index
    %168 = vector.load %arg13[%c128_171, %c0_172] : memref<256x128xf32, #tpu.memory_space<vmem>>, vector<128x128xf32>
    tpu.vector_store %arg13[%c128_171, %c0_172], %167 {strides = array<i32>} : memref<256x128xf32, #tpu.memory_space<vmem>>, vector<128x128xf32>,
    %c0_173 = arith.constant 0 : index
    %c0_174 = arith.constant 0 : index
    %169 = vector.load %arg13[%c0_173, %c0_174] : memref<256x128xf32, #tpu.memory_space<vmem>>, vector<128x128xf32>
    %170 = vector.shape_cast %169 : vector<128x128xf32> to vector<8x16x128xf32>
    %c1_175 = arith.constant 1 : index
    %c1_176 = arith.constant 1 : index
    %c0_177 = arith.constant 0 : index
    %171 = vector.load %arg14[%c1_175, %c1_176, %c0_177] : memref<18x18x128xf32, #tpu.memory_space<vmem>>, vector<8x16x128xf32>
    tpu.vector_store %arg14[%c1_175, %c1_176, %c0_177], %170 {strides = array<i32>} : memref<18x18x128xf32, #tpu.memory_space<vmem>>, vector<8x16x128xf32>,
    %c128_178 = arith.constant 128 : index
    %c0_179 = arith.constant 0 : index
    %172 = vector.load %arg13[%c128_178, %c0_179] : memref<256x128xf32, #tpu.memory_space<vmem>>, vector<128x128xf32>
    %173 = vector.shape_cast %172 : vector<128x128xf32> to vector<8x16x128xf32>
    %c9_180 = arith.constant 9 : index
    %c1_181 = arith.constant 1 : index
    %c0_182 = arith.constant 0 : index
    %174 = vector.load %arg14[%c9_180, %c1_181, %c0_182] : memref<18x18x128xf32, #tpu.memory_space<vmem>>, vector<8x16x128xf32>
    tpu.vector_store %arg14[%c9_180, %c1_181, %c0_182], %173 {strides = array<i32>} : memref<18x18x128xf32, #tpu.memory_space<vmem>>, vector<8x16x128xf32>,
    %c0_183 = arith.constant 0 : index
    %c0_184 = arith.constant 0 : index
    %175 = vector.load %arg9[%c0_183, %c0_184] : memref<1x128xf32, #tpu.memory_space<vmem>>, vector<1x128xf32>
    %c0_185 = arith.constant 0 : index
    %c0_186 = arith.constant 0 : index
    %c0_187 = arith.constant 0 : index
    %176 = vector.load %arg14[%c0_185, %c0_186, %c0_187] : memref<18x18x128xf32, #tpu.memory_space<vmem>>, vector<8x16x128xf32>
    %177 = vector.shape_cast %176 : vector<8x16x128xf32> to vector<128x128xf32>
    %c0_188 = arith.constant 0 : index
    %c0_189 = arith.constant 0 : index
    %c0_190 = arith.constant 0 : index
    %178 = vector.load %arg8[%c0_188, %c0_189, %c0_190] : memref<9x128x128xf32, #tpu.memory_space<vmem>>, vector<1x128x128xf32>
    %179 = vector.shape_cast %178 : vector<1x128x128xf32> to vector<128x128xf32>
    %cst_191 = arith.constant dense<0.000000e+00> : vector<128x128xf32>
    %180 = tpu.matmul %177, %179, %cst_191 {dimension_numbers = #tpu.dot_dimension_numbers<[1], [0], [0], [1], [0, 0, 1, 1], [], []>} : vector<128x128xf32>, vector<128x128xf32>, vector<128x128xf32> -> vector<128x128xf32>
    %c0_192 = arith.constant 0 : index
    %c1_193 = arith.constant 1 : index
    %c0_194 = arith.constant 0 : index
    %181 = vector.load %arg14[%c0_192, %c1_193, %c0_194] : memref<18x18x128xf32, #tpu.memory_space<vmem>>, vector<8x16x128xf32>
    %182 = vector.shape_cast %181 : vector<8x16x128xf32> to vector<128x128xf32>
    %c1_195 = arith.constant 1 : index
    %c0_196 = arith.constant 0 : index
    %c0_197 = arith.constant 0 : index
    %183 = vector.load %arg8[%c1_195, %c0_196, %c0_197] : memref<9x128x128xf32, #tpu.memory_space<vmem>>, vector<1x128x128xf32>
    %184 = vector.shape_cast %183 : vector<1x128x128xf32> to vector<128x128xf32>
    %cst_198 = arith.constant dense<0.000000e+00> : vector<128x128xf32>
    %185 = tpu.matmul %182, %184, %cst_198 {dimension_numbers = #tpu.dot_dimension_numbers<[1], [0], [0], [1], [0, 0, 1, 1], [], []>} : vector<128x128xf32>, vector<128x128xf32>, vector<128x128xf32> -> vector<128x128xf32>
    %186 = arith.addf %180, %185 : vector<128x128xf32>
    %c0_199 = arith.constant 0 : index
    %c2_200 = arith.constant 2 : index
    %c0_201 = arith.constant 0 : index
    %187 = vector.load %arg14[%c0_199, %c2_200, %c0_201] : memref<18x18x128xf32, #tpu.memory_space<vmem>>, vector<8x16x128xf32>
    %188 = vector.shape_cast %187 : vector<8x16x128xf32> to vector<128x128xf32>
    %c2_202 = arith.constant 2 : index
    %c0_203 = arith.constant 0 : index
    %c0_204 = arith.constant 0 : index
    %189 = vector.load %arg8[%c2_202, %c0_203, %c0_204] : memref<9x128x128xf32, #tpu.memory_space<vmem>>, vector<1x128x128xf32>
    %190 = vector.shape_cast %189 : vector<1x128x128xf32> to vector<128x128xf32>
    %cst_205 = arith.constant dense<0.000000e+00> : vector<128x128xf32>
    %191 = tpu.matmul %188, %190, %cst_205 {dimension_numbers = #tpu.dot_dimension_numbers<[1], [0], [0], [1], [0, 0, 1, 1], [], []>} : vector<128x128xf32>, vector<128x128xf32>, vector<128x128xf32> -> vector<128x128xf32>
    %192 = arith.addf %186, %191 : vector<128x128xf32>
    %c1_206 = arith.constant 1 : index
    %c0_207 = arith.constant 0 : index
    %c0_208 = arith.constant 0 : index
    %193 = vector.load %arg14[%c1_206, %c0_207, %c0_208] : memref<18x18x128xf32, #tpu.memory_space<vmem>>, vector<8x16x128xf32>
    %194 = vector.shape_cast %193 : vector<8x16x128xf32> to vector<128x128xf32>
    %c3_209 = arith.constant 3 : index
    %c0_210 = arith.constant 0 : index
    %c0_211 = arith.constant 0 : index
    %195 = vector.load %arg8[%c3_209, %c0_210, %c0_211] : memref<9x128x128xf32, #tpu.memory_space<vmem>>, vector<1x128x128xf32>
    %196 = vector.shape_cast %195 : vector<1x128x128xf32> to vector<128x128xf32>
    %cst_212 = arith.constant dense<0.000000e+00> : vector<128x128xf32>
    %197 = tpu.matmul %194, %196, %cst_212 {dimension_numbers = #tpu.dot_dimension_numbers<[1], [0], [0], [1], [0, 0, 1, 1], [], []>} : vector<128x128xf32>, vector<128x128xf32>, vector<128x128xf32> -> vector<128x128xf32>
    %198 = arith.addf %192, %197 : vector<128x128xf32>
    %c1_213 = arith.constant 1 : index
    %c1_214 = arith.constant 1 : index
    %c0_215 = arith.constant 0 : index
    %199 = vector.load %arg14[%c1_213, %c1_214, %c0_215] : memref<18x18x128xf32, #tpu.memory_space<vmem>>, vector<8x16x128xf32>
    %200 = vector.shape_cast %199 : vector<8x16x128xf32> to vector<128x128xf32>
    %c4_216 = arith.constant 4 : index
    %c0_217 = arith.constant 0 : index
    %c0_218 = arith.constant 0 : index
    %201 = vector.load %arg8[%c4_216, %c0_217, %c0_218] : memref<9x128x128xf32, #tpu.memory_space<vmem>>, vector<1x128x128xf32>
    %202 = vector.shape_cast %201 : vector<1x128x128xf32> to vector<128x128xf32>
    %cst_219 = arith.constant dense<0.000000e+00> : vector<128x128xf32>
    %203 = tpu.matmul %200, %202, %cst_219 {dimension_numbers = #tpu.dot_dimension_numbers<[1], [0], [0], [1], [0, 0, 1, 1], [], []>} : vector<128x128xf32>, vector<128x128xf32>, vector<128x128xf32> -> vector<128x128xf32>
    %204 = arith.addf %198, %203 : vector<128x128xf32>
    %c1_220 = arith.constant 1 : index
    %c2_221 = arith.constant 2 : index
    %c0_222 = arith.constant 0 : index
    %205 = vector.load %arg14[%c1_220, %c2_221, %c0_222] : memref<18x18x128xf32, #tpu.memory_space<vmem>>, vector<8x16x128xf32>
    %206 = vector.shape_cast %205 : vector<8x16x128xf32> to vector<128x128xf32>
    %c5_223 = arith.constant 5 : index
    %c0_224 = arith.constant 0 : index
    %c0_225 = arith.constant 0 : index
    %207 = vector.load %arg8[%c5_223, %c0_224, %c0_225] : memref<9x128x128xf32, #tpu.memory_space<vmem>>, vector<1x128x128xf32>
    %208 = vector.shape_cast %207 : vector<1x128x128xf32> to vector<128x128xf32>
    %cst_226 = arith.constant dense<0.000000e+00> : vector<128x128xf32>
    %209 = tpu.matmul %206, %208, %cst_226 {dimension_numbers = #tpu.dot_dimension_numbers<[1], [0], [0], [1], [0, 0, 1, 1], [], []>} : vector<128x128xf32>, vector<128x128xf32>, vector<128x128xf32> -> vector<128x128xf32>
    %210 = arith.addf %204, %209 : vector<128x128xf32>
    %c2_227 = arith.constant 2 : index
    %c0_228 = arith.constant 0 : index
    %c0_229 = arith.constant 0 : index
    %211 = vector.load %arg14[%c2_227, %c0_228, %c0_229] : memref<18x18x128xf32, #tpu.memory_space<vmem>>, vector<8x16x128xf32>
    %212 = vector.shape_cast %211 : vector<8x16x128xf32> to vector<128x128xf32>
    %c6_230 = arith.constant 6 : index
    %c0_231 = arith.constant 0 : index
    %c0_232 = arith.constant 0 : index
    %213 = vector.load %arg8[%c6_230, %c0_231, %c0_232] : memref<9x128x128xf32, #tpu.memory_space<vmem>>, vector<1x128x128xf32>
    %214 = vector.shape_cast %213 : vector<1x128x128xf32> to vector<128x128xf32>
    %cst_233 = arith.constant dense<0.000000e+00> : vector<128x128xf32>
    %215 = tpu.matmul %212, %214, %cst_233 {dimension_numbers = #tpu.dot_dimension_numbers<[1], [0], [0], [1], [0, 0, 1, 1], [], []>} : vector<128x128xf32>, vector<128x128xf32>, vector<128x128xf32> -> vector<128x128xf32>
    %216 = arith.addf %210, %215 : vector<128x128xf32>
    %c2_234 = arith.constant 2 : index
    %c1_235 = arith.constant 1 : index
    %c0_236 = arith.constant 0 : index
    %217 = vector.load %arg14[%c2_234, %c1_235, %c0_236] : memref<18x18x128xf32, #tpu.memory_space<vmem>>, vector<8x16x128xf32>
    %218 = vector.shape_cast %217 : vector<8x16x128xf32> to vector<128x128xf32>
    %c7_237 = arith.constant 7 : index
    %c0_238 = arith.constant 0 : index
    %c0_239 = arith.constant 0 : index
    %219 = vector.load %arg8[%c7_237, %c0_238, %c0_239] : memref<9x128x128xf32, #tpu.memory_space<vmem>>, vector<1x128x128xf32>
    %220 = vector.shape_cast %219 : vector<1x128x128xf32> to vector<128x128xf32>
    %cst_240 = arith.constant dense<0.000000e+00> : vector<128x128xf32>
    %221 = tpu.matmul %218, %220, %cst_240 {dimension_numbers = #tpu.dot_dimension_numbers<[1], [0], [0], [1], [0, 0, 1, 1], [], []>} : vector<128x128xf32>, vector<128x128xf32>, vector<128x128xf32> -> vector<128x128xf32>
    %222 = arith.addf %216, %221 : vector<128x128xf32>
    %c2_241 = arith.constant 2 : index
    %c2_242 = arith.constant 2 : index
    %c0_243 = arith.constant 0 : index
    %223 = vector.load %arg14[%c2_241, %c2_242, %c0_243] : memref<18x18x128xf32, #tpu.memory_space<vmem>>, vector<8x16x128xf32>
    %224 = vector.shape_cast %223 : vector<8x16x128xf32> to vector<128x128xf32>
    %c8_244 = arith.constant 8 : index
    %c0_245 = arith.constant 0 : index
    %c0_246 = arith.constant 0 : index
    %225 = vector.load %arg8[%c8_244, %c0_245, %c0_246] : memref<9x128x128xf32, #tpu.memory_space<vmem>>, vector<1x128x128xf32>
    %226 = vector.shape_cast %225 : vector<1x128x128xf32> to vector<128x128xf32>
    %cst_247 = arith.constant dense<0.000000e+00> : vector<128x128xf32>
    %227 = tpu.matmul %224, %226, %cst_247 {dimension_numbers = #tpu.dot_dimension_numbers<[1], [0], [0], [1], [0, 0, 1, 1], [], []>} : vector<128x128xf32>, vector<128x128xf32>, vector<128x128xf32> -> vector<128x128xf32>
    %228 = arith.addf %222, %227 : vector<128x128xf32>
    %229 = vector.broadcast %175 : vector<1x128xf32> to vector<128x128xf32>
    %230 = arith.addf %228, %229 : vector<128x128xf32>
    %cst_248 = arith.constant 1.000000e-01 : f32
    %231 = vector.broadcast %cst_248 : f32 to vector<128x128xf32>
    %232 = arith.mulf %231, %230 : vector<128x128xf32>
    %233 = arith.maximumf %230, %232 : vector<128x128xf32>
    %c0_249 = arith.constant 0 : index
    %c0_250 = arith.constant 0 : index
    %234 = vector.load %arg13[%c0_249, %c0_250] : memref<256x128xf32, #tpu.memory_space<vmem>>, vector<128x128xf32>
    tpu.vector_store %arg13[%c0_249, %c0_250], %233 {strides = array<i32>} : memref<256x128xf32, #tpu.memory_space<vmem>>, vector<128x128xf32>,
    %c8_251 = arith.constant 8 : index
    %c0_252 = arith.constant 0 : index
    %c0_253 = arith.constant 0 : index
    %235 = vector.load %arg14[%c8_251, %c0_252, %c0_253] : memref<18x18x128xf32, #tpu.memory_space<vmem>>, vector<8x16x128xf32>
    %236 = vector.shape_cast %235 : vector<8x16x128xf32> to vector<128x128xf32>
    %c0_254 = arith.constant 0 : index
    %c0_255 = arith.constant 0 : index
    %c0_256 = arith.constant 0 : index
    %237 = vector.load %arg8[%c0_254, %c0_255, %c0_256] : memref<9x128x128xf32, #tpu.memory_space<vmem>>, vector<1x128x128xf32>
    %238 = vector.shape_cast %237 : vector<1x128x128xf32> to vector<128x128xf32>
    %cst_257 = arith.constant dense<0.000000e+00> : vector<128x128xf32>
    %239 = tpu.matmul %236, %238, %cst_257 {dimension_numbers = #tpu.dot_dimension_numbers<[1], [0], [0], [1], [0, 0, 1, 1], [], []>} : vector<128x128xf32>, vector<128x128xf32>, vector<128x128xf32> -> vector<128x128xf32>
    %c8_258 = arith.constant 8 : index
    %c1_259 = arith.constant 1 : index
    %c0_260 = arith.constant 0 : index
    %240 = vector.load %arg14[%c8_258, %c1_259, %c0_260] : memref<18x18x128xf32, #tpu.memory_space<vmem>>, vector<8x16x128xf32>
    %241 = vector.shape_cast %240 : vector<8x16x128xf32> to vector<128x128xf32>
    %c1_261 = arith.constant 1 : index
    %c0_262 = arith.constant 0 : index
    %c0_263 = arith.constant 0 : index
    %242 = vector.load %arg8[%c1_261, %c0_262, %c0_263] : memref<9x128x128xf32, #tpu.memory_space<vmem>>, vector<1x128x128xf32>
    %243 = vector.shape_cast %242 : vector<1x128x128xf32> to vector<128x128xf32>
    %cst_264 = arith.constant dense<0.000000e+00> : vector<128x128xf32>
    %244 = tpu.matmul %241, %243, %cst_264 {dimension_numbers = #tpu.dot_dimension_numbers<[1], [0], [0], [1], [0, 0, 1, 1], [], []>} : vector<128x128xf32>, vector<128x128xf32>, vector<128x128xf32> -> vector<128x128xf32>
    %245 = arith.addf %239, %244 : vector<128x128xf32>
    %c8_265 = arith.constant 8 : index
    %c2_266 = arith.constant 2 : index
    %c0_267 = arith.constant 0 : index
    %246 = vector.load %arg14[%c8_265, %c2_266, %c0_267] : memref<18x18x128xf32, #tpu.memory_space<vmem>>, vector<8x16x128xf32>
    %247 = vector.shape_cast %246 : vector<8x16x128xf32> to vector<128x128xf32>
    %c2_268 = arith.constant 2 : index
    %c0_269 = arith.constant 0 : index
    %c0_270 = arith.constant 0 : index
    %248 = vector.load %arg8[%c2_268, %c0_269, %c0_270] : memref<9x128x128xf32, #tpu.memory_space<vmem>>, vector<1x128x128xf32>
    %249 = vector.shape_cast %248 : vector<1x128x128xf32> to vector<128x128xf32>
    %cst_271 = arith.constant dense<0.000000e+00> : vector<128x128xf32>
    %250 = tpu.matmul %247, %249, %cst_271 {dimension_numbers = #tpu.dot_dimension_numbers<[1], [0], [0], [1], [0, 0, 1, 1], [], []>} : vector<128x128xf32>, vector<128x128xf32>, vector<128x128xf32> -> vector<128x128xf32>
    %251 = arith.addf %245, %250 : vector<128x128xf32>
    %c9_272 = arith.constant 9 : index
    %c0_273 = arith.constant 0 : index
    %c0_274 = arith.constant 0 : index
    %252 = vector.load %arg14[%c9_272, %c0_273, %c0_274] : memref<18x18x128xf32, #tpu.memory_space<vmem>>, vector<8x16x128xf32>
    %253 = vector.shape_cast %252 : vector<8x16x128xf32> to vector<128x128xf32>
    %c3_275 = arith.constant 3 : index
    %c0_276 = arith.constant 0 : index
    %c0_277 = arith.constant 0 : index
    %254 = vector.load %arg8[%c3_275, %c0_276, %c0_277] : memref<9x128x128xf32, #tpu.memory_space<vmem>>, vector<1x128x128xf32>
    %255 = vector.shape_cast %254 : vector<1x128x128xf32> to vector<128x128xf32>
    %cst_278 = arith.constant dense<0.000000e+00> : vector<128x128xf32>
    %256 = tpu.matmul %253, %255, %cst_278 {dimension_numbers = #tpu.dot_dimension_numbers<[1], [0], [0], [1], [0, 0, 1, 1], [], []>} : vector<128x128xf32>, vector<128x128xf32>, vector<128x128xf32> -> vector<128x128xf32>
    %257 = arith.addf %251, %256 : vector<128x128xf32>
    %c9_279 = arith.constant 9 : index
    %c1_280 = arith.constant 1 : index
    %c0_281 = arith.constant 0 : index
    %258 = vector.load %arg14[%c9_279, %c1_280, %c0_281] : memref<18x18x128xf32, #tpu.memory_space<vmem>>, vector<8x16x128xf32>
    %259 = vector.shape_cast %258 : vector<8x16x128xf32> to vector<128x128xf32>
    %c4_282 = arith.constant 4 : index
    %c0_283 = arith.constant 0 : index
    %c0_284 = arith.constant 0 : index
    %260 = vector.load %arg8[%c4_282, %c0_283, %c0_284] : memref<9x128x128xf32, #tpu.memory_space<vmem>>, vector<1x128x128xf32>
    %261 = vector.shape_cast %260 : vector<1x128x128xf32> to vector<128x128xf32>
    %cst_285 = arith.constant dense<0.000000e+00> : vector<128x128xf32>
    %262 = tpu.matmul %259, %261, %cst_285 {dimension_numbers = #tpu.dot_dimension_numbers<[1], [0], [0], [1], [0, 0, 1, 1], [], []>} : vector<128x128xf32>, vector<128x128xf32>, vector<128x128xf32> -> vector<128x128xf32>
    %263 = arith.addf %257, %262 : vector<128x128xf32>
    %c9_286 = arith.constant 9 : index
    %c2_287 = arith.constant 2 : index
    %c0_288 = arith.constant 0 : index
    %264 = vector.load %arg14[%c9_286, %c2_287, %c0_288] : memref<18x18x128xf32, #tpu.memory_space<vmem>>, vector<8x16x128xf32>
    %265 = vector.shape_cast %264 : vector<8x16x128xf32> to vector<128x128xf32>
    %c5_289 = arith.constant 5 : index
    %c0_290 = arith.constant 0 : index
    %c0_291 = arith.constant 0 : index
    %266 = vector.load %arg8[%c5_289, %c0_290, %c0_291] : memref<9x128x128xf32, #tpu.memory_space<vmem>>, vector<1x128x128xf32>
    %267 = vector.shape_cast %266 : vector<1x128x128xf32> to vector<128x128xf32>
    %cst_292 = arith.constant dense<0.000000e+00> : vector<128x128xf32>
    %268 = tpu.matmul %265, %267, %cst_292 {dimension_numbers = #tpu.dot_dimension_numbers<[1], [0], [0], [1], [0, 0, 1, 1], [], []>} : vector<128x128xf32>, vector<128x128xf32>, vector<128x128xf32> -> vector<128x128xf32>
    %269 = arith.addf %263, %268 : vector<128x128xf32>
    %c10_293 = arith.constant 10 : index
    %c0_294 = arith.constant 0 : index
    %c0_295 = arith.constant 0 : index
    %270 = vector.load %arg14[%c10_293, %c0_294, %c0_295] : memref<18x18x128xf32, #tpu.memory_space<vmem>>, vector<8x16x128xf32>
    %271 = vector.shape_cast %270 : vector<8x16x128xf32> to vector<128x128xf32>
    %c6_296 = arith.constant 6 : index
    %c0_297 = arith.constant 0 : index
    %c0_298 = arith.constant 0 : index
    %272 = vector.load %arg8[%c6_296, %c0_297, %c0_298] : memref<9x128x128xf32, #tpu.memory_space<vmem>>, vector<1x128x128xf32>
    %273 = vector.shape_cast %272 : vector<1x128x128xf32> to vector<128x128xf32>
    %cst_299 = arith.constant dense<0.000000e+00> : vector<128x128xf32>
    %274 = tpu.matmul %271, %273, %cst_299 {dimension_numbers = #tpu.dot_dimension_numbers<[1], [0], [0], [1], [0, 0, 1, 1], [], []>} : vector<128x128xf32>, vector<128x128xf32>, vector<128x128xf32> -> vector<128x128xf32>
    %275 = arith.addf %269, %274 : vector<128x128xf32>
    %c10_300 = arith.constant 10 : index
    %c1_301 = arith.constant 1 : index
    %c0_302 = arith.constant 0 : index
    %276 = vector.load %arg14[%c10_300, %c1_301, %c0_302] : memref<18x18x128xf32, #tpu.memory_space<vmem>>, vector<8x16x128xf32>
    %277 = vector.shape_cast %276 : vector<8x16x128xf32> to vector<128x128xf32>
    %c7_303 = arith.constant 7 : index
    %c0_304 = arith.constant 0 : index
    %c0_305 = arith.constant 0 : index
    %278 = vector.load %arg8[%c7_303, %c0_304, %c0_305] : memref<9x128x128xf32, #tpu.memory_space<vmem>>, vector<1x128x128xf32>
    %279 = vector.shape_cast %278 : vector<1x128x128xf32> to vector<128x128xf32>
    %cst_306 = arith.constant dense<0.000000e+00> : vector<128x128xf32>
    %280 = tpu.matmul %277, %279, %cst_306 {dimension_numbers = #tpu.dot_dimension_numbers<[1], [0], [0], [1], [0, 0, 1, 1], [], []>} : vector<128x128xf32>, vector<128x128xf32>, vector<128x128xf32> -> vector<128x128xf32>
    %281 = arith.addf %275, %280 : vector<128x128xf32>
    %c10_307 = arith.constant 10 : index
    %c2_308 = arith.constant 2 : index
    %c0_309 = arith.constant 0 : index
    %282 = vector.load %arg14[%c10_307, %c2_308, %c0_309] : memref<18x18x128xf32, #tpu.memory_space<vmem>>, vector<8x16x128xf32>
    %283 = vector.shape_cast %282 : vector<8x16x128xf32> to vector<128x128xf32>
    %c8_310 = arith.constant 8 : index
    %c0_311 = arith.constant 0 : index
    %c0_312 = arith.constant 0 : index
    %284 = vector.load %arg8[%c8_310, %c0_311, %c0_312] : memref<9x128x128xf32, #tpu.memory_space<vmem>>, vector<1x128x128xf32>
    %285 = vector.shape_cast %284 : vector<1x128x128xf32> to vector<128x128xf32>
    %cst_313 = arith.constant dense<0.000000e+00> : vector<128x128xf32>
    %286 = tpu.matmul %283, %285, %cst_313 {dimension_numbers = #tpu.dot_dimension_numbers<[1], [0], [0], [1], [0, 0, 1, 1], [], []>} : vector<128x128xf32>, vector<128x128xf32>, vector<128x128xf32> -> vector<128x128xf32>
    %287 = arith.addf %281, %286 : vector<128x128xf32>
    %288 = vector.broadcast %175 : vector<1x128xf32> to vector<128x128xf32>
    %289 = arith.addf %287, %288 : vector<128x128xf32>
    %cst_314 = arith.constant 1.000000e-01 : f32
    %290 = vector.broadcast %cst_314 : f32 to vector<128x128xf32>
    %291 = arith.mulf %290, %289 : vector<128x128xf32>
    %292 = arith.maximumf %289, %291 : vector<128x128xf32>
    %c128_315 = arith.constant 128 : index
    %c0_316 = arith.constant 0 : index
    %293 = vector.load %arg13[%c128_315, %c0_316] : memref<256x128xf32, #tpu.memory_space<vmem>>, vector<128x128xf32>
    tpu.vector_store %arg13[%c128_315, %c0_316], %292 {strides = array<i32>} : memref<256x128xf32, #tpu.memory_space<vmem>>, vector<128x128xf32>,
    %c0_317 = arith.constant 0 : index
    %c0_318 = arith.constant 0 : index
    %c0_319 = arith.constant 0 : index
    %294 = vector.load %arg10[%c0_317, %c0_318, %c0_319] : memref<1x128x128xf32, #tpu.memory_space<vmem>>, vector<1x128x128xf32>
    %295 = vector.shape_cast %294 : vector<1x128x128xf32> to vector<128x128xf32>
    %c0_320 = arith.constant 0 : index
    %c0_321 = arith.constant 0 : index
    %296 = vector.load %arg11[%c0_320, %c0_321] : memref<1x128xf32, #tpu.memory_space<vmem>>, vector<1x128xf32>
    %c0_322 = arith.constant 0 : index
    %c0_323 = arith.constant 0 : index
    %297 = vector.load %arg13[%c0_322, %c0_323] : memref<256x128xf32, #tpu.memory_space<vmem>>, vector<128x128xf32>
    %cst_324 = arith.constant dense<0.000000e+00> : vector<128x128xf32>
    %298 = tpu.matmul %297, %295, %cst_324 {dimension_numbers = #tpu.dot_dimension_numbers<[1], [0], [0], [1], [0, 0, 1, 1], [], []>} : vector<128x128xf32>, vector<128x128xf32>, vector<128x128xf32> -> vector<128x128xf32>
    %299 = vector.broadcast %296 : vector<1x128xf32> to vector<128x128xf32>
    %300 = arith.addf %298, %299 : vector<128x128xf32>
    %cst_325 = arith.constant 1.000000e-01 : f32
    %301 = vector.broadcast %cst_325 : f32 to vector<128x128xf32>
    %302 = arith.mulf %301, %300 : vector<128x128xf32>
    %303 = arith.maximumf %300, %302 : vector<128x128xf32>
    %304 = vector.shape_cast %303 : vector<128x128xf32> to vector<8x16x128xf32>
    %c0_326 = arith.constant 0 : index
    %c0_327 = arith.constant 0 : index
    %c0_328 = arith.constant 0 : index
    %c0_329 = arith.constant 0 : index
    %305 = vector.load %arg12[%c0_326, %c0_327, %c0_328, %c0_329] : memref<1x16x16x128xf32, #tpu.memory_space<vmem>>, vector<1x8x16x128xf32>
    %306 = vector.shape_cast %305 : vector<1x8x16x128xf32> to vector<8x16x128xf32>
    %307 = vector.shape_cast %304 : vector<8x16x128xf32> to vector<1x8x16x128xf32>
    tpu.vector_store %arg12[%c0_326, %c0_327, %c0_328, %c0_329], %307 {strides = array<i32>} : memref<1x16x16x128xf32, #tpu.memory_space<vmem>>, vector<1x8x16x128xf32>,
    %c128_330 = arith.constant 128 : index
    %c0_331 = arith.constant 0 : index
    %308 = vector.load %arg13[%c128_330, %c0_331] : memref<256x128xf32, #tpu.memory_space<vmem>>, vector<128x128xf32>
    %cst_332 = arith.constant dense<0.000000e+00> : vector<128x128xf32>
    %309 = tpu.matmul %308, %295, %cst_332 {dimension_numbers = #tpu.dot_dimension_numbers<[1], [0], [0], [1], [0, 0, 1, 1], [], []>} : vector<128x128xf32>, vector<128x128xf32>, vector<128x128xf32> -> vector<128x128xf32>
    %310 = vector.broadcast %296 : vector<1x128xf32> to vector<128x128xf32>
    %311 = arith.addf %309, %310 : vector<128x128xf32>
    %cst_333 = arith.constant 1.000000e-01 : f32
    %312 = vector.broadcast %cst_333 : f32 to vector<128x128xf32>
    %313 = arith.mulf %312, %311 : vector<128x128xf32>
    %314 = arith.maximumf %311, %313 : vector<128x128xf32>
    %315 = vector.shape_cast %314 : vector<128x128xf32> to vector<8x16x128xf32>
    %c0_334 = arith.constant 0 : index
    %c8_335 = arith.constant 8 : index
    %c0_336 = arith.constant 0 : index
    %c0_337 = arith.constant 0 : index
    %316 = vector.load %arg12[%c0_334, %c8_335, %c0_336, %c0_337] : memref<1x16x16x128xf32, #tpu.memory_space<vmem>>, vector<1x8x16x128xf32>
    %317 = vector.shape_cast %316 : vector<1x8x16x128xf32> to vector<8x16x128xf32>
    %318 = vector.shape_cast %315 : vector<8x16x128xf32> to vector<1x8x16x128xf32>
    tpu.vector_store %arg12[%c0_334, %c8_335, %c0_336, %c0_337], %318 {strides = array<i32>} : memref<1x16x16x128xf32, #tpu.memory_space<vmem>>, vector<1x8x16x128xf32>,
    return
  }
  func.func @transform_0(%arg0: i32) -> (i32, i32, i32, i32) {
    %c0_i32 = arith.constant 0 : i32
    %c0_i32_0 = arith.constant 0 : i32
    %c0_i32_1 = arith.constant 0 : i32
    %c0_i32_2 = arith.constant 0 : i32
    return %arg0, %c0_i32, %c0_i32_0, %c0_i32_1 : i32, i32, i32, i32
  }
  func.func @transform_1(%arg0: i32) -> (i32, i32, i32) {
    %c0_i32 = arith.constant 0 : i32
    %c0_i32_0 = arith.constant 0 : i32
    %c0_i32_1 = arith.constant 0 : i32
    %c0_i32_2 = arith.constant 0 : i32
    return %c0_i32, %c0_i32_0, %c0_i32_1 : i32, i32, i32
  }
  func.func @transform_2(%arg0: i32) -> (i32, i32) {
    %c0_i32 = arith.constant 0 : i32
    %c0_i32_0 = arith.constant 0 : i32
    %c0_i32_1 = arith.constant 0 : i32
    return %c0_i32, %c0_i32_0 : i32, i32
  }
  func.func @transform_3(%arg0: i32) -> (i32, i32, i32) {
    %c0_i32 = arith.constant 0 : i32
    %c0_i32_0 = arith.constant 0 : i32
    %c0_i32_1 = arith.constant 0 : i32
    %c0_i32_2 = arith.constant 0 : i32
    return %c0_i32, %c0_i32_0, %c0_i32_1 : i32, i32, i32
  }
  func.func @transform_4(%arg0: i32) -> (i32, i32) {
    %c0_i32 = arith.constant 0 : i32
    %c0_i32_0 = arith.constant 0 : i32
    %c0_i32_1 = arith.constant 0 : i32
    return %c0_i32, %c0_i32_0 : i32, i32
  }
  func.func @transform_5(%arg0: i32) -> (i32, i32, i32) {
    %c0_i32 = arith.constant 0 : i32
    %c0_i32_0 = arith.constant 0 : i32
    %c0_i32_1 = arith.constant 0 : i32
    %c0_i32_2 = arith.constant 0 : i32
    return %c0_i32, %c0_i32_0, %c0_i32_1 : i32, i32, i32
  }
  func.func @transform_6(%arg0: i32) -> (i32, i32) {
    %c0_i32 = arith.constant 0 : i32
    %c0_i32_0 = arith.constant 0 : i32
    %c0_i32_1 = arith.constant 0 : i32
    return %c0_i32, %c0_i32_0 : i32, i32
  }
  func.func @transform_7(%arg0: i32) -> (i32, i32, i32) {
    %c0_i32 = arith.constant 0 : i32
    %c0_i32_0 = arith.constant 0 : i32
    %c0_i32_1 = arith.constant 0 : i32
    %c0_i32_2 = arith.constant 0 : i32
    return %c0_i32, %c0_i32_0, %c0_i32_1 : i32, i32, i32
  }
  func.func @transform_8(%arg0: i32) -> (i32, i32) {
    %c0_i32 = arith.constant 0 : i32
    %c0_i32_0 = arith.constant 0 : i32
    %c0_i32_1 = arith.constant 0 : i32
    return %c0_i32, %c0_i32_0 : i32, i32
  }
  func.func @transform_9(%arg0: i32) -> (i32, i32, i32) {
    %c0_i32 = arith.constant 0 : i32
    %c0_i32_0 = arith.constant 0 : i32
    %c0_i32_1 = arith.constant 0 : i32
    %c0_i32_2 = arith.constant 0 : i32
    return %c0_i32, %c0_i32_0, %c0_i32_1 : i32, i32, i32
  }
  func.func @transform_10(%arg0: i32) -> (i32, i32) {
    %c0_i32 = arith.constant 0 : i32
    %c0_i32_0 = arith.constant 0 : i32
    %c0_i32_1 = arith.constant 0 : i32
    return %c0_i32, %c0_i32_0 : i32, i32
  }
  func.func @transform_11(%arg0: i32) -> (i32, i32, i32, i32) {
    %c0_i32 = arith.constant 0 : i32
    %c0_i32_0 = arith.constant 0 : i32
    %c0_i32_1 = arith.constant 0 : i32
    %c0_i32_2 = arith.constant 0 : i32
    return %arg0, %c0_i32, %c0_i32_0, %c0_i32_1 : i32, i32, i32, i32
  }
}

</mosaic_0001>

<bundles_post_ra>
// kernel: _forward.1
= control target key start
LH: loop header
LB: loop body
LE: loop exit
PB: predicated region body
PF: predicated region fallthrough
CT: control target
= control target key end

     0   :  { %16 = vsyncpa [#allocation5], 0  ;;  %s15078_s17 = smov 0   ;;  %s17680_s0 = inlined_call_operand.vmem [shape: f32[2,16,16,128], index: 0, kind: input, shape index: {}]   ;;  %s17681_s1 = inlined_call_operand.vmem [shape: f32[1,128,128], index: 1, kind: input, shape index: {}]   ;;  %s17682_s2 = inlined_call_operand.vmem [shape: f32[1,128], index: 2, kind: input, shape index: {}]   ;;  %s17683_s3 = inlined_call_operand.vmem [shape: f32[9,128,128], index: 3, kind: input, shape index: {}]   ;;  %s17684_s4 = inlined_call_operand.vmem [shape: f32[1,128], index: 4, kind: input, shape index: {}]   ;;  %s17685_s5 = inlined_call_operand.vmem [shape: f32[1,128,128], index: 5, kind: input, shape index: {}]   ;;  %s17686_s6 = inlined_call_operand.vmem [shape: f32[1,128], index: 6, kind: input, shape index: {}]   ;;  %s17687_s7 = inlined_call_operand.hbm [shape: f32[9,128,128], index: 7, kind: input, shape index: {}]   ;;  %s17688_s8 = inlined_call_operand.vmem [shape: f32[1,128], index: 8, kind: input, shape index: {}]   ;;  %s17689_s9 = inlined_call_operand.vmem [shape: f32[1,128,128], index: 9, kind: input, shape index: {}]   ;;  %s17690_s10 = inlined_call_operand.vmem [shape: f32[1,128], index: 10, kind: input, shape index: {}]   ;;  %s17691_s11 = inlined_call_operand.vmem [shape: f32[2,16,16,128], index: 11, kind: output, shape index: {}]  }
   0x1 LB: > { %s15084_s18 = sadd.s32 4294967295, %s15012_s17   ;;  %p9089_p0 = scmp.ge.s32.totalorder %s15012_s17, 1  ;;  %s15012_s17 = sphi %s15078_s17, %s22_s17  }
   0x2   : > { %p289_p1 = scmp.lt.s32.totalorder %s15012_s17, 3  ;;  %s15014_s19 = smov [#allocation4]  }
   0x3   : > { %s319_s20 = sshll.u32 %s15014_s19, 4  ;;  %p17692_p3 = scmp.eq.s32.totalorder %s15084_s18, 0  ;;  %s320_s20 = int_to_ptr.vmem [resolvable:$true] %s319_s20 }
   0x4   : > { %p15088_p2 = pnand %p9089_p0, %p289_p1  ;;  %s14974_s25 = scalar_lea.hbm %s17687_s7, 18432 }
   0x5   : > { %p14975_p6 = scmp.ne.s32.totalorder %s17687_s7, %s14974_s25  ;;  %p14981_p10 = scmp.lt.u32.totalorder %s14974_s25, %s17687_s7 }
   0x6   : > { %s17694_s21 = scalar_select %p15088_p2, 1, 0 }
   0x7   : > { %p14951_p4 = pneg %p15088_p2 }
   0x9   : > { %p15097_p5 = pnand %p17692_p3, %p14951_p4 }
   0xb   : > { %p14976_p7 = pneg %p15097_p5 }
   0xd   : > { %p14977_p8 = pnand %p14976_p7, %p14975_p6 }
   0xf   : > { %p14978_p9 = pneg %p14977_p8 }
  0x11   : > { %p14983_p11 = pnand %p14981_p10, %p14978_p9 }
  0x13   : > { %14986 = shalt.err (!%p14983_p11)
}
  0x14   : > { %s14987_s30 = scalar_lea.vmem %s320_s20, 18432  ;;  %p14995_p1 = scmp.lt.s32.totalorder %s320_s20, %s320_s20 }
  0x15   : > { %p14988_p12 = scmp.ne.s32.totalorder %s320_s20, %s14987_s30  ;;  %p14996_p4 = scmp.lt.s32.totalorder %s14987_s30, %s14987_s30 }
  0x17   : > { %p14990_p13 = pnand %p14988_p12, %p14976_p7  ;;  %p14997_p3 = por %p14996_p4, %p14995_p1 }
  0x19   : > { %p14991_p0 = pneg %p14990_p13 }
  0x1b   : > { %p14998_p2 = pnand %p14997_p3, %p14991_p0 }
  0x1d   : > { %15001 = shalt.err (!%p14998_p2)
}
  0x1e   : > { %s15015_s12 = smov 128   ;;  %s15016_s13 = smov 8  }
  0x1f   : > { %14954 = dma.hbm_to_vmem [thread:$0]  (!%p15097_p5), %s17687_s7, 18432, %s320_s20, [#allocation5], %s15015_s12, %s15015_s12, %s15016_s13  }
  0x20   : > { %p17696_p6 = scmp.ne.s32.totalorder %s17694_s21, 0 }
  0x21   : > { %p17697_p8 = scmp.eq.s32.totalorder (!%p17696_p6), %s15084_s18, 0 }
  0x22   : > { %352 = sbr.rel (%p17696_p6) target bundleno = 1742 (0x6ce), region = 64 }
  0x29   : > { %15007 = dma.done.wait (%p17697_p8), [#allocation5], 18432   ;;  %p17698_p7 = pmov %p17697_p8 }
  0x2a   : > { %p392_p3 = scmp.lt.s32.totalorder %s15084_s18, 1  ;;  %v15017_v0 = vmov 0.0   ;;  %v456_v1 = vld [vmem:[%s17681_s1] sm:$0xff]  ;;  %v457_v2 = vld [vmem:[%s17681_s1 + $0x8] sm:$0xff]  ;;  %v458_v3 = vld [vmem:[%s17681_s1 + $0x10] sm:$0xff] }
  0x2b   : > { %15009 = vsyncadd (%p17698_p7), [#allocation5], 4294948864  ;;  %406 = vst [vmem:[#allocation3 + $0x20] sm:$0xff] %v15017_v0  ;;  %v13091_v4 = vpack.c.bf16 %v457_v2, %v456_v1  ;;  %v459_v5 = vld [vmem:[%s17681_s1 + $0x18] sm:$0xff]  ;;  %v460_v7 = vld [vmem:[%s17681_s1 + $0x20] sm:$0xff] }
  0x2c   : > { %407 = vst [vmem:[#allocation3 + $0x28] sm:$0x3] %v15017_v0  ;;  %402 = vst [vmem:[#allocation3] sm:$0xff] %v15017_v0  ;;  %s17700_s18 = smov (!%p392_p3, %s15084_s18), 1  ;;  %v13095_v6 = vpack.c.bf16 %v459_v5, %v458_v3  ;;  %v461_v8 = vld [vmem:[%s17681_s1 + $0x28] sm:$0xff]  ;;  %v462_v11 = vld [vmem:[%s17681_s1 + $0x30] sm:$0xff] }
  0x2d   : > { %403 = vst [vmem:[#allocation3 + $0x8] sm:$0xff] %v15017_v0  ;;  %404 = vst [vmem:[#allocation3 + $0x10] sm:$0x3] %v15017_v0  ;;  %s9393_s16 = sshll.u32 %s17700_s18, 8  ;;  %13092 = vmatprep.subr.bf16.mxu0 %v13091_v4  ;;  %13124 = vmatprep.subr.bf16.mxu1 %v13091_v4  ;;  %v13099_v9 = vpack.c.bf16 %v461_v8, %v460_v7  ;;  %v463_v12 = vld [vmem:[%s17681_s1 + $0x38] sm:$0xff]  ;;  %v464_v14 = vld [vmem:[%s17681_s1 + $0x40] sm:$0xff] }
  0x2e   : > { %405 = vst [vmem:[#allocation3 + $0x18] sm:$0xff] %v15017_v0  ;;  %408 = vst [vmem:[#allocation3 + $0x30] sm:$0xff] %v15017_v0  ;;  %s15207_s14 = scalar_lea.vmem %s17680_s0, %s9393_s16  ;;  %13094 = vmatpush3.bf16.msra.mxu0 %v13091_v4  ;;  %13126 = vmatpush3.bf16.msra.mxu1 %v13091_v4  ;;  %v13103_v13 = vpack.c.bf16 %v463_v12, %v462_v11  ;;  %v465_v15 = vld [vmem:[%s17681_s1 + $0x48] sm:$0xff]  ;;  %v466_v18 = vld [vmem:[%s17681_s1 + $0x50] sm:$0xff]  ;;  %s17613_s20 = scalar_lea.vmem %s17691_s11, %s9393_s16 }
  0x2f   : > { %409 = vst [vmem:[#allocation3 + $0x38] sm:$0xff] %v15017_v0  ;;  %410 = vst [vmem:[#allocation3 + $0x40] sm:$0x3] %v15017_v0  ;;  %13096 = vmatprep.subr.bf16.mxu0 %v13095_v6  ;;  %v473_v10 = vld [vmem:[%s15207_s14] sm:$0xff]  ;;  %13128 = vmatprep.subr.bf16.mxu1 %v13095_v6  ;;  %v13107_v17 = vpack.c.bf16 %v465_v15, %v464_v14  ;;  %v467_v19 = vld [vmem:[%s17681_s1 + $0x58] sm:$0xff] }
  0x30   : > { %411 = vst [vmem:[#allocation3 + $0x48] sm:$0xff] %v15017_v0  ;;  %412 = vst [vmem:[#allocation3 + $0x50] sm:$0xff] %v15017_v0  ;;  %10771 = vmatprep.mubr.f32.mxu0 %v473_v10  ;;  %v9099_v16 = vld [vmem:[%s15207_s14 + $0x80] sm:$0xff]  ;;  %v13111_v20 = vpack.c.bf16 %v467_v19, %v466_v18  ;;  %v469_v22 = vld [vmem:[%s17681_s1 + $0x68] sm:$0xff] }
  0x31   : > { %413 = vst [vmem:[#allocation3 + $0x58] sm:$0x3] %v15017_v0  ;;  %414 = vst [vmem:[#allocation3 + $0x60] sm:$0xff] %v15017_v0  ;;  %10827 = vmatprep.mubr.f32.mxu1 %v9099_v16  ;;  %v468_v21 = vld [vmem:[%s17681_s1 + $0x60] sm:$0xff]  ;;  %v470_v24 = vld [vmem:[%s17681_s1 + $0x70] sm:$0xff] }
  0x32   : > { %415 = vst [vmem:[#allocation3 + $0x68] sm:$0xff] %v15017_v0  ;;  %416 = vst [vmem:[#allocation3 + $0x70] sm:$0x3] %v15017_v0  ;;  %13098 = vmatpush3.bf16.msra.mxu0 %v13095_v6  ;;  %13130 = vmatpush3.bf16.msra.mxu1 %v13095_v6  ;;  %v13115_v23 = vpack.c.bf16 %v469_v22, %v468_v21  ;;  %v471_v25 = vld [vmem:[%s17681_s1 + $0x78] sm:$0xff]  ;;  %v9115_v27 = vld [vmem:[%s17683_s3 + $0x80] sm:$0xff] }
  0x33   : > { %417 = vst [vmem:[#allocation3 + $0x78] sm:$0xff] %v15017_v0  ;;  %418 = vst [vmem:[#allocation3 + $0x80] sm:$0xff] %v15017_v0  ;;  %13100 = vmatprep.subr.bf16.mxu0 %v13099_v9  ;;  %13132 = vmatprep.subr.bf16.mxu1 %v13099_v9  ;;  %v13119_v26 = vpack.c.bf16 %v471_v25, %v470_v24  ;;  %v9116_v28 = vld [vmem:[%s17683_s3 + $0x88] sm:$0xff]  ;;  %v9117_v30 = vld [vmem:[%s17683_s3 + $0x90] sm:$0xff] }
  0x34   : > { %419 = vst [vmem:[#allocation3 + $0x88] sm:$0x3] %v15017_v0  ;;  %420 = vst [vmem:[#allocation3 + $0x90] sm:$0xff] %v15017_v0  ;;  %v13155_v29 = vpack.c.bf16 %v9116_v28, %v9115_v27  ;;  %v9118_v31 = vld [vmem:[%s17683_s3 + $0x98] sm:$0xff]  ;;  %v474_v32 = vld [vmem:[%s15207_s14 + $0x8] sm:$0xff] }
  0x35   : > { %421 = vst [vmem:[#allocation3 + $0x98] sm:$0xff] %v15017_v0  ;;  %422 = vst [vmem:[#allocation3 + $0xa0] sm:$0x3] %v15017_v0  ;;  %v9100_v33 = vld [vmem:[%s15207_s14 + $0x88] sm:$0xff]  ;;  %v475_v34 = vld [vmem:[%s15207_s14 + $0x10] sm:$0xff]  ;;  %v13159_v36 = vpack.c.bf16 %v9118_v31, %v9117_v30 }
  0x36   : > { %423 = vst [vmem:[#allocation3 + $0xa8] sm:$0xff] %v15017_v0  ;;  %424 = vst [vmem:[#allocation3 + $0xb0] sm:$0xff] %v15017_v0  ;;  %13102 = vmatpush3.bf16.msra.mxu0 %v13099_v9  ;;  %13134 = vmatpush3.bf16.msra.mxu1 %v13099_v9  ;;  %v9101_v35 = vld [vmem:[%s15207_s14 + $0x90] sm:$0xff]  ;;  %v9119_v37 = vld [vmem:[%s17683_s3 + $0xa0] sm:$0xff] }
  0x37   : > { %425 = vst [vmem:[#allocation3 + $0xb8] sm:$0x3] %v15017_v0  ;;  %426 = vst [vmem:[#allocation3 + $0xc0] sm:$0xff] %v15017_v0  ;;  %13104 = vmatprep.subr.bf16.mxu0 %v13103_v13  ;;  %13136 = vmatprep.subr.bf16.mxu1 %v13103_v13  ;;  %v9120_v38 = vld [vmem:[%s17683_s3 + $0xa8] sm:$0xff]  ;;  %v476_v39 = vld [vmem:[%s15207_s14 + $0x18] sm:$0xff] }
  0x38   : > { %427 = vst [vmem:[#allocation3 + $0xc8] sm:$0xff] %v15017_v0  ;;  %428 = vst [vmem:[#allocation3 + $0xd0] sm:$0x3] %v15017_v0  ;;  %v9102_v40 = vld [vmem:[%s15207_s14 + $0x98] sm:$0xff]  ;;  %v477_v41 = vld [vmem:[%s15207_s14 + $0x20] sm:$0xff]  ;;  %v13163_v43 = vpack.c.bf16 %v9120_v38, %v9119_v37 }
  0x39   : > { %429 = vst [vmem:[#allocation3 + $0xd8] sm:$0xff] %v15017_v0  ;;  %430 = vst [vmem:[#allocation3 + $0xe0] sm:$0xff] %v15017_v0  ;;  %v9103_v42 = vld [vmem:[%s15207_s14 + $0xa0] sm:$0xff]  ;;  %v9121_v44 = vld [vmem:[%s17683_s3 + $0xb0] sm:$0xff] }
  0x3a   : > { %431 = vst [vmem:[#allocation3 + $0xe8] sm:$0x3] %v15017_v0  ;;  %432 = vst [vmem:[#allocation3 + $0xf0] sm:$0xff] %v15017_v0  ;;  %13106 = vmatpush3.bf16.msra.mxu0 %v13103_v13  ;;  %13138 = vmatpush3.bf16.msra.mxu1 %v13103_v13  ;;  %v9122_v45 = vld [vmem:[%s17683_s3 + $0xb8] sm:$0xff]  ;;  %v478_v46 = vld [vmem:[%s15207_s14 + $0x28] sm:$0xff] }
  0x3b   : > { %433 = vst [vmem:[#allocation3 + $0xf8] sm:$0xff] %v15017_v0  ;;  %434 = vst [vmem:[#allocation3 + $0x100] sm:$0x3] %v15017_v0  ;;  %13108 = vmatprep.subr.bf16.mxu0 %v13107_v17  ;;  %13140 = vmatprep.subr.bf16.mxu1 %v13107_v17  ;;  %v9104_v47 = vld [vmem:[%s15207_s14 + $0xa8] sm:$0xff]  ;;  %v479_v48 = vld [vmem:[%s15207_s14 + $0x30] sm:$0xff]  ;;  %v13167_v50 = vpack.c.bf16 %v9122_v45, %v9121_v44 }
  0x3c   : > { %435 = vst [vmem:[#allocation3 + $0x108] sm:$0xff] %v15017_v0  ;;  %436 = vst [vmem:[#allocation3 + $0x110] sm:$0xff] %v15017_v0  ;;  %v9105_v49 = vld [vmem:[%s15207_s14 + $0xb0] sm:$0xff]  ;;  %v9123_v51 = vld [vmem:[%s17683_s3 + $0xc0] sm:$0xff] }
  0x3d   : > { %437 = vst [vmem:[#allocation3 + $0x118] sm:$0x3] %v15017_v0  ;;  %438 = vst [vmem:[#allocation3 + $0x120] sm:$0xff] %v15017_v0  ;;  %v9124_v52 = vld [vmem:[%s17683_s3 + $0xc8] sm:$0xff]  ;;  %v480_v53 = vld [vmem:[%s15207_s14 + $0x38] sm:$0xff] }
  0x3e   : > { %439 = vst [vmem:[#allocation3 + $0x128] sm:$0xff] %v15017_v0  ;;  %440 = vst [vmem:[#allocation3 + $0x130] sm:$0x3] %v15017_v0  ;;  %13110 = vmatpush3.bf16.msra.mxu0 %v13107_v17  ;;  %13142 = vmatpush3.bf16.msra.mxu1 %v13107_v17  ;;  %v9106_v54 = vld [vmem:[%s15207_s14 + $0xb8] sm:$0xff]  ;;  %v481_v55 = vld [vmem:[%s15207_s14 + $0x40] sm:$0xff]  ;;  %v13171_v57 = vpack.c.bf16 %v9124_v52, %v9123_v51 }
  0x3f   : > { %441 = vst [vmem:[#allocation3 + $0x138] sm:$0xff] %v15017_v0  ;;  %442 = vst [vmem:[#allocation3 + $0x140] sm:$0xff] %v15017_v0  ;;  %13112 = vmatprep.subr.bf16.mxu0 %v13111_v20  ;;  %13144 = vmatprep.subr.bf16.mxu1 %v13111_v20  ;;  %v9107_v56 = vld [vmem:[%s15207_s14 + $0xc0] sm:$0xff]  ;;  %v482_v58 = vld [vmem:[%s15207_s14 + $0x48] sm:$0xff] }
  0x40   : > { %443 = vst [vmem:[#allocation3 + $0x148] sm:$0x3] %v15017_v0  ;;  %444 = vst [vmem:[#allocation3 + $0x150] sm:$0xff] %v15017_v0  ;;  %v9108_v59 = vld [vmem:[%s15207_s14 + $0xc8] sm:$0xff]  ;;  %v483_v60 = vld [vmem:[%s15207_s14 + $0x50] sm:$0xff] }
  0x41   : > { %445 = vst [vmem:[#allocation3 + $0x158] sm:$0xff] %v15017_v0  ;;  %446 = vst [vmem:[#allocation3 + $0x160] sm:$0x3] %v15017_v0  ;;  %v9109_v61 = vld [vmem:[%s15207_s14 + $0xd0] sm:$0xff]  ;;  %v484_v62 = vld [vmem:[%s15207_s14 + $0x58] sm:$0xff] }
  0x42   : > { %447 = vst [vmem:[#allocation3 + $0x168] sm:$0xff] %v15017_v0  ;;  %448 = vst [vmem:[#allocation3 + $0x170] sm:$0xff] %v15017_v0  ;;  %13114 = vmatpush3.bf16.msra.mxu0 %v13111_v20  ;;  %13146 = vmatpush3.bf16.msra.mxu1 %v13111_v20  ;;  %v9110_v63 = vld [vmem:[%s15207_s14 + $0xd8] sm:$0xff]  ;;  %v485_v1 = vld [vmem:[%s15207_s14 + $0x60] sm:$0xff] }
  0x43   : > { %449 = vst [vmem:[#allocation3 + $0x178] sm:$0x3] %v15017_v0  ;;  %450 = vst [vmem:[#allocation3 + $0x180] sm:$0xff] %v15017_v0  ;;  %13116 = vmatprep.subr.bf16.mxu0 %v13115_v23  ;;  %13148 = vmatprep.subr.bf16.mxu1 %v13115_v23  ;;  %v9111_v2 = vld [vmem:[%s15207_s14 + $0xe0] sm:$0xff]  ;;  %v486_v3 = vld [vmem:[%s15207_s14 + $0x68] sm:$0xff] }
  0x44   : > { %451 = vst [vmem:[#allocation3 + $0x188] sm:$0xff] %v15017_v0  ;;  %452 = vst [vmem:[#allocation3 + $0x190] sm:$0x3] %v15017_v0  ;;  %v9112_v4 = vld [vmem:[%s15207_s14 + $0xe8] sm:$0xff]  ;;  %v487_v5 = vld [vmem:[%s15207_s14 + $0x70] sm:$0xff] }
  0x45   : > { %453 = vst [vmem:[#allocation3 + $0x198] sm:$0xff] %v15017_v0  ;;  %454 = vst [vmem:[#allocation3 + $0x1a0] sm:$0xff] %v15017_v0  ;;  %v9113_v6 = vld [vmem:[%s15207_s14 + $0xf0] sm:$0xff]  ;;  %v488_v7 = vld [vmem:[%s15207_s14 + $0x78] sm:$0xff] }
  0x46   : > { %455 = vst [vmem:[#allocation3 + $0x1a8] sm:$0x3] %v15017_v0  ;;  %13118 = vmatpush3.bf16.msra.mxu0 %v13115_v23  ;;  %13150 = vmatpush3.bf16.msra.mxu1 %v13115_v23  ;;  %v9114_v8 = vld [vmem:[%s15207_s14 + $0xf8] sm:$0xff]  ;;  %v9125_v9 = vld [vmem:[%s17683_s3 + $0xd0] sm:$0xff]  ;;  %v9127_v12 = vld [vmem:[%s17683_s3 + $0xe0] sm:$0xff] }
  0x47   : > { %13120 = vmatprep.subr.bf16.mxu0 %v13119_v26  ;;  %13152 = vmatprep.subr.bf16.mxu1 %v13119_v26  ;;  %v9126_v10 = vld [vmem:[%s17683_s3 + $0xd8] sm:$0xff]  ;;  %v9128_v13 = vld [vmem:[%s17683_s3 + $0xe8] sm:$0xff]  ;;  %v9129_v15 = vld [vmem:[%s17683_s3 + $0xf0] sm:$0xff] }
  0x48   : > { %v13175_v11 = vpack.c.bf16 %v9126_v10, %v9125_v9  ;;  %v13179_v14 = vpack.c.bf16 %v9128_v13, %v9127_v12  ;;  %v9130_v16 = vld [vmem:[%s17683_s3 + $0xf8] sm:$0xff]  ;;  %v981_v18 = vld [vmem:[%s17683_s3] sm:$0xff]  ;;  %v982_v19 = vld [vmem:[%s17683_s3 + $0x8] sm:$0xff] }
  0x49   : > { %v13183_v17 = vpack.c.bf16 %v9130_v16, %v9129_v15  ;;  %v997_v20 = vld [vmem:[#allocation3 + $0x1] sm:$0xff]  ;;  %v15325_v21 = vpack.c.bf16 %v982_v19, %v981_v18  ;;  %v998_v22 = vld [vmem:[#allocation3 + $0x9] sm:$0xff]  ;;  %v984_v24 = vld [vmem:[%s17683_s3 + $0x18] sm:$0xff] }
  0x4a   : > { %13122 = vmatpush3.bf16.msra.mxu0 %v13119_v26  ;;  %13154 = vmatpush3.bf16.msra.mxu1 %v13119_v26  ;;  %v983_v23 = vld [vmem:[%s17683_s3 + $0x10] sm:$0xff]  ;;  %v985_v26 = vld [vmem:[%s17683_s3 + $0x20] sm:$0xff]  ;;  %v986_v27 = vld [vmem:[%s17683_s3 + $0x28] sm:$0xff] }
  0x4b   : > { %13156 = vmatprep.subr.bf16.mxu0 %v13155_v29  ;;  %13444 = vmatprep.subr.bf16.mxu1 %v13155_v29  ;;  %v15336_v25 = vpack.c.bf16 %v984_v24, %v983_v23  ;;  %v15346_v28 = vpack.c.bf16 %v986_v27, %v985_v26  ;;  %v988_v30 = vld [vmem:[%s17683_s3 + $0x38] sm:$0xff]  ;;  %v993_v38 = vld [vmem:[%s17683_s3 + $0x60] sm:$0xff]  ;;  %v9132_v45 = vld [vmem:[%s17683_s3 + $0x108] sm:$0xff] }
  0x4c   : > { %v9131_v44 = vld [vmem:[%s17683_s3 + $0x100] sm:$0xff] }
  0x4d   : > { %10772 = vmatmul.mubr.f32.vlgmr.msra.gmra.mrb[0].mxu0 %v474_v32  ;;  %10828 = vmatmul.mubr.f32.vlgmr.msra.gmra.mrb[0].mxu1 %v9100_v33  ;;  %v989_v32 = vld [vmem:[%s17683_s3 + $0x40] sm:$0xff]  ;;  %v990_v33 = vld [vmem:[%s17683_s3 + $0x48] sm:$0xff] }
  0x4e   : > { %10774 = vmatprep.mubr.f32.mxu0 %v475_v34  ;;  %10830 = vmatprep.mubr.f32.mxu1 %v9101_v35  ;;  %v15366_v34 = vpack.c.bf16 %v990_v33, %v989_v32  ;;  %v991_v35 = vld [vmem:[%s17683_s3 + $0x50] sm:$0xff] }
  0x4f   : > { %13158 = vmatpush3.bf16.msra.mxu0 %v13155_v29  ;;  %13446 = vmatpush3.bf16.msra.mxu1 %v13155_v29  ;;  %v987_v29 = vld [vmem:[%s17683_s3 + $0x30] sm:$0xff] }
  0x50   : > { %13160 = vmatprep.subr.bf16.mxu0 %v13159_v36  ;;  %13448 = vmatprep.subr.bf16.mxu1 %v13159_v36  ;;  %v15356_v31 = vpack.c.bf16 %v988_v30, %v987_v29 }
  0x51   : > { %10775 = vmatmul.mubr.f32.gmra.mrb[2].mxu0 %v476_v39  ;;  %10831 = vmatmul.mubr.f32.gmra.mrb[2].mxu1 %v9102_v40  ;;  %v994_v39 = vld [vmem:[%s17683_s3 + $0x68] sm:$0xff] }
  0x52   : > { %10777 = vmatprep.mubr.f32.mxu0 %v477_v41  ;;  %10833 = vmatprep.mubr.f32.mxu1 %v9103_v42  ;;  %v15386_v40 = vpack.c.bf16 %v994_v39, %v993_v38  ;;  %v995_v41 = vld [vmem:[%s17683_s3 + $0x70] sm:$0xff]  ;;  %v996_v42 = vld [vmem:[%s17683_s3 + $0x78] sm:$0xff] }
  0x53   : > { %13162 = vmatpush3.bf16.msra.mxu0 %v13159_v36  ;;  %13450 = vmatpush3.bf16.msra.mxu1 %v13159_v36  ;;  %v992_v36 = vld [vmem:[%s17683_s3 + $0x58] sm:$0xff] }
  0x54   : > { %13164 = vmatprep.subr.bf16.mxu0 %v13163_v43  ;;  %13452 = vmatprep.subr.bf16.mxu1 %v13163_v43  ;;  %v15376_v37 = vpack.c.bf16 %v992_v36, %v991_v35 }
  0x55   : > { %10778 = vmatmul.mubr.f32.gmra.mrb[4].mxu0 %v478_v46  ;;  %10834 = vmatmul.mubr.f32.gmra.mrb[4].mxu1 %v9104_v47  ;;  %v15406_v46 = vpack.c.bf16 %v9132_v45, %v9131_v44  ;;  %v15412_v47 = vld [vmem:[%s17682_s2] ss:$0 sm:$0xff] }
  0x56   : > { %10780 = vmatprep.mubr.f32.mxu0 %v479_v48  ;;  %10836 = vmatprep.mubr.f32.mxu1 %v9105_v49 }
  0x57   : > { %13166 = vmatpush3.bf16.msra.mxu0 %v13163_v43  ;;  %13454 = vmatpush3.bf16.msra.mxu1 %v13163_v43  ;;  %v15396_v43 = vpack.c.bf16 %v996_v42, %v995_v41 }
  0x58   : > { %13168 = vmatprep.subr.bf16.mxu0 %v13167_v50  ;;  %13456 = vmatprep.subr.bf16.mxu1 %v13167_v50 }
  0x59   : > { %10781 = vmatmul.mubr.f32.gmra.mrb[6].mxu0 %v480_v53  ;;  %10837 = vmatmul.mubr.f32.gmra.mrb[6].mxu1 %v9106_v54 }
  0x5a   : > { %10783 = vmatprep.mubr.f32.mxu0 %v481_v55  ;;  %10839 = vmatprep.mubr.f32.mxu1 %v9107_v56 }
  0x5b   : > { %13170 = vmatpush3.bf16.msra.mxu0 %v13167_v50  ;;  %13458 = vmatpush3.bf16.msra.mxu1 %v13167_v50 }
  0x5c   : > { %13172 = vmatprep.subr.bf16.mxu0 %v13171_v57  ;;  %13460 = vmatprep.subr.bf16.mxu1 %v13171_v57 }
  0x5d   : > { %10784 = vmatmul.mubr.f32.gmra.mrb[8].mxu0 %v482_v58  ;;  %10840 = vmatmul.mubr.f32.gmra.mrb[8].mxu1 %v9108_v59 }
  0x5e   : > { %10786 = vmatprep.mubr.f32.mxu0 %v483_v60  ;;  %10842 = vmatprep.mubr.f32.mxu1 %v9109_v61 }
  0x5f   : > { %13174 = vmatpush3.bf16.msra.mxu0 %v13171_v57  ;;  %13462 = vmatpush3.bf16.msra.mxu1 %v13171_v57 }
  0x60   : > { %13176 = vmatprep.subr.bf16.mxu0 %v13175_v11  ;;  %13464 = vmatprep.subr.bf16.mxu1 %v13175_v11 }
  0x61   : > { %10787 = vmatmul.mubr.f32.gmra.mrb[10].mxu0 %v484_v62  ;;  %10843 = vmatmul.mubr.f32.gmra.mrb[10].mxu1 %v9110_v63 }
  0x62   : > { %10789 = vmatprep.mubr.f32.mxu0 %v485_v1  ;;  %10845 = vmatprep.mubr.f32.mxu1 %v9111_v2 }
  0x63   : > { %13178 = vmatpush3.bf16.msra.mxu0 %v13175_v11  ;;  %13466 = vmatpush3.bf16.msra.mxu1 %v13175_v11 }
  0x64   : > { %13180 = vmatprep.subr.bf16.mxu0 %v13179_v14  ;;  %13468 = vmatprep.subr.bf16.mxu1 %v13179_v14 }
  0x65   : > { %10790 = vmatmul.mubr.f32.gmra.mrb[12].mxu0 %v486_v3  ;;  %10846 = vmatmul.mubr.f32.gmra.mrb[12].mxu1 %v9112_v4 }
  0x66   : > { %10792 = vmatprep.mubr.f32.mxu0 %v487_v5  ;;  %10848 = vmatprep.mubr.f32.mxu1 %v9113_v6 }
  0x67   : > { %13182 = vmatpush3.bf16.msra.mxu0 %v13179_v14  ;;  %13470 = vmatpush3.bf16.msra.mxu1 %v13179_v14 }
  0x68   : > { %13184 = vmatprep.subr.bf16.mxu0 %v13183_v17  ;;  %13472 = vmatprep.subr.bf16.mxu1 %v13183_v17 }
  0x69   : > { %10793 = vmatmul.mubr.f32.gmra.mrb[14].mxu0 %v488_v7  ;;  %10849 = vmatmul.mubr.f32.gmra.mrb[14].mxu1 %v9114_v8 }
  0x6a   : > { %10883 = vmatprep.mubr.f32.mxu0 %v997_v20 }
  0x6b   : > { %13186 = vmatpush3.bf16.msra.mxu0 %v13183_v17  ;;  %13474 = vmatpush3.bf16.msra.mxu1 %v13183_v17 }
  0x6c   : > { %13188 = vmatprep.subr.bf16.mxu0 %v15325_v21  ;;  %13476 = vmatprep.subr.bf16.mxu1 %v15325_v21 }
  0x6e   : > { %10884 = vmatmul.mubr.f32.vlgmr.msra.gmra.mrb[16].mxu0 %v998_v22 }
  0x6f   : > { %13190 = vmatpush3.bf16.msra.mxu0 %v15325_v21 }
  0x70   : > { %13192 = vmatprep.subr.bf16.mxu0 %v15336_v25 }
  0x73   : > { %13194 = vmatpush3.bf16.msra.mxu0 %v15336_v25 }
  0x74   : > { %13196 = vmatprep.subr.bf16.mxu0 %v15346_v28 }
  0x77   : > { %13198 = vmatpush3.bf16.msra.mxu0 %v15346_v28 }
  0x78   : > { %13200 = vmatprep.subr.bf16.mxu0 %v15356_v31 }
  0x7b   : > { %13202 = vmatpush3.bf16.msra.mxu0 %v15356_v31 }
  0x7c   : > { %13204 = vmatprep.subr.bf16.mxu0 %v15366_v34 }
  0x7f   : > { %13206 = vmatpush3.bf16.msra.mxu0 %v15366_v34 }
  0x80   : > { %13208 = vmatprep.subr.bf16.mxu0 %v15376_v37 }
  0x83   : > { %13210 = vmatpush3.bf16.msra.mxu0 %v15376_v37 }
  0x84   : > { %13212 = vmatprep.subr.bf16.mxu0 %v15386_v40 }
  0x87   : > { %13214 = vmatpush3.bf16.msra.mxu0 %v15386_v40 }
  0x88   : > { %13216 = vmatprep.subr.bf16.mxu0 %v15396_v43 }
  0x8b   : > { %13218 = vmatpush3.bf16.msra.mxu0 %v15396_v43 }
  0x8c   : > { %13220 = vmatprep.subr.bf16.mxu0 %v15406_v46 }
 0x120   : > { %v10773_v48 = vpop.f32.mrb[0].mxu0  ;;  %v10829_v49 = vpop.f32.mrb[0].mxu1 }
 0x121   : > { %v567_v50 = vadd.f32 %v10773_v48, %v15412_v47  ;;  %v561_v51 = vpop.f32.mrb[1].mxu0  ;;  %v777_v52 = vadd.f32 %v10829_v49, %v15412_v47  ;;  %v771_v53 = vpop.f32.mrb[1].mxu1 }
 0x122   : > { %v562_v54 = vadd.f32 %v15412_v47, %v561_v51  ;;  %v772_v55 = vadd.f32 %v15412_v47, %v771_v53 }
 0x123   : > { %v641_v56 = vmul.f32 0.1, %v567_v50  ;;  %v851_v57 = vmul.f32 0.1, %v777_v52 }
 0x124   : > { %v640_v58 = vmul.f32 0.1, %v562_v54  ;;  %v10776_v59 = vpop.f32.mrb[2].mxu0  ;;  %v850_v60 = vmul.f32 0.1, %v772_v55  ;;  %v10832_v61 = vpop.f32.mrb[2].mxu1 }
 0x125   : > { %v657_v62 = vmax.f32 %v567_v50, %v641_v56  ;;  %v577_v63 = vadd.f32 %v10776_v59, %v15412_v47  ;;  %v571_v1 = vpop.f32.mrb[3].mxu0  ;;  %v15419_v2 = vmax.f32 %v777_v52, %v851_v57  ;;  %v787_v3 = vadd.f32 %v10832_v61, %v15412_v47  ;;  %v781_v4 = vpop.f32.mrb[3].mxu1 }
 0x126   : > { %v656_v5 = vmax.f32 %v562_v54, %v640_v58  ;;  %v572_v6 = vadd.f32 %v15412_v47, %v571_v1  ;;  %v15423_v7 = vmax.f32 %v772_v55, %v850_v60  ;;  %v782_v8 = vadd.f32 %v15412_v47, %v781_v4 }
 0x127   : > { %916 = vst [vmem:[#allocation3 + $0x21] sm:$0xff] %v657_v62  ;;  %v643_v9 = vmul.f32 0.1, %v577_v63  ;;  %949 = vst [vmem:[#allocation3 + $0xe1] sm:$0xff] %v15419_v2  ;;  %v853_v10 = vmul.f32 0.1, %v787_v3 }
 0x128   : > { %915 = vst [vmem:[#allocation3 + $0x19] sm:$0xff] %v656_v5  ;;  %v642_v11 = vmul.f32 0.1, %v572_v6  ;;  %v10779_v12 = vpop.f32.mrb[4].mxu0  ;;  %10886 = vmatprep.mubr.f32.mxu0 %v656_v5  ;;  %948 = vst [vmem:[#allocation3 + $0xd9] sm:$0xff] %v15423_v7  ;;  %v10835_v14 = vpop.f32.mrb[4].mxu1 }
 0x129   : > { %v852_v13 = vmul.f32 0.1, %v782_v8  ;;  %v659_v15 = vmax.f32 %v577_v63, %v643_v9  ;;  %v587_v16 = vadd.f32 %v10779_v12, %v15412_v47  ;;  %v581_v17 = vpop.f32.mrb[5].mxu0  ;;  %10887 = vmatmul.mubr.f32.gmra.mrb[18].mxu0 %v657_v62  ;;  %v15429_v18 = vmax.f32 %v787_v3, %v853_v10  ;;  %v791_v20 = vpop.f32.mrb[5].mxu1 }
 0x12a   : > { %v797_v19 = vadd.f32 %v10835_v14, %v15412_v47  ;;  %v658_v22 = vmax.f32 %v572_v6, %v642_v11  ;;  %v582_v23 = vadd.f32 %v15412_v47, %v581_v17  ;;  %v792_v26 = vadd.f32 %v15412_v47, %v791_v20 }
 0x12b   : > { %v15433_v24 = vmax.f32 %v782_v8, %v852_v13  ;;  %918 = vst [vmem:[#allocation3 + $0x39] sm:$0xff] %v659_v15  ;;  %v645_v27 = vmul.f32 0.1, %v587_v16  ;;  %951 = vst [vmem:[#allocation3 + $0xf9] sm:$0xff] %v15429_v18 }
 0x12c   : > { %v855_v29 = vmul.f32 0.1, %v797_v19  ;;  %917 = vst [vmem:[#allocation3 + $0x31] sm:$0xff] %v658_v22  ;;  %v644_v30 = vmul.f32 0.1, %v582_v23  ;;  %v10782_v32 = vpop.f32.mrb[6].mxu0  ;;  %10889 = vmatprep.mubr.f32.mxu0 %v658_v22 }
 0x12d   : > { %950 = vst [vmem:[#allocation3 + $0xf1] sm:$0xff] %v15433_v24  ;;  %v854_v33 = vmul.f32 0.1, %v792_v26  ;;  %v10838_v35 = vpop.f32.mrb[6].mxu1  ;;  %v661_v36 = vmax.f32 %v587_v16, %v645_v27  ;;  %v597_v38 = vadd.f32 %v10782_v32, %v15412_v47  ;;  %v591_v39 = vpop.f32.mrb[7].mxu0  ;;  %10890 = vmatmul.mubr.f32.gmra.mrb[20].mxu0 %v659_v15 }
 0x12e   : > { %v15439_v41 = vmax.f32 %v797_v19, %v855_v29  ;;  %v807_v42 = vadd.f32 %v10838_v35, %v15412_v47  ;;  %v801_v44 = vpop.f32.mrb[7].mxu1  ;;  %v660_v45 = vmax.f32 %v582_v23, %v644_v30  ;;  %v592_v48 = vadd.f32 %v15412_v47, %v591_v39 }
 0x12f   : > { %v15443_v49 = vmax.f32 %v792_v26, %v854_v33  ;;  %v802_v50 = vadd.f32 %v15412_v47, %v801_v44  ;;  %920 = vst [vmem:[#allocation3 + $0x51] sm:$0xff] %v661_v36  ;;  %v647_v51 = vmul.f32 0.1, %v597_v38 }
 0x130   : > { %953 = vst [vmem:[#allocation3 + $0x111] sm:$0xff] %v15439_v41  ;;  %v857_v52 = vmul.f32 0.1, %v807_v42  ;;  %919 = vst [vmem:[#allocation3 + $0x49] sm:$0xff] %v660_v45  ;;  %v646_v53 = vmul.f32 0.1, %v592_v48  ;;  %10892 = vmatprep.mubr.f32.mxu0 %v660_v45 }
 0x131   : > { %v10785_v54 = vpop.f32.mrb[8].mxu0  ;;  %952 = vst [vmem:[#allocation3 + $0x109] sm:$0xff] %v15443_v49  ;;  %v856_v55 = vmul.f32 0.1, %v802_v50  ;;  %v10841_v56 = vpop.f32.mrb[8].mxu1  ;;  %v663_v57 = vmax.f32 %v597_v38, %v647_v51  ;;  %10893 = vmatmul.mubr.f32.gmra.mrb[22].mxu0 %v661_v36 }
 0x132   : > { %v607_v58 = vadd.f32 %v10785_v54, %v15412_v47  ;;  %v601_v59 = vpop.f32.mrb[9].mxu0  ;;  %v15449_v60 = vmax.f32 %v807_v42, %v857_v52  ;;  %v817_v61 = vadd.f32 %v10841_v56, %v15412_v47  ;;  %v811_v62 = vpop.f32.mrb[9].mxu1  ;;  %v662_v63 = vmax.f32 %v592_v48, %v646_v53 }
 0x133   : > { %v602_v1 = vadd.f32 %v15412_v47, %v601_v59  ;;  %v15453_v3 = vmax.f32 %v802_v50, %v856_v55  ;;  %v812_v4 = vadd.f32 %v15412_v47, %v811_v62  ;;  %922 = vst [vmem:[#allocation3 + $0x69] sm:$0xff] %v663_v57 }
 0x134   : > { %v649_v5 = vmul.f32 0.1, %v607_v58  ;;  %955 = vst [vmem:[#allocation3 + $0x129] sm:$0xff] %v15449_v60  ;;  %v859_v6 = vmul.f32 0.1, %v817_v61  ;;  %921 = vst [vmem:[#allocation3 + $0x61] sm:$0xff] %v662_v63  ;;  %10895 = vmatprep.mubr.f32.mxu0 %v662_v63 }
 0x135   : > { %v648_v8 = vmul.f32 0.1, %v602_v1  ;;  %v10788_v9 = vpop.f32.mrb[10].mxu0  ;;  %954 = vst [vmem:[#allocation3 + $0x121] sm:$0xff] %v15453_v3  ;;  %v858_v10 = vmul.f32 0.1, %v812_v4  ;;  %10896 = vmatmul.mubr.f32.gmra.mrb[24].mxu0 %v663_v57 }
 0x136   : > { %v10844_v11 = vpop.f32.mrb[10].mxu1  ;;  %v665_v12 = vmax.f32 %v607_v58, %v649_v5  ;;  %v617_v13 = vadd.f32 %v10788_v9, %v15412_v47  ;;  %v611_v14 = vpop.f32.mrb[11].mxu0  ;;  %v15459_v15 = vmax.f32 %v817_v61, %v859_v6 }
 0x137   : > { %v827_v16 = vadd.f32 %v10844_v11, %v15412_v47  ;;  %v821_v17 = vpop.f32.mrb[11].mxu1  ;;  %v664_v19 = vmax.f32 %v602_v1, %v648_v8  ;;  %v612_v20 = vadd.f32 %v15412_v47, %v611_v14  ;;  %v15463_v22 = vmax.f32 %v812_v4, %v858_v10 }
 0x138   : > { %v822_v23 = vadd.f32 %v15412_v47, %v821_v17  ;;  %924 = vst [vmem:[#allocation3 + $0x81] sm:$0xff] %v665_v12  ;;  %v651_v26 = vmul.f32 0.1, %v617_v13  ;;  %957 = vst [vmem:[#allocation3 + $0x141] sm:$0xff] %v15459_v15  ;;  %v10791_v30 = vpop.f32.mrb[12].mxu0  ;;  %v10847_v33 = vpop.f32.mrb[12].mxu1 }
 0x139   : > { %v861_v27 = vmul.f32 0.1, %v827_v16  ;;  %923 = vst [vmem:[#allocation3 + $0x79] sm:$0xff] %v664_v19  ;;  %v650_v29 = vmul.f32 0.1, %v612_v20  ;;  %10898 = vmatprep.mubr.f32.mxu0 %v664_v19  ;;  %956 = vst [vmem:[#allocation3 + $0x139] sm:$0xff] %v15463_v22  ;;  %v627_v36 = vadd.f32 %v10791_v30, %v15412_v47  ;;  %v837_v42 = vadd.f32 %v10847_v33, %v15412_v47 }
 0x13a   : > { %v860_v32 = vmul.f32 0.1, %v822_v23  ;;  %v667_v35 = vmax.f32 %v617_v13, %v651_v26  ;;  %v621_v38 = vpop.f32.mrb[13].mxu0  ;;  %10899 = vmatmul.mubr.f32.gmra.mrb[26].mxu0 %v665_v12  ;;  %v831_v44 = vpop.f32.mrb[13].mxu1  ;;  %v9133_v12 = vld [vmem:[%s17683_s3 + $0x110] sm:$0xff]  ;;  %v9134_v13 = vld [vmem:[%s17683_s3 + $0x118] sm:$0xff] }
 0x13b   : > { %v15469_v39 = vmax.f32 %v827_v16, %v861_v27  ;;  %v666_v45 = vmax.f32 %v612_v20, %v650_v29  ;;  %v622_v48 = vadd.f32 %v15412_v47, %v621_v38  ;;  %v832_v51 = vadd.f32 %v15412_v47, %v831_v44  ;;  %v9136_v26 = vld [vmem:[%s17683_s3 + $0x128] sm:$0xff]  ;;  %v15506_v27 = vld [vmem:[#allocation3 + $0x18] sm:$0xff]  ;;  %v15526_v30 = vld [vmem:[#allocation3 + $0x30] sm:$0xff] }
 0x13c   : > { %v15473_v50 = vmax.f32 %v822_v23, %v860_v32  ;;  %926 = vst [vmem:[#allocation3 + $0x99] sm:$0xff] %v667_v35  ;;  %v653_v52 = vmul.f32 0.1, %v627_v36  ;;  %v863_v53 = vmul.f32 0.1, %v837_v42  ;;  %v10794_v55 = vpop.f32.mrb[14].mxu0  ;;  %v15495_v19 = vpack.c.bf16 %v9134_v13, %v9133_v12 }
 0x13d   : > { %959 = vst [vmem:[#allocation3 + $0x159] sm:$0xff] %v15469_v39  ;;  %925 = vst [vmem:[#allocation3 + $0x91] sm:$0xff] %v666_v45  ;;  %v652_v54 = vmul.f32 0.1, %v622_v48  ;;  %10901 = vmatprep.mubr.f32.mxu0 %v666_v45  ;;  %v862_v56 = vmul.f32 0.1, %v832_v51  ;;  %v637_v58 = vadd.f32 %v10794_v55, %v15412_v47 }
 0x13e   : > { %958 = vst [vmem:[#allocation3 + $0x151] sm:$0xff] %v15473_v50  ;;  %v669_v57 = vmax.f32 %v627_v36, %v653_v52  ;;  %v631_v59 = vpop.f32.mrb[15].mxu0  ;;  %10902 = vmatmul.mubr.f32.gmra.mrb[28].mxu0 %v667_v35  ;;  %v15479_v61 = vmax.f32 %v837_v42, %v863_v53  ;;  %v10850_v62 = vpop.f32.mrb[14].mxu1  ;;  %v9135_v23 = vld [vmem:[%s17683_s3 + $0x120] sm:$0xff]  ;;  %v15546_v33 = vld [vmem:[#allocation3 + $0x48] sm:$0xff] }
 0x13f   : > { %v668_v63 = vmax.f32 %v622_v48, %v652_v54  ;;  %v632_v1 = vadd.f32 %v15412_v47, %v631_v59  ;;  %v15482_v4 = vmax.f32 %v832_v51, %v862_v56  ;;  %v847_v5 = vadd.f32 %v10850_v62, %v15412_v47  ;;  %v841_v6 = vpop.f32.mrb[15].mxu1  ;;  %v15566_v36 = vld [vmem:[#allocation3 + $0x60] sm:$0xff]  ;;  %v9150_v54 = vld [vmem:[%s17683_s3 + $0x198] sm:$0xff]  ;;  %v1321_v56 = vld [vmem:[#allocation3 + $0xa] sm:$0xff] }
 0x140   : > { %928 = vst [vmem:[#allocation3 + $0xb1] sm:$0xff] %v669_v57  ;;  %v655_v8 = vmul.f32 0.1, %v637_v58  ;;  %961 = vst [vmem:[#allocation3 + $0x171] sm:$0xff] %v15479_v61  ;;  %v842_v9 = vadd.f32 %v15412_v47, %v841_v6  ;;  %v15514_v29 = vpack.c.bf16 %v9136_v26, %v9135_v23  ;;  %v15586_v42 = vld [vmem:[#allocation3 + $0x78] sm:$0xff]  ;;  %v1320_v52 = vld [vmem:[#allocation3 + $0x2] sm:$0xff] }
 0x141   : > { %927 = vst [vmem:[#allocation3 + $0xa9] sm:$0xff] %v668_v63  ;;  %v654_v10 = vmul.f32 0.1, %v632_v1  ;;  %10904 = vmatprep.mubr.f32.mxu0 %v668_v63  ;;  %960 = vst [vmem:[#allocation3 + $0x169] sm:$0xff] %v15482_v4  ;;  %v865_v14 = vmul.f32 0.1, %v847_v5 }
 0x142   : > { %v671_v11 = vmax.f32 %v637_v58, %v655_v8  ;;  %10905 = vmatmul.mubr.f32.gmra.mrb[30].mxu0 %v669_v57  ;;  %v864_v47 = vmul.f32 0.1, %v842_v9  ;;  %v9152_v59 = vld [vmem:[%s17683_s3 + $0x1a8] sm:$0xff]  ;;  %v15666_v62 = vld [vmem:[#allocation3 + $0xd8] sm:$0xff]  ;;  %v15690_v8 = vld [vmem:[#allocation3 + $0xf0] sm:$0xff] }
 0x143   : > { %v670_v16 = vmax.f32 %v632_v1, %v654_v10  ;;  %10939 = vmatprep.mubr.f32.mxu0 %v15017_v0  ;;  %v881_v17 = vmax.f32 %v847_v5, %v865_v14  ;;  %v15672_v63 = vld [vmem:[#allocation3 + $0x22] sm:$0xff]  ;;  %v9154_v5 = vld [vmem:[%s17683_s3 + $0x1b8] sm:$0xff]  ;;  %v15712_v14 = vld [vmem:[#allocation3 + $0x4a] sm:$0xff] }
 0x144   : > { %930 = vst [vmem:[#allocation3 + $0xc9] sm:$0xff] %v671_v11  ;;  %v880_v20 = vmax.f32 %v842_v9, %v864_v47  ;;  %v15606_v45 = vld [vmem:[#allocation3 + $0x90] sm:$0xff]  ;;  %v15674_v1 = vld [vmem:[#allocation3 + $0xe0] sm:$0xff]  ;;  %v15698_v10 = vld [vmem:[#allocation3 + $0xf8] sm:$0xff] }
 0x145   : > { %929 = vst [vmem:[#allocation3 + $0xc1] sm:$0xff] %v670_v16  ;;  %11387 = vmatprep.mubr.f32.mxu1 %v670_v16  ;;  %963 = vst [vmem:[#allocation3 + $0x189] sm:$0xff] %v881_v17  ;;  %v15688_v6 = vld [vmem:[#allocation3 + $0x32] sm:$0xff]  ;;  %v15696_v9 = vld [vmem:[#allocation3 + $0x3a] sm:$0xff] }
 0x146   : > { %10940 = vmatmul.mubr.f32.vlgmr.msra.gmra.mrb[16].mxu0 %v15017_v0  ;;  %11388 = vmatmul.mubr.f32.vlgmr.msra.gmra.mrb[16].mxu1 %v671_v11  ;;  %962 = vst [vmem:[#allocation3 + $0x181] sm:$0xff] %v880_v20  ;;  %v15512_v0 = vld [vmem:[#allocation3 + $0x20] sm:$0xff]  ;;  %v9156_v13 = vld [vmem:[%s17683_s3 + $0x1c8] sm:$0xff]  ;;  %v15720_v47 = vld [vmem:[#allocation3 + $0x52] sm:$0xff] }
 0x147   : > { %13222 = vmatpush3.bf16.msra.mxu0 %v15406_v46  ;;  %13478 = vmatpush3.bf16.msra.mxu1 %v15325_v21  ;;  %v9137_v21 = vld [vmem:[%s17683_s3 + $0x130] sm:$0xff]  ;;  %v9155_v12 = vld [vmem:[%s17683_s3 + $0x1c0] sm:$0xff]  ;;  %v15714_v16 = vld [vmem:[#allocation3 + $0x108] sm:$0xff] }
 0x148   : > { %10942 = vmatprep.mubr.f32.mxu0 %v15506_v27  ;;  %11390 = vmatprep.mubr.f32.mxu1 %v15423_v7  ;;  %v9138_v7 = vld [vmem:[%s17683_s3 + $0x138] sm:$0xff]  ;;  %v15626_v51 = vld [vmem:[#allocation3 + $0xa8] sm:$0xff]  ;;  %v15722_v17 = vld [vmem:[#allocation3 + $0x110] sm:$0xff] }
 0x149   : > { %13224 = vmatprep.subr.bf16.mxu0 %v15495_v19  ;;  %13480 = vmatprep.subr.bf16.mxu1 %v15336_v25  ;;  %v15534_v32 = vpack.c.bf16 %v9138_v7, %v9137_v21  ;;  %v9157_v20 = vld [vmem:[%s17683_s3 + $0x1d0] sm:$0xff]  ;;  %v9158_v23 = vld [vmem:[%s17683_s3 + $0x1d8] sm:$0xff]  ;;  %v15736_v26 = vld [vmem:[#allocation3 + $0x62] sm:$0xff] }
 0x14a   : > { %10943 = vmatmul.mubr.f32.gmra.mrb[18].mxu0 %v15512_v0  ;;  %11391 = vmatmul.mubr.f32.gmra.mrb[18].mxu1 %v15419_v2  ;;  %v15532_v2 = vld [vmem:[#allocation3 + $0x38] sm:$0xff]  ;;  %v15744_v21 = vld [vmem:[#allocation3 + $0x6a] sm:$0xff] }
 0x14b   : > { %13226 = vmatpush3.bf16.msra.mxu0 %v15495_v19  ;;  %13482 = vmatpush3.bf16.msra.mxu1 %v15336_v25  ;;  %v9139_v25 = vld [vmem:[%s17683_s3 + $0x140] sm:$0xff]  ;;  %v15746_v7 = vld [vmem:[#allocation3 + $0x128] sm:$0xff] }
 0x14c   : > { %10945 = vmatprep.mubr.f32.mxu0 %v15526_v30  ;;  %11393 = vmatprep.mubr.f32.mxu1 %v15433_v24  ;;  %v9140_v24 = vld [vmem:[%s17683_s3 + $0x148] sm:$0xff]  ;;  %v15646_v55 = vld [vmem:[#allocation3 + $0xc0] sm:$0xff] }
 0x14d   : > { %13228 = vmatprep.subr.bf16.mxu0 %v15514_v29  ;;  %13484 = vmatprep.subr.bf16.mxu1 %v15346_v28  ;;  %v15554_v35 = vpack.c.bf16 %v9140_v24, %v9139_v25  ;;  %v15651_v57 = vld [vmem:[#allocation3 + $0xc8] sm:$0xff]  ;;  %v15748_v25 = vpack.c.bf16 %v9158_v23, %v9157_v20 }
 0x14e   : > { %10946 = vmatmul.mubr.f32.gmra.mrb[20].mxu0 %v15532_v2  ;;  %11394 = vmatmul.mubr.f32.gmra.mrb[20].mxu1 %v15429_v18  ;;  %v15552_v18 = vld [vmem:[#allocation3 + $0x50] sm:$0xff]  ;;  %v9160_v24 = vld [vmem:[%s17683_s3 + $0x1e8] sm:$0xff] }
 0x14f   : > { %13230 = vmatpush3.bf16.msra.mxu0 %v15514_v29  ;;  %13486 = vmatpush3.bf16.msra.mxu1 %v15346_v28  ;;  %v9141_v28 = vld [vmem:[%s17683_s3 + $0x150] sm:$0xff]  ;;  %v15832_v20 = vld [vmem:[#allocation3 + $0xc2] sm:$0xff] }
 0x150   : > { %10948 = vmatprep.mubr.f32.mxu0 %v15546_v33  ;;  %11396 = vmatprep.mubr.f32.mxu1 %v15443_v49  ;;  %v9142_v49 = vld [vmem:[%s17683_s3 + $0x158] sm:$0xff]  ;;  %v15838_v23 = vld [vmem:[#allocation3 + $0xca] sm:$0xff] }
 0x151   : > { %13232 = vmatprep.subr.bf16.mxu0 %v15534_v32  ;;  %13488 = vmatprep.subr.bf16.mxu1 %v15356_v31  ;;  %v15574_v38 = vpack.c.bf16 %v9142_v49, %v9141_v28  ;;  %v15760_v28 = vld [vmem:[#allocation3 + $0x7a] sm:$0xff] }
 0x152   : > { %10949 = vmatmul.mubr.f32.gmra.mrb[22].mxu0 %v15552_v18  ;;  %11397 = vmatmul.mubr.f32.gmra.mrb[22].mxu1 %v15439_v41  ;;  %v15572_v41 = vld [vmem:[#allocation3 + $0x68] sm:$0xff]  ;;  %v15762_v49 = vld [vmem:[#allocation3 + $0x138] sm:$0xff] }
 0x153   : > { %13234 = vmatpush3.bf16.msra.mxu0 %v15534_v32  ;;  %13490 = vmatpush3.bf16.msra.mxu1 %v15356_v31  ;;  %v9143_v31 = vld [vmem:[%s17683_s3 + $0x160] sm:$0xff] }
 0x154   : > { %10951 = vmatprep.mubr.f32.mxu0 %v15566_v36  ;;  %11399 = vmatprep.mubr.f32.mxu1 %v15453_v3  ;;  %v9144_v3 = vld [vmem:[%s17683_s3 + $0x168] sm:$0xff] }
 0x155   : > { %13236 = vmatprep.subr.bf16.mxu0 %v15554_v35  ;;  %13492 = vmatprep.subr.bf16.mxu1 %v15366_v34  ;;  %v15594_v44 = vpack.c.bf16 %v9144_v3, %v9143_v31  ;;  %v15768_v31 = vld [vmem:[#allocation3 + $0x82] sm:$0xff] }
 0x156   : > { %10952 = vmatmul.mubr.f32.gmra.mrb[24].mxu0 %v15572_v41  ;;  %11400 = vmatmul.mubr.f32.gmra.mrb[24].mxu1 %v15449_v60  ;;  %v15592_v60 = vld [vmem:[#allocation3 + $0x80] sm:$0xff] }
 0x157   : > { %13238 = vmatpush3.bf16.msra.mxu0 %v15554_v35  ;;  %13494 = vmatpush3.bf16.msra.mxu1 %v15366_v34  ;;  %v9145_v34 = vld [vmem:[%s17683_s3 + $0x170] sm:$0xff]  ;;  %v15770_v3 = vld [vmem:[#allocation3 + $0x140] sm:$0xff] }
 0x158   : > { %10954 = vmatprep.mubr.f32.mxu0 %v15586_v42  ;;  %11402 = vmatprep.mubr.f32.mxu1 %v15463_v22  ;;  %v9146_v22 = vld [vmem:[%s17683_s3 + $0x178] sm:$0xff] }
 0x159   : > { %13240 = vmatprep.subr.bf16.mxu0 %v15574_v38  ;;  %13496 = vmatprep.subr.bf16.mxu1 %v15376_v37  ;;  %v15614_v48 = vpack.c.bf16 %v9146_v22, %v9145_v34  ;;  %v9162_v22 = vld [vmem:[%s17683_s3 + $0x1f8] sm:$0xff] }
 0x15a   : > { %10955 = vmatmul.mubr.f32.gmra.mrb[26].mxu0 %v15592_v60  ;;  %11403 = vmatmul.mubr.f32.gmra.mrb[26].mxu1 %v15459_v15  ;;  %v15612_v15 = vld [vmem:[#allocation3 + $0x98] sm:$0xff] }
 0x15b   : > { %13242 = vmatpush3.bf16.msra.mxu0 %v15574_v38  ;;  %13498 = vmatpush3.bf16.msra.mxu1 %v15376_v37  ;;  %v9147_v37 = vld [vmem:[%s17683_s3 + $0x180] sm:$0xff] }
 0x15c   : > { %10957 = vmatprep.mubr.f32.mxu0 %v15606_v45  ;;  %11405 = vmatprep.mubr.f32.mxu1 %v15473_v50  ;;  %v9148_v50 = vld [vmem:[%s17683_s3 + $0x188] sm:$0xff] }
 0x15d   : > { %13244 = vmatprep.subr.bf16.mxu0 %v15594_v44  ;;  %13500 = vmatprep.subr.bf16.mxu1 %v15386_v40  ;;  %v15634_v53 = vpack.c.bf16 %v9148_v50, %v9147_v37  ;;  %v15784_v37 = vld [vmem:[#allocation3 + $0x92] sm:$0xff] }
 0x15e   : > { %10958 = vmatmul.mubr.f32.gmra.mrb[28].mxu0 %v15612_v15  ;;  %11406 = vmatmul.mubr.f32.gmra.mrb[28].mxu1 %v15469_v39  ;;  %v15632_v39 = vld [vmem:[#allocation3 + $0xb0] sm:$0xff] }
 0x15f   : > { %13246 = vmatpush3.bf16.msra.mxu0 %v15594_v44  ;;  %13502 = vmatpush3.bf16.msra.mxu1 %v15386_v40  ;;  %v9149_v40 = vld [vmem:[%s17683_s3 + $0x190] sm:$0xff] }
 0x160   : > { %10960 = vmatprep.mubr.f32.mxu0 %v15626_v51  ;;  %11408 = vmatprep.mubr.f32.mxu1 %v15482_v4  ;;  %v15653_v58 = vpack.c.bf16 %v9150_v54, %v9149_v40  ;;  %v15786_v50 = vld [vmem:[#allocation3 + $0x150] sm:$0xff]  ;;  %v15794_v40 = vld [vmem:[#allocation3 + $0x158] sm:$0xff] }
 0x161   : > { %13248 = vmatprep.subr.bf16.mxu0 %v15614_v48  ;;  %13504 = vmatprep.subr.bf16.mxu1 %v15396_v43 }
 0x162   : > { %10961 = vmatmul.mubr.f32.gmra.mrb[30].mxu0 %v15632_v39  ;;  %11409 = vmatmul.mubr.f32.gmra.mrb[30].mxu1 %v15479_v61  ;;  %v15664_v61 = vld [vmem:[#allocation3 + $0x1a] sm:$0xff] }
 0x163   : > { %13250 = vmatpush3.bf16.msra.mxu0 %v15614_v48  ;;  %13506 = vmatpush3.bf16.msra.mxu1 %v15396_v43  ;;  %v9151_v43 = vld [vmem:[%s17683_s3 + $0x1a0] sm:$0xff] }
 0x164   : > { %11443 = vmatprep.mubr.f32.mxu1 %v15646_v55  ;;  %10995 = vmatprep.mubr.f32.mxu0 %v1320_v52  ;;  %v15676_v4 = vpack.c.bf16 %v9152_v59, %v9151_v43  ;;  %v15792_v52 = vld [vmem:[#allocation3 + $0x9a] sm:$0xff]  ;;  %v15808_v43 = vld [vmem:[#allocation3 + $0xaa] sm:$0xff] }
 0x165   : > { %13252 = vmatprep.subr.bf16.mxu0 %v15634_v53  ;;  %13508 = vmatprep.subr.bf16.mxu1 %v15406_v46  ;;  %v15810_v59 = vld [vmem:[#allocation3 + $0x168] sm:$0xff] }
 0x166   : > { %10996 = vmatmul.mubr.f32.vlgmr.msra.gmra.mrb[16].mxu0 %v1321_v56  ;;  %11444 = vmatmul.mubr.f32.vlgmr.msra.gmra.mrb[16].mxu1 %v15651_v57  ;;  %v9164_v56 = vld [vmem:[%s17683_s3 + $0x208] sm:$0xff] }
 0x167   : > { %13254 = vmatpush3.bf16.msra.mxu0 %v15634_v53  ;;  %13510 = vmatpush3.bf16.msra.mxu1 %v15406_v46  ;;  %v9153_v46 = vld [vmem:[%s17683_s3 + $0x1b0] sm:$0xff] }
 0x168   : > { %10998 = vmatprep.mubr.f32.mxu0 %v15664_v61  ;;  %11446 = vmatprep.mubr.f32.mxu1 %v15666_v62  ;;  %v15700_v11 = vpack.c.bf16 %v9154_v5, %v9153_v46  ;;  %v15816_v46 = vld [vmem:[#allocation3 + $0xb2] sm:$0xff] }
 0x169   : > { %13256 = vmatprep.subr.bf16.mxu0 %v15653_v58  ;;  %13512 = vmatprep.subr.bf16.mxu1 %v15495_v19  ;;  %v15818_v5 = vld [vmem:[#allocation3 + $0x170] sm:$0xff] }
 0x16a   : > { %10999 = vmatmul.mubr.f32.gmra.mrb[18].mxu0 %v15672_v63  ;;  %11447 = vmatmul.mubr.f32.gmra.mrb[18].mxu1 %v15674_v1 }
 0x16b   : > { %13258 = vmatpush3.bf16.msra.mxu0 %v15653_v58  ;;  %13514 = vmatpush3.bf16.msra.mxu1 %v15495_v19  ;;  %v15724_v19 = vpack.c.bf16 %v9156_v13, %v9155_v12  ;;  %v9166_v13 = vld [vmem:[%s17683_s3 + $0x218] sm:$0xff] }
 0x16c   : > { %11001 = vmatprep.mubr.f32.mxu0 %v15688_v6  ;;  %11449 = vmatprep.mubr.f32.mxu1 %v15690_v8 }
 0x16d   : > { %13260 = vmatprep.subr.bf16.mxu0 %v15676_v4  ;;  %13516 = vmatprep.subr.bf16.mxu1 %v15514_v29 }
 0x16e   : > { %11002 = vmatmul.mubr.f32.gmra.mrb[20].mxu0 %v15696_v9  ;;  %11450 = vmatmul.mubr.f32.gmra.mrb[20].mxu1 %v15698_v10 }
 0x16f   : > { %13262 = vmatpush3.bf16.msra.mxu0 %v15676_v4  ;;  %13518 = vmatpush3.bf16.msra.mxu1 %v15514_v29  ;;  %v15738_v29 = vld [vmem:[#allocation3 + $0x120] sm:$0xff] }
 0x170   : > { %11004 = vmatprep.mubr.f32.mxu0 %v15712_v14  ;;  %11452 = vmatprep.mubr.f32.mxu1 %v15714_v16 }
 0x171   : > { %13264 = vmatprep.subr.bf16.mxu0 %v15700_v11  ;;  %13520 = vmatprep.subr.bf16.mxu1 %v15534_v32 }
 0x172   : > { %11005 = vmatmul.mubr.f32.gmra.mrb[22].mxu0 %v15720_v47  ;;  %11453 = vmatmul.mubr.f32.gmra.mrb[22].mxu1 %v15722_v17 }
 0x173   : > { %13266 = vmatpush3.bf16.msra.mxu0 %v15700_v11  ;;  %13522 = vmatpush3.bf16.msra.mxu1 %v15534_v32  ;;  %v9159_v32 = vld [vmem:[%s17683_s3 + $0x1e0] sm:$0xff] }
 0x174   : > { %11007 = vmatprep.mubr.f32.mxu0 %v15736_v26  ;;  %11455 = vmatprep.mubr.f32.mxu1 %v15738_v29  ;;  %v15772_v34 = vpack.c.bf16 %v9160_v24, %v9159_v32  ;;  %v15852_v24 = vld [vmem:[#allocation3 + $0xda] sm:$0xff] }
 0x175   : > { %13268 = vmatprep.subr.bf16.mxu0 %v15724_v19  ;;  %13524 = vmatprep.subr.bf16.mxu1 %v15554_v35 }
 0x176   : > { %11008 = vmatmul.mubr.f32.gmra.mrb[24].mxu0 %v15744_v21  ;;  %11456 = vmatmul.mubr.f32.gmra.mrb[24].mxu1 %v15746_v7 }
 0x177   : > { %13270 = vmatpush3.bf16.msra.mxu0 %v15724_v19  ;;  %13526 = vmatpush3.bf16.msra.mxu1 %v15554_v35  ;;  %v9161_v35 = vld [vmem:[%s17683_s3 + $0x1f0] sm:$0xff] }
 0x178   : > { %11010 = vmatprep.mubr.f32.mxu0 %v15760_v28  ;;  %11458 = vmatprep.mubr.f32.mxu1 %v15762_v49  ;;  %v15796_v54 = vpack.c.bf16 %v9162_v22, %v9161_v35  ;;  %v15872_v22 = vld [vmem:[#allocation3 + $0xf2] sm:$0xff] }
 0x179   : > { %13272 = vmatprep.subr.bf16.mxu0 %v15748_v25  ;;  %13528 = vmatprep.subr.bf16.mxu1 %v15574_v38 }
 0x17a   : > { %11011 = vmatmul.mubr.f32.gmra.mrb[26].mxu0 %v15768_v31  ;;  %11459 = vmatmul.mubr.f32.gmra.mrb[26].mxu1 %v15770_v3 }
 0x17b   : > { %13274 = vmatpush3.bf16.msra.mxu0 %v15748_v25  ;;  %13530 = vmatpush3.bf16.msra.mxu1 %v15574_v38  ;;  %v9163_v38 = vld [vmem:[%s17683_s3 + $0x200] sm:$0xff] }
 0x17c   : > { %11013 = vmatprep.mubr.f32.mxu0 %v15784_v37  ;;  %11461 = vmatprep.mubr.f32.mxu1 %v15786_v50  ;;  %v15820_v12 = vpack.c.bf16 %v9164_v56, %v9163_v38  ;;  %v15892_v56 = vld [vmem:[#allocation3 + $0x10a] sm:$0xff] }
 0x17d   : > { %13276 = vmatprep.subr.bf16.mxu0 %v15772_v34  ;;  %13532 = vmatprep.subr.bf16.mxu1 %v15594_v44 }
 0x17e   : > { %11014 = vmatmul.mubr.f32.gmra.mrb[28].mxu0 %v15792_v52  ;;  %11462 = vmatmul.mubr.f32.gmra.mrb[28].mxu1 %v15794_v40 }
 0x17f   : > { %13278 = vmatpush3.bf16.msra.mxu0 %v15772_v34  ;;  %13534 = vmatpush3.bf16.msra.mxu1 %v15594_v44  ;;  %v9165_v44 = vld [vmem:[%s17683_s3 + $0x210] sm:$0xff] }
 0x180   : > { %11016 = vmatprep.mubr.f32.mxu0 %v15808_v43  ;;  %11464 = vmatprep.mubr.f32.mxu1 %v15810_v59  ;;  %v15840_v32 = vpack.c.bf16 %v9166_v13, %v9165_v44  ;;  %v15912_v13 = vld [vmem:[#allocation3 + $0x122] sm:$0xff] }
 0x181   : > { %13280 = vmatprep.subr.bf16.mxu0 %v15796_v54  ;;  %13536 = vmatprep.subr.bf16.mxu1 %v15614_v48 }
 0x182   : > { %11017 = vmatmul.mubr.f32.gmra.mrb[30].mxu0 %v15816_v46  ;;  %11465 = vmatmul.mubr.f32.gmra.mrb[30].mxu1 %v15818_v5 }
 0x183   : > { %13282 = vmatpush3.bf16.msra.mxu0 %v15796_v54  ;;  %13538 = vmatpush3.bf16.msra.mxu1 %v15614_v48  ;;  %v9167_v48 = vld [vmem:[%s17683_s3 + $0x220] sm:$0xff] }
 0x184   : > { %11051 = vmatprep.mubr.f32.mxu0 %v15506_v27  ;;  %11499 = vmatprep.mubr.f32.mxu1 %v15832_v20  ;;  %v9168_v27 = vld [vmem:[%s17683_s3 + $0x228] sm:$0xff] }
 0x185   : > { %13284 = vmatprep.subr.bf16.mxu0 %v15820_v12  ;;  %13540 = vmatprep.subr.bf16.mxu1 %v15634_v53  ;;  %v15860_v35 = vpack.c.bf16 %v9168_v27, %v9167_v48  ;;  %v15932_v27 = vld [vmem:[#allocation3 + $0x13a] sm:$0xff] }
 0x186   : > { %11052 = vmatmul.mubr.f32.vlgmr.msra.gmra.mrb[16].mxu0 %v15512_v0  ;;  %11500 = vmatmul.mubr.f32.vlgmr.msra.gmra.mrb[16].mxu1 %v15838_v23  ;;  %v15858_v0 = vld [vmem:[#allocation3 + $0xe2] sm:$0xff] }
 0x187   : > { %13286 = vmatpush3.bf16.msra.mxu0 %v15820_v12  ;;  %13542 = vmatpush3.bf16.msra.mxu1 %v15634_v53  ;;  %v9169_v53 = vld [vmem:[%s17683_s3 + $0x230] sm:$0xff] }
 0x188   : > { %11054 = vmatprep.mubr.f32.mxu0 %v15526_v30  ;;  %11502 = vmatprep.mubr.f32.mxu1 %v15852_v24  ;;  %v9170_v30 = vld [vmem:[%s17683_s3 + $0x238] sm:$0xff] }
 0x189   : > { %13288 = vmatprep.subr.bf16.mxu0 %v15840_v32  ;;  %13544 = vmatprep.subr.bf16.mxu1 %v15653_v58  ;;  %v15880_v38 = vpack.c.bf16 %v9170_v30, %v9169_v53  ;;  %v15952_v30 = vld [vmem:[#allocation3 + $0x152] sm:$0xff] }
 0x18a   : > { %11055 = vmatmul.mubr.f32.gmra.mrb[18].mxu0 %v15532_v2  ;;  %11503 = vmatmul.mubr.f32.gmra.mrb[18].mxu1 %v15858_v0  ;;  %v15878_v2 = vld [vmem:[#allocation3 + $0xfa] sm:$0xff] }
 0x18b   : > { %13290 = vmatpush3.bf16.msra.mxu0 %v15840_v32  ;;  %13546 = vmatpush3.bf16.msra.mxu1 %v15653_v58  ;;  %v9171_v58 = vld [vmem:[%s17683_s3 + $0x240] sm:$0xff] }
 0x18c   : > { %11057 = vmatprep.mubr.f32.mxu0 %v15546_v33  ;;  %11505 = vmatprep.mubr.f32.mxu1 %v15872_v22  ;;  %v9172_v33 = vld [vmem:[%s17683_s3 + $0x248] sm:$0xff] }
 0x18d   : > { %13292 = vmatprep.subr.bf16.mxu0 %v15860_v35  ;;  %13548 = vmatprep.subr.bf16.mxu1 %v15676_v4  ;;  %v15900_v44 = vpack.c.bf16 %v9172_v33, %v9171_v58  ;;  %v15972_v33 = vld [vmem:[#allocation3 + $0x16a] sm:$0xff] }
 0x18e   : > { %11058 = vmatmul.mubr.f32.gmra.mrb[20].mxu0 %v15552_v18  ;;  %11506 = vmatmul.mubr.f32.gmra.mrb[20].mxu1 %v15878_v2  ;;  %v15898_v18 = vld [vmem:[#allocation3 + $0x112] sm:$0xff] }
 0x18f   : > { %13294 = vmatpush3.bf16.msra.mxu0 %v15860_v35  ;;  %13550 = vmatpush3.bf16.msra.mxu1 %v15676_v4  ;;  %v9173_v4 = vld [vmem:[%s17683_s3 + $0x250] sm:$0xff] }
 0x190   : > { %11060 = vmatprep.mubr.f32.mxu0 %v15566_v36  ;;  %11508 = vmatprep.mubr.f32.mxu1 %v15892_v56  ;;  %v9174_v36 = vld [vmem:[%s17683_s3 + $0x258] sm:$0xff] }
 0x191   : > { %13296 = vmatprep.subr.bf16.mxu0 %v15880_v38  ;;  %13552 = vmatprep.subr.bf16.mxu1 %v15700_v11  ;;  %v15920_v48 = vpack.c.bf16 %v9174_v36, %v9173_v4  ;;  %v1708_v36 = vld [vmem:[#allocation3 + $0x19] sm:$0xff] }
 0x192   : > { %11061 = vmatmul.mubr.f32.gmra.mrb[22].mxu0 %v15572_v41  ;;  %11509 = vmatmul.mubr.f32.gmra.mrb[22].mxu1 %v15898_v18  ;;  %v15918_v41 = vld [vmem:[#allocation3 + $0x12a] sm:$0xff] }
 0x193   : > { %13298 = vmatpush3.bf16.msra.mxu0 %v15880_v38  ;;  %13554 = vmatpush3.bf16.msra.mxu1 %v15700_v11  ;;  %v9175_v11 = vld [vmem:[%s17683_s3 + $0x260] sm:$0xff] }
 0x194   : > { %11063 = vmatprep.mubr.f32.mxu0 %v15586_v42  ;;  %11511 = vmatprep.mubr.f32.mxu1 %v15912_v13  ;;  %v9176_v42 = vld [vmem:[%s17683_s3 + $0x268] sm:$0xff] }
 0x195   : > { %13300 = vmatprep.subr.bf16.mxu0 %v15900_v44  ;;  %13556 = vmatprep.subr.bf16.mxu1 %v15724_v19  ;;  %v15940_v53 = vpack.c.bf16 %v9176_v42, %v9175_v11  ;;  %v9183_v42 = vld [vmem:[%s17683_s3 + $0x2a0] sm:$0xff] }
 0x196   : > { %11064 = vmatmul.mubr.f32.gmra.mrb[24].mxu0 %v15592_v60  ;;  %11512 = vmatmul.mubr.f32.gmra.mrb[24].mxu1 %v15918_v41  ;;  %v15938_v60 = vld [vmem:[#allocation3 + $0x142] sm:$0xff] }
 0x197   : > { %13302 = vmatpush3.bf16.msra.mxu0 %v15900_v44  ;;  %13558 = vmatpush3.bf16.msra.mxu1 %v15724_v19  ;;  %v9177_v19 = vld [vmem:[%s17683_s3 + $0x270] sm:$0xff] }
 0x198   : > { %11066 = vmatprep.mubr.f32.mxu0 %v15606_v45  ;;  %11514 = vmatprep.mubr.f32.mxu1 %v15932_v27  ;;  %v9178_v45 = vld [vmem:[%s17683_s3 + $0x278] sm:$0xff] }
 0x199   : > { %13304 = vmatprep.subr.bf16.mxu0 %v15920_v48  ;;  %13560 = vmatprep.subr.bf16.mxu1 %v15748_v25  ;;  %v15960_v58 = vpack.c.bf16 %v9178_v45, %v9177_v19  ;;  %v16026_v45 = vld [vmem:[#allocation3 + $0x49] sm:$0xff] }
 0x19a   : > { %11067 = vmatmul.mubr.f32.gmra.mrb[26].mxu0 %v15612_v15  ;;  %11515 = vmatmul.mubr.f32.gmra.mrb[26].mxu1 %v15938_v60  ;;  %v15958_v15 = vld [vmem:[#allocation3 + $0x15a] sm:$0xff] }
 0x19b   : > { %13306 = vmatpush3.bf16.msra.mxu0 %v15920_v48  ;;  %13562 = vmatpush3.bf16.msra.mxu1 %v15748_v25  ;;  %v9179_v25 = vld [vmem:[%s17683_s3 + $0x280] sm:$0xff] }
 0x19c   : > { %11069 = vmatprep.mubr.f32.mxu0 %v15626_v51  ;;  %11517 = vmatprep.mubr.f32.mxu1 %v15952_v30  ;;  %v9180_v51 = vld [vmem:[%s17683_s3 + $0x288] sm:$0xff] }
 0x19d   : > { %13308 = vmatprep.subr.bf16.mxu0 %v15940_v53  ;;  %13564 = vmatprep.subr.bf16.mxu1 %v15772_v34  ;;  %v15980_v4 = vpack.c.bf16 %v9180_v51, %v9179_v25  ;;  %v16046_v51 = vld [vmem:[#allocation3 + $0x61] sm:$0xff] }
 0x19e   : > { %11070 = vmatmul.mubr.f32.gmra.mrb[28].mxu0 %v15632_v39  ;;  %11518 = vmatmul.mubr.f32.gmra.mrb[28].mxu1 %v15958_v15  ;;  %v15978_v39 = vld [vmem:[#allocation3 + $0x172] sm:$0xff] }
 0x19f   : > { %13310 = vmatpush3.bf16.msra.mxu0 %v15940_v53  ;;  %13566 = vmatpush3.bf16.msra.mxu1 %v15772_v34  ;;  %v9181_v34 = vld [vmem:[%s17683_s3 + $0x290] sm:$0xff] }
 0x1a0   : > { %11072 = vmatprep.mubr.f32.mxu0 %v15646_v55  ;;  %11520 = vmatprep.mubr.f32.mxu1 %v15972_v33  ;;  %v9182_v55 = vld [vmem:[%s17683_s3 + $0x298] sm:$0xff] }
 0x1a1   : > { %13312 = vmatprep.subr.bf16.mxu0 %v15960_v58  ;;  %13568 = vmatprep.subr.bf16.mxu1 %v15796_v54  ;;  %v15995_v11 = vpack.c.bf16 %v9182_v55, %v9181_v34  ;;  %v16066_v55 = vld [vmem:[#allocation3 + $0x79] sm:$0xff] }
 0x1a2   : > { %11073 = vmatmul.mubr.f32.gmra.mrb[30].mxu0 %v15651_v57  ;;  %11521 = vmatmul.mubr.f32.gmra.mrb[30].mxu1 %v15978_v39  ;;  %v1709_v57 = vld [vmem:[#allocation3 + $0x21] sm:$0xff] }
 0x1a3   : > { %13314 = vmatpush3.bf16.msra.mxu0 %v15960_v58  ;;  %13570 = vmatpush3.bf16.msra.mxu1 %v15796_v54  ;;  %v9184_v54 = vld [vmem:[%s17683_s3 + $0x2a8] sm:$0xff] }
 0x1a4   : > { %11107 = vmatprep.mubr.f32.mxu0 %v1708_v36  ;;  %11555 = vmatprep.mubr.f32.mxu1 %v15666_v62  ;;  %v16006_v62 = vld [vmem:[#allocation3 + $0x31] sm:$0xff]  ;;  %v16014_v19 = vpack.c.bf16 %v9184_v54, %v9183_v42  ;;  %v16106_v54 = vld [vmem:[#allocation3 + $0xa9] sm:$0xff] }
 0x1a5   : > { %13316 = vmatprep.subr.bf16.mxu0 %v15980_v4  ;;  %13572 = vmatprep.subr.bf16.mxu1 %v15820_v12 }
 0x1a6   : > { %11108 = vmatmul.mubr.f32.vlgmr.msra.gmra.mrb[16].mxu0 %v1709_v57  ;;  %11556 = vmatmul.mubr.f32.vlgmr.msra.gmra.mrb[16].mxu1 %v15674_v1  ;;  %v16012_v1 = vld [vmem:[#allocation3 + $0x39] sm:$0xff]  ;;  %v16086_v57 = vld [vmem:[#allocation3 + $0x91] sm:$0xff] }
 0x1a7   : > { %13318 = vmatpush3.bf16.msra.mxu0 %v15980_v4  ;;  %13574 = vmatpush3.bf16.msra.mxu1 %v15820_v12  ;;  %v9185_v12 = vld [vmem:[%s17683_s3 + $0x2b0] sm:$0xff] }
 0x1a8   : > { %11110 = vmatprep.mubr.f32.mxu0 %v16006_v62  ;;  %11558 = vmatprep.mubr.f32.mxu1 %v15690_v8  ;;  %v9186_v8 = vld [vmem:[%s17683_s3 + $0x2b8] sm:$0xff] }
 0x1a9   : > { %13320 = vmatprep.subr.bf16.mxu0 %v15995_v11  ;;  %13576 = vmatprep.subr.bf16.mxu1 %v15840_v32  ;;  %v16034_v25 = vpack.c.bf16 %v9186_v8, %v9185_v12  ;;  %v16114_v12 = vld [vmem:[#allocation3 + $0x180] sm:$0xff] }
 0x1aa   : > { %11111 = vmatmul.mubr.f32.gmra.mrb[18].mxu0 %v16012_v1  ;;  %11559 = vmatmul.mubr.f32.gmra.mrb[18].mxu1 %v15698_v10  ;;  %v16032_v10 = vld [vmem:[#allocation3 + $0x51] sm:$0xff] }
 0x1ab   : > { %13322 = vmatpush3.bf16.msra.mxu0 %v15995_v11  ;;  %13578 = vmatpush3.bf16.msra.mxu1 %v15840_v32  ;;  %v9187_v32 = vld [vmem:[%s17683_s3 + $0x2c0] sm:$0xff] }
 0x1ac   : > { %11113 = vmatprep.mubr.f32.mxu0 %v16026_v45  ;;  %11561 = vmatprep.mubr.f32.mxu1 %v15714_v16  ;;  %v9188_v16 = vld [vmem:[%s17683_s3 + $0x2c8] sm:$0xff] }
 0x1ad   : > { %13324 = vmatprep.subr.bf16.mxu0 %v16014_v19  ;;  %13580 = vmatprep.subr.bf16.mxu1 %v15860_v35  ;;  %v16054_v34 = vpack.c.bf16 %v9188_v16, %v9187_v32  ;;  %v16128_v32 = vld [vmem:[#allocation3 + $0xc1] sm:$0xff] }
 0x1ae   : > { %11114 = vmatmul.mubr.f32.gmra.mrb[20].mxu0 %v16032_v10  ;;  %11562 = vmatmul.mubr.f32.gmra.mrb[20].mxu1 %v15722_v17  ;;  %v16052_v17 = vld [vmem:[#allocation3 + $0x69] sm:$0xff] }
 0x1af   : > { %13326 = vmatpush3.bf16.msra.mxu0 %v16014_v19  ;;  %13582 = vmatpush3.bf16.msra.mxu1 %v15860_v35  ;;  %v9189_v35 = vld [vmem:[%s17683_s3 + $0x2d0] sm:$0xff]  ;;  %v16136_v16 = vld [vmem:[#allocation3 + $0x188] sm:$0xff] }
 0x1b0   : > { %11116 = vmatprep.mubr.f32.mxu0 %v16046_v51  ;;  %11564 = vmatprep.mubr.f32.mxu1 %v15738_v29  ;;  %v9190_v29 = vld [vmem:[%s17683_s3 + $0x2d8] sm:$0xff] }
 0x1b1   : > { %13328 = vmatprep.subr.bf16.mxu0 %v16034_v25  ;;  %13584 = vmatprep.subr.bf16.mxu1 %v15880_v38  ;;  %v16074_v36 = vpack.c.bf16 %v9190_v29, %v9189_v35  ;;  %v9198_v29 = vld [vmem:[%s17683_s3 + $0x318] sm:$0xff] }
 0x1b2   : > { %11117 = vmatmul.mubr.f32.gmra.mrb[22].mxu0 %v16052_v17  ;;  %11565 = vmatmul.mubr.f32.gmra.mrb[22].mxu1 %v15746_v7  ;;  %v16072_v7 = vld [vmem:[#allocation3 + $0x81] sm:$0xff] }
 0x1b3   : > { %13330 = vmatpush3.bf16.msra.mxu0 %v16034_v25  ;;  %13586 = vmatpush3.bf16.msra.mxu1 %v15880_v38  ;;  %v9191_v38 = vld [vmem:[%s17683_s3 + $0x2e0] sm:$0xff] }
 0x1b4   : > { %11119 = vmatprep.mubr.f32.mxu0 %v16066_v55  ;;  %11567 = vmatprep.mubr.f32.mxu1 %v15762_v49  ;;  %v9192_v49 = vld [vmem:[%s17683_s3 + $0x2e8] sm:$0xff] }
 0x1b5   : > { %13332 = vmatprep.subr.bf16.mxu0 %v16054_v34  ;;  %13588 = vmatprep.subr.bf16.mxu1 %v15900_v44  ;;  %v16094_v42 = vpack.c.bf16 %v9192_v49, %v9191_v38  ;;  %v16150_v38 = vld [vmem:[#allocation3 + $0xd9] sm:$0xff]  ;;  %v16156_v49 = vld [vmem:[#allocation3 + $0xe1] sm:$0xff] }
 0x1b6   : > { %11120 = vmatmul.mubr.f32.gmra.mrb[24].mxu0 %v16072_v7  ;;  %11568 = vmatmul.mubr.f32.gmra.mrb[24].mxu1 %v15770_v3  ;;  %v16092_v3 = vld [vmem:[#allocation3 + $0x99] sm:$0xff] }
 0x1b7   : > { %13334 = vmatpush3.bf16.msra.mxu0 %v16054_v34  ;;  %13590 = vmatpush3.bf16.msra.mxu1 %v15900_v44  ;;  %v9193_v44 = vld [vmem:[%s17683_s3 + $0x2f0] sm:$0xff] }
 0x1b8   : > { %11122 = vmatprep.mubr.f32.mxu0 %v16086_v57  ;;  %11570 = vmatprep.mubr.f32.mxu1 %v15786_v50  ;;  %v9194_v50 = vld [vmem:[%s17683_s3 + $0x2f8] sm:$0xff] }
 0x1b9   : > { %13336 = vmatprep.subr.bf16.mxu0 %v16074_v36  ;;  %13592 = vmatprep.subr.bf16.mxu1 %v15920_v48  ;;  %v16116_v8 = vpack.c.bf16 %v9194_v50, %v9193_v44  ;;  %v16170_v50 = vld [vmem:[#allocation3 + $0xf1] sm:$0xff] }
 0x1ba   : > { %11123 = vmatmul.mubr.f32.gmra.mrb[26].mxu0 %v16092_v3  ;;  %11571 = vmatmul.mubr.f32.gmra.mrb[26].mxu1 %v15794_v40  ;;  %v16112_v40 = vld [vmem:[#allocation3 + $0xb1] sm:$0xff] }
 0x1bb   : > { %13338 = vmatpush3.bf16.msra.mxu0 %v16074_v36  ;;  %13594 = vmatpush3.bf16.msra.mxu1 %v15920_v48  ;;  %v9195_v48 = vld [vmem:[%s17683_s3 + $0x300] sm:$0xff] }
 0x1bc   : > { %11125 = vmatprep.mubr.f32.mxu0 %v16106_v54  ;;  %11573 = vmatprep.mubr.f32.mxu1 %v15810_v59  ;;  %v9196_v59 = vld [vmem:[%s17683_s3 + $0x308] sm:$0xff] }
 0x1bd   : > { %13340 = vmatprep.subr.bf16.mxu0 %v16094_v42  ;;  %13596 = vmatprep.subr.bf16.mxu1 %v15940_v53  ;;  %v16138_v35 = vpack.c.bf16 %v9196_v59, %v9195_v48  ;;  %v16190_v59 = vld [vmem:[#allocation3 + $0x109] sm:$0xff] }
 0x1be   : > { %11126 = vmatmul.mubr.f32.gmra.mrb[28].mxu0 %v16112_v40  ;;  %11574 = vmatmul.mubr.f32.gmra.mrb[28].mxu1 %v15818_v5  ;;  %v16134_v5 = vld [vmem:[#allocation3 + $0xc9] sm:$0xff] }
 0x1bf   : > { %13342 = vmatpush3.bf16.msra.mxu0 %v16094_v42  ;;  %13598 = vmatpush3.bf16.msra.mxu1 %v15940_v53  ;;  %v9197_v53 = vld [vmem:[%s17683_s3 + $0x310] sm:$0xff] }
 0x1c0   : > { %11128 = vmatprep.mubr.f32.mxu0 %v16128_v32  ;;  %11576 = vmatprep.mubr.f32.mxu1 %v16114_v12  ;;  %v16158_v44 = vpack.c.bf16 %v9198_v29, %v9197_v53  ;;  %v16210_v29 = vld [vmem:[#allocation3 + $0x121] sm:$0xff] }
 0x1c1   : > { %13344 = vmatprep.subr.bf16.mxu0 %v16116_v8  ;;  %13600 = vmatprep.subr.bf16.mxu1 %v15960_v58 }
 0x1c2   : > { %11129 = vmatmul.mubr.f32.gmra.mrb[30].mxu0 %v16134_v5  ;;  %11577 = vmatmul.mubr.f32.gmra.mrb[30].mxu1 %v16136_v16 }
 0x1c3   : > { %13346 = vmatpush3.bf16.msra.mxu0 %v16116_v8  ;;  %13602 = vmatpush3.bf16.msra.mxu1 %v15960_v58  ;;  %v9199_v58 = vld [vmem:[%s17683_s3 + $0x320] sm:$0xff] }
 0x1c4   : > { %11163 = vmatprep.mubr.f32.mxu0 %v15664_v61  ;;  %11611 = vmatprep.mubr.f32.mxu1 %v16150_v38  ;;  %v9200_v61 = vld [vmem:[%s17683_s3 + $0x328] sm:$0xff] }
 0x1c5   : > { %13348 = vmatprep.subr.bf16.mxu0 %v16138_v35  ;;  %13604 = vmatprep.subr.bf16.mxu1 %v15980_v4  ;;  %v16178_v48 = vpack.c.bf16 %v9200_v61, %v9199_v58  ;;  %v16230_v61 = vld [vmem:[#allocation3 + $0x139] sm:$0xff] }
 0x1c6   : > { %11164 = vmatmul.mubr.f32.vlgmr.msra.gmra.mrb[16].mxu0 %v15672_v63  ;;  %11612 = vmatmul.mubr.f32.vlgmr.msra.gmra.mrb[16].mxu1 %v16156_v49  ;;  %v16176_v63 = vld [vmem:[#allocation3 + $0xf9] sm:$0xff] }
 0x1c7   : > { %13350 = vmatpush3.bf16.msra.mxu0 %v16138_v35  ;;  %13606 = vmatpush3.bf16.msra.mxu1 %v15980_v4  ;;  %v9201_v4 = vld [vmem:[%s17683_s3 + $0x330] sm:$0xff] }
 0x1c8   : > { %11166 = vmatprep.mubr.f32.mxu0 %v15688_v6  ;;  %11614 = vmatprep.mubr.f32.mxu1 %v16170_v50  ;;  %v9202_v6 = vld [vmem:[%s17683_s3 + $0x338] sm:$0xff] }
 0x1c9   : > { %13352 = vmatprep.subr.bf16.mxu0 %v16158_v44  ;;  %13608 = vmatprep.subr.bf16.mxu1 %v15995_v11  ;;  %v16198_v53 = vpack.c.bf16 %v9202_v6, %v9201_v4  ;;  %v16250_v6 = vld [vmem:[#allocation3 + $0x151] sm:$0xff] }
 0x1ca   : > { %11167 = vmatmul.mubr.f32.gmra.mrb[18].mxu0 %v15696_v9  ;;  %11615 = vmatmul.mubr.f32.gmra.mrb[18].mxu1 %v16176_v63  ;;  %v16196_v9 = vld [vmem:[#allocation3 + $0x111] sm:$0xff] }
 0x1cb   : > { %13354 = vmatpush3.bf16.msra.mxu0 %v16158_v44  ;;  %13610 = vmatpush3.bf16.msra.mxu1 %v15995_v11  ;;  %v9203_v11 = vld [vmem:[%s17683_s3 + $0x340] sm:$0xff] }
 0x1cc   : > { %11169 = vmatprep.mubr.f32.mxu0 %v15712_v14  ;;  %11617 = vmatprep.mubr.f32.mxu1 %v16190_v59  ;;  %v9204_v14 = vld [vmem:[%s17683_s3 + $0x348] sm:$0xff] }
 0x1cd   : > { %13356 = vmatprep.subr.bf16.mxu0 %v16178_v48  ;;  %13612 = vmatprep.subr.bf16.mxu1 %v16014_v19  ;;  %v16218_v58 = vpack.c.bf16 %v9204_v14, %v9203_v11  ;;  %v16270_v14 = vld [vmem:[#allocation3 + $0x169] sm:$0xff] }
 0x1ce   : > { %11170 = vmatmul.mubr.f32.gmra.mrb[20].mxu0 %v15720_v47  ;;  %11618 = vmatmul.mubr.f32.gmra.mrb[20].mxu1 %v16196_v9  ;;  %v16216_v47 = vld [vmem:[#allocation3 + $0x129] sm:$0xff] }
 0x1cf   : > { %13358 = vmatpush3.bf16.msra.mxu0 %v16178_v48  ;;  %13614 = vmatpush3.bf16.msra.mxu1 %v16014_v19  ;;  %v9205_v19 = vld [vmem:[%s17683_s3 + $0x350] sm:$0xff] }
 0x1d0   : > { %11172 = vmatprep.mubr.f32.mxu0 %v15736_v26  ;;  %11620 = vmatprep.mubr.f32.mxu1 %v16210_v29  ;;  %v9206_v26 = vld [vmem:[%s17683_s3 + $0x358] sm:$0xff] }
 0x1d1   : > { %13360 = vmatprep.subr.bf16.mxu0 %v16198_v53  ;;  %13616 = vmatprep.subr.bf16.mxu1 %v16034_v25  ;;  %v16238_v4 = vpack.c.bf16 %v9206_v26, %v9205_v19  ;;  %v14969_v26 = vld [vmem:[#allocation3 + $0x181] sm:$0xff] }
 0x1d2   : > { %11173 = vmatmul.mubr.f32.gmra.mrb[22].mxu0 %v15744_v21  ;;  %11621 = vmatmul.mubr.f32.gmra.mrb[22].mxu1 %v16216_v47  ;;  %v16236_v21 = vld [vmem:[#allocation3 + $0x141] sm:$0xff] }
 0x1d3   : > { %13362 = vmatpush3.bf16.msra.mxu0 %v16198_v53  ;;  %13618 = vmatpush3.bf16.msra.mxu1 %v16034_v25  ;;  %v9207_v25 = vld [vmem:[%s17683_s3 + $0x360] sm:$0xff] }
 0x1d4   : > { %11175 = vmatprep.mubr.f32.mxu0 %v15760_v28  ;;  %11623 = vmatprep.mubr.f32.mxu1 %v16230_v61  ;;  %v9208_v28 = vld [vmem:[%s17683_s3 + $0x368] sm:$0xff] }
 0x1d5   : > { %13364 = vmatprep.subr.bf16.mxu0 %v16218_v58  ;;  %13620 = vmatprep.subr.bf16.mxu1 %v16054_v34  ;;  %v16258_v11 = vpack.c.bf16 %v9208_v28, %v9207_v25  ;;  %v14970_v25 = vld [vmem:[#allocation3 + $0x189] sm:$0xff] }
 0x1d6   : > { %11176 = vmatmul.mubr.f32.gmra.mrb[24].mxu0 %v15768_v31  ;;  %11624 = vmatmul.mubr.f32.gmra.mrb[24].mxu1 %v16236_v21  ;;  %v16256_v31 = vld [vmem:[#allocation3 + $0x159] sm:$0xff]  ;;  %v9213_v28 = vld [vmem:[%s17683_s3 + $0x390] sm:$0xff] }
 0x1d7   : > { %13366 = vmatpush3.bf16.msra.mxu0 %v16218_v58  ;;  %13622 = vmatpush3.bf16.msra.mxu1 %v16054_v34  ;;  %v9209_v34 = vld [vmem:[%s17683_s3 + $0x370] sm:$0xff] }
 0x1d8   : > { %11178 = vmatprep.mubr.f32.mxu0 %v15784_v37  ;;  %11626 = vmatprep.mubr.f32.mxu1 %v16250_v6  ;;  %v9210_v37 = vld [vmem:[%s17683_s3 + $0x378] sm:$0xff] }
 0x1d9   : > { %13368 = vmatprep.subr.bf16.mxu0 %v16238_v4  ;;  %13624 = vmatprep.subr.bf16.mxu1 %v16074_v36  ;;  %v16278_v19 = vpack.c.bf16 %v9210_v37, %v9209_v34  ;;  %v9215_v37 = vld [vmem:[%s17683_s3 + $0x3a0] sm:$0xff] }
 0x1da   : > { %11179 = vmatmul.mubr.f32.gmra.mrb[26].mxu0 %v15792_v52  ;;  %11627 = vmatmul.mubr.f32.gmra.mrb[26].mxu1 %v16256_v31  ;;  %v16276_v52 = vld [vmem:[#allocation3 + $0x171] sm:$0xff] }
 0x1db   : > { %13370 = vmatpush3.bf16.msra.mxu0 %v16238_v4  ;;  %13626 = vmatpush3.bf16.msra.mxu1 %v16074_v36  ;;  %v9211_v36 = vld [vmem:[%s17683_s3 + $0x380] sm:$0xff] }
 0x1dc   : > { %11181 = vmatprep.mubr.f32.mxu0 %v15808_v43  ;;  %11629 = vmatprep.mubr.f32.mxu1 %v16270_v14  ;;  %v9212_v43 = vld [vmem:[%s17683_s3 + $0x388] sm:$0xff] }
 0x1dd   : > { %13372 = vmatprep.subr.bf16.mxu0 %v16258_v11  ;;  %13628 = vmatprep.subr.bf16.mxu1 %v16094_v42 }
 0x1de   : > { %11182 = vmatmul.mubr.f32.gmra.mrb[28].mxu0 %v15816_v46  ;;  %11630 = vmatmul.mubr.f32.gmra.mrb[28].mxu1 %v16276_v52  ;;  %v16293_v46 = vpack.c.bf16 %v9212_v43, %v9211_v36  ;;  %v9217_v43 = vld [vmem:[%s17683_s3 + $0x3b0] sm:$0xff] }
 0x1df   : > { %13374 = vmatpush3.bf16.msra.mxu0 %v16258_v11  ;;  %13630 = vmatpush3.bf16.msra.mxu1 %v16094_v42  ;;  %v2097_v42 = vld [vmem:[#allocation3 + $0x30] sm:$0xff] }
 0x1e0   : > { %11184 = vmatprep.mubr.f32.mxu0 %v15832_v20  ;;  %11632 = vmatprep.mubr.f32.mxu1 %v14969_v26  ;;  %v9214_v20 = vld [vmem:[%s17683_s3 + $0x398] sm:$0xff] }
 0x1e1   : > { %13376 = vmatprep.subr.bf16.mxu0 %v16278_v19  ;;  %13632 = vmatprep.subr.bf16.mxu1 %v16116_v8  ;;  %v16307_v34 = vpack.c.bf16 %v9214_v20, %v9213_v28  ;;  %v9221_v20 = vld [vmem:[%s17683_s3 + $0x3d0] sm:$0xff] }
 0x1e2   : > { %11185 = vmatmul.mubr.f32.gmra.mrb[30].mxu0 %v15838_v23  ;;  %11633 = vmatmul.mubr.f32.gmra.mrb[30].mxu1 %v14970_v25  ;;  %v2098_v23 = vld [vmem:[#allocation3 + $0x38] sm:$0xff]  ;;  %v9219_v25 = vld [vmem:[%s17683_s3 + $0x3c0] sm:$0xff] }
 0x1e3   : > { %13378 = vmatpush3.bf16.msra.mxu0 %v16278_v19  ;;  %13634 = vmatpush3.bf16.msra.mxu1 %v16116_v8  ;;  %v9216_v8 = vld [vmem:[%s17683_s3 + $0x3a8] sm:$0xff] }
 0x1e4   : > { %11219 = vmatprep.mubr.f32.mxu0 %v2097_v42  ;;  %11667 = vmatprep.mubr.f32.mxu1 %v15852_v24  ;;  %v2099_v24 = vld [vmem:[#allocation3 + $0x48] sm:$0xff]  ;;  %v16321_v36 = vpack.c.bf16 %v9216_v8, %v9215_v37  ;;  %v9225_v8 = vld [vmem:[%s17683_s3 + $0x3f0] sm:$0xff] }
 0x1e5   : > { %13380 = vmatprep.subr.bf16.mxu0 %v16293_v46  ;;  %13636 = vmatprep.subr.bf16.mxu1 %v16138_v35 }
 0x1e6   : > { %11220 = vmatmul.mubr.f32.vlgmr.msra.gmra.mrb[16].mxu0 %v2098_v23  ;;  %11668 = vmatmul.mubr.f32.vlgmr.msra.gmra.mrb[16].mxu1 %v15858_v0  ;;  %v2100_v0 = vld [vmem:[#allocation3 + $0x50] sm:$0xff]  ;;  %v9223_v23 = vld [vmem:[%s17683_s3 + $0x3e0] sm:$0xff] }
 0x1e7   : > { %13382 = vmatpush3.bf16.msra.mxu0 %v16293_v46  ;;  %13638 = vmatpush3.bf16.msra.mxu1 %v16138_v35  ;;  %v9218_v35 = vld [vmem:[%s17683_s3 + $0x3b8] sm:$0xff] }
 0x1e8   : > { %11222 = vmatprep.mubr.f32.mxu0 %v2099_v24  ;;  %11670 = vmatprep.mubr.f32.mxu1 %v15872_v22  ;;  %v2101_v22 = vld [vmem:[#allocation3 + $0x60] sm:$0xff]  ;;  %v16335_v26 = vpack.c.bf16 %v9218_v35, %v9217_v43  ;;  %v16407_v35 = vld [vmem:[#allocation3 + $0x18a] sm:$0xff] }
 0x1e9   : > { %13384 = vmatprep.subr.bf16.mxu0 %v16307_v34  ;;  %13640 = vmatprep.subr.bf16.mxu1 %v16158_v44  ;;  %v16402_v43 = vld [vmem:[#allocation3 + $0x182] sm:$0xff] }
 0x1ea   : > { %11223 = vmatmul.mubr.f32.gmra.mrb[18].mxu0 %v2100_v0  ;;  %11671 = vmatmul.mubr.f32.gmra.mrb[18].mxu1 %v15878_v2  ;;  %v2102_v2 = vld [vmem:[#allocation3 + $0x68] sm:$0xff]  ;;  %v9227_v0 = vld [vmem:[%s17683_s3 + $0x400] sm:$0xff] }
 0x1eb   : > { %13386 = vmatpush3.bf16.msra.mxu0 %v16307_v34  ;;  %13642 = vmatpush3.bf16.msra.mxu1 %v16158_v44  ;;  %v9220_v44 = vld [vmem:[%s17683_s3 + $0x3c8] sm:$0xff] }
 0x1ec   : > { %11225 = vmatprep.mubr.f32.mxu0 %v2101_v22  ;;  %11673 = vmatprep.mubr.f32.mxu1 %v15892_v56  ;;  %v2103_v56 = vld [vmem:[#allocation3 + $0x78] sm:$0xff]  ;;  %v16349_v28 = vpack.c.bf16 %v9220_v44, %v9219_v25  ;;  %v3877_v25 = vld [vmem:[#allocation3 + $0xf0] sm:$0xff] }
 0x1ed   : > { %13388 = vmatprep.subr.bf16.mxu0 %v16321_v36  ;;  %13644 = vmatprep.subr.bf16.mxu1 %v16178_v48  ;;  %v3878_v44 = vld [vmem:[#allocation3 + $0xf8] sm:$0xff] }
 0x1ee   : > { %11226 = vmatmul.mubr.f32.gmra.mrb[20].mxu0 %v2102_v2  ;;  %11674 = vmatmul.mubr.f32.gmra.mrb[20].mxu1 %v15898_v18  ;;  %v2104_v18 = vld [vmem:[#allocation3 + $0x80] sm:$0xff]  ;;  %v9230_v2 = vld [vmem:[%s17683_s3 + $0x418] sm:$0xff] }
 0x1ef   : > { %13390 = vmatpush3.bf16.msra.mxu0 %v16321_v36  ;;  %13646 = vmatpush3.bf16.msra.mxu1 %v16178_v48  ;;  %v9222_v48 = vld [vmem:[%s17683_s3 + $0x3d8] sm:$0xff] }
 0x1f0   : > { %11228 = vmatprep.mubr.f32.mxu0 %v2103_v56  ;;  %11676 = vmatprep.mubr.f32.mxu1 %v15912_v13  ;;  %v2105_v13 = vld [vmem:[#allocation3 + $0x90] sm:$0xff]  ;;  %v16363_v42 = vpack.c.bf16 %v9222_v48, %v9221_v20 }
 0x1f1   : > { %13392 = vmatprep.subr.bf16.mxu0 %v16335_v26  ;;  %13648 = vmatprep.subr.bf16.mxu1 %v16198_v53  ;;  %v9233_v48 = vld [vmem:[%s17683_s3 + $0x430] sm:$0xff] }
 0x1f2   : > { %11229 = vmatmul.mubr.f32.gmra.mrb[22].mxu0 %v2104_v18  ;;  %11677 = vmatmul.mubr.f32.gmra.mrb[22].mxu1 %v15918_v41  ;;  %v2106_v41 = vld [vmem:[#allocation3 + $0x98] sm:$0xff]  ;;  %v9231_v18 = vld [vmem:[%s17683_s3 + $0x420] sm:$0xff] }
 0x1f3   : > { %13394 = vmatpush3.bf16.msra.mxu0 %v16335_v26  ;;  %13650 = vmatpush3.bf16.msra.mxu1 %v16198_v53  ;;  %v9224_v53 = vld [vmem:[%s17683_s3 + $0x3e8] sm:$0xff] }
 0x1f4   : > { %11231 = vmatprep.mubr.f32.mxu0 %v2105_v13  ;;  %11679 = vmatprep.mubr.f32.mxu1 %v15932_v27  ;;  %v2107_v27 = vld [vmem:[#allocation3 + $0xa8] sm:$0xff]  ;;  %v16377_v37 = vpack.c.bf16 %v9224_v53, %v9223_v23  ;;  %v9237_v53 = vld [vmem:[%s17683_s3 + $0x450] sm:$0xff] }
 0x1f5   : > { %13396 = vmatprep.subr.bf16.mxu0 %v16349_v28  ;;  %13652 = vmatprep.subr.bf16.mxu1 %v16218_v58 }
 0x1f6   : > { %11232 = vmatmul.mubr.f32.gmra.mrb[24].mxu0 %v2106_v41  ;;  %11680 = vmatmul.mubr.f32.gmra.mrb[24].mxu1 %v15938_v60  ;;  %v2108_v60 = vld [vmem:[#allocation3 + $0xb0] sm:$0xff]  ;;  %v9235_v41 = vld [vmem:[%s17683_s3 + $0x440] sm:$0xff] }
 0x1f7   : > { %13398 = vmatpush3.bf16.msra.mxu0 %v16349_v28  ;;  %13654 = vmatpush3.bf16.msra.mxu1 %v16218_v58  ;;  %v9226_v58 = vld [vmem:[%s17683_s3 + $0x3f8] sm:$0xff] }
 0x1f8   : > { %11234 = vmatprep.mubr.f32.mxu0 %v2107_v27  ;;  %11682 = vmatprep.mubr.f32.mxu1 %v15952_v30  ;;  %v2109_v30 = vld [vmem:[#allocation3 + $0xc0] sm:$0xff]  ;;  %v16391_v24 = vpack.c.bf16 %v9226_v58, %v9225_v8  ;;  %v9241_v58 = vld [vmem:[%s17683_s3 + $0x470] sm:$0xff] }
 0x1f9   : > { %13400 = vmatprep.subr.bf16.mxu0 %v16363_v42  ;;  %13656 = vmatprep.subr.bf16.mxu1 %v16238_v4 }
 0x1fa   : > { %11235 = vmatmul.mubr.f32.gmra.mrb[26].mxu0 %v2108_v60  ;;  %11683 = vmatmul.mubr.f32.gmra.mrb[26].mxu1 %v15958_v15  ;;  %v2110_v15 = vld [vmem:[#allocation3 + $0xc8] sm:$0xff]  ;;  %v9239_v60 = vld [vmem:[%s17683_s3 + $0x460] sm:$0xff] }
 0x1fb   : > { %13402 = vmatpush3.bf16.msra.mxu0 %v16363_v42  ;;  %13658 = vmatpush3.bf16.msra.mxu1 %v16238_v4  ;;  %v9228_v4 = vld [vmem:[%s17683_s3 + $0x408] sm:$0xff] }
 0x1fc   : > { %11237 = vmatprep.mubr.f32.mxu0 %v2109_v30  ;;  %11685 = vmatprep.mubr.f32.mxu1 %v15972_v33  ;;  %v2111_v33 = vld [vmem:[#allocation3 + $0xd8] sm:$0xff]  ;;  %v16409_v22 = vpack.c.bf16 %v9228_v4, %v9227_v0 }
 0x1fd   : > { %13404 = vmatprep.subr.bf16.mxu0 %v16377_v37  ;;  %13660 = vmatprep.subr.bf16.mxu1 %v16258_v11  ;;  %v9242_v30 = vld [vmem:[%s17683_s3 + $0x478] sm:$0xff] }
 0x1fe   : > { %11238 = vmatmul.mubr.f32.gmra.mrb[28].mxu0 %v2110_v15  ;;  %11686 = vmatmul.mubr.f32.gmra.mrb[28].mxu1 %v15978_v39  ;;  %v2112_v39 = vld [vmem:[#allocation3 + $0xe0] sm:$0xff]  ;;  %v2490_v15 = vld [vmem:[#allocation3 + $0x6a] sm:$0xff]  ;;  %v2493_v0 = vld [vmem:[#allocation3 + $0x92] sm:$0xff] }
 0x1ff   : > { %13406 = vmatpush3.bf16.msra.mxu0 %v16377_v37  ;;  %13662 = vmatpush3.bf16.msra.mxu1 %v16258_v11  ;;  %v9229_v11 = vld [vmem:[%s17683_s3 + $0x410] sm:$0xff]  ;;  %v2494_v4 = vld [vmem:[#allocation3 + $0x9a] sm:$0xff] }
 0x200   : > { %11240 = vmatprep.mubr.f32.mxu0 %v2111_v33  ;;  %11688 = vmatprep.mubr.f32.mxu1 %v16402_v43  ;;  %v16423_v56 = vpack.c.bf16 %v9230_v2, %v9229_v11  ;;  %v4526_v33 = vld [vmem:[%s17685_s5 + $0x30] sm:$0xff] }
 0x201   : > { %13408 = vmatprep.subr.bf16.mxu0 %v16391_v24  ;;  %13664 = vmatprep.subr.bf16.mxu1 %v16278_v19  ;;  %v2498_v11 = vld [vmem:[#allocation3 + $0xca] sm:$0xff] }
 0x202   : > { %11241 = vmatmul.mubr.f32.gmra.mrb[30].mxu0 %v2112_v39  ;;  %11689 = vmatmul.mubr.f32.gmra.mrb[30].mxu1 %v16407_v35  ;;  %v2497_v39 = vld [vmem:[#allocation3 + $0xc2] sm:$0xff] }
 0x203   : > { %13410 = vmatpush3.bf16.msra.mxu0 %v16391_v24  ;;  %13666 = vmatpush3.bf16.msra.mxu1 %v16278_v19  ;;  %v9232_v19 = vld [vmem:[%s17683_s3 + $0x428] sm:$0xff] }
 0x204   : > { %11275 = vmatprep.mubr.f32.mxu0 %v16006_v62  ;;  %11723 = vmatprep.mubr.f32.mxu1 %v3877_v25  ;;  %v3879_v62 = vld [vmem:[#allocation3 + $0x108] sm:$0xff]  ;;  %v16437_v20 = vpack.c.bf16 %v9232_v19, %v9231_v18  ;;  %v4528_v25 = vld [vmem:[%s17685_s5 + $0x40] sm:$0xff]  ;;  %v4530_v18 = vld [vmem:[%s17685_s5 + $0x50] sm:$0xff] }
 0x205   : > { %13412 = vmatprep.subr.bf16.mxu0 %v16409_v22  ;;  %13668 = vmatprep.subr.bf16.mxu1 %v16293_v46  ;;  %v4083_v2 = vld [vmem:[#allocation3 + $0x189] sm:$0xff]  ;;  %v4531_v19 = vld [vmem:[%s17685_s5 + $0x58] sm:$0xff] }
 0x206   : > { %11276 = vmatmul.mubr.f32.vlgmr.msra.gmra.mrb[16].mxu0 %v16012_v1  ;;  %11724 = vmatmul.mubr.f32.vlgmr.msra.gmra.mrb[16].mxu1 %v3878_v44  ;;  %v3880_v1 = vld [vmem:[#allocation3 + $0x110] sm:$0xff]  ;;  %v2499_v44 = vld [vmem:[#allocation3 + $0xda] sm:$0xff] }
 0x207   : > { %13414 = vmatpush3.bf16.msra.mxu0 %v16409_v22  ;;  %13670 = vmatpush3.bf16.msra.mxu1 %v16293_v46  ;;  %v9234_v46 = vld [vmem:[%s17683_s3 + $0x438] sm:$0xff] }
 0x208   : > { %11278 = vmatprep.mubr.f32.mxu0 %v16026_v45  ;;  %11726 = vmatprep.mubr.f32.mxu1 %v3879_v62  ;;  %v3881_v45 = vld [vmem:[#allocation3 + $0x120] sm:$0xff]  ;;  %v16451_v13 = vpack.c.bf16 %v9234_v46, %v9233_v48  ;;  %v13751_v48 = vpack.c.bf16 %v4531_v19, %v4530_v18 }
 0x209   : > { %13416 = vmatprep.subr.bf16.mxu0 %v16423_v56  ;;  %13672 = vmatprep.subr.bf16.mxu1 %v16307_v34  ;;  %v4264_v46 = vld [vmem:[#allocation3 + $0xfa] sm:$0xff] }
 0x20a   : > { %11279 = vmatmul.mubr.f32.gmra.mrb[18].mxu0 %v16032_v10  ;;  %11727 = vmatmul.mubr.f32.gmra.mrb[18].mxu1 %v3880_v1  ;;  %v3882_v10 = vld [vmem:[#allocation3 + $0x128] sm:$0xff] }
 0x20b   : > { %13418 = vmatpush3.bf16.msra.mxu0 %v16423_v56  ;;  %13674 = vmatpush3.bf16.msra.mxu1 %v16307_v34  ;;  %v9236_v34 = vld [vmem:[%s17683_s3 + $0x448] sm:$0xff] }
 0x20c   : > { %11281 = vmatprep.mubr.f32.mxu0 %v16046_v51  ;;  %11729 = vmatprep.mubr.f32.mxu1 %v3881_v45  ;;  %v3883_v51 = vld [vmem:[#allocation3 + $0x138] sm:$0xff]  ;;  %v16465_v23 = vpack.c.bf16 %v9236_v34, %v9235_v41  ;;  %v2500_v1 = vld [vmem:[#allocation3 + $0xe2] sm:$0xff]  ;;  %v4265_v45 = vld [vmem:[#allocation3 + $0x10a] sm:$0xff] }
 0x20d   : > { %13420 = vmatprep.subr.bf16.mxu0 %v16437_v20  ;;  %13676 = vmatprep.subr.bf16.mxu1 %v16321_v36  ;;  %v4268_v41 = vld [vmem:[#allocation3 + $0x12a] sm:$0xff]  ;;  %v4269_v34 = vld [vmem:[#allocation3 + $0x13a] sm:$0xff] }
 0x20e   : > { %11282 = vmatmul.mubr.f32.gmra.mrb[20].mxu0 %v16052_v17  ;;  %11730 = vmatmul.mubr.f32.gmra.mrb[20].mxu1 %v3882_v10  ;;  %v3884_v17 = vld [vmem:[#allocation3 + $0x140] sm:$0xff]  ;;  %v4266_v10 = vld [vmem:[#allocation3 + $0x112] sm:$0xff] }
 0x20f   : > { %13422 = vmatpush3.bf16.msra.mxu0 %v16437_v20  ;;  %13678 = vmatpush3.bf16.msra.mxu1 %v16321_v36  ;;  %v9238_v36 = vld [vmem:[%s17683_s3 + $0x458] sm:$0xff] }
 0x210   : > { %11284 = vmatprep.mubr.f32.mxu0 %v16066_v55  ;;  %11732 = vmatprep.mubr.f32.mxu1 %v3883_v51  ;;  %v3885_v55 = vld [vmem:[#allocation3 + $0x150] sm:$0xff]  ;;  %v16479_v27 = vpack.c.bf16 %v9238_v36, %v9237_v53  ;;  %v4270_v51 = vld [vmem:[#allocation3 + $0x142] sm:$0xff] }
 0x211   : > { %13424 = vmatprep.subr.bf16.mxu0 %v16451_v13  ;;  %13680 = vmatprep.subr.bf16.mxu1 %v16335_v26  ;;  %v4273_v53 = vld [vmem:[#allocation3 + $0x16a] sm:$0xff]  ;;  %v4274_v36 = vld [vmem:[#allocation3 + $0x172] sm:$0xff] }
 0x212   : > { %11285 = vmatmul.mubr.f32.gmra.mrb[22].mxu0 %v16072_v7  ;;  %11733 = vmatmul.mubr.f32.gmra.mrb[22].mxu1 %v3884_v17  ;;  %v3886_v7 = vld [vmem:[#allocation3 + $0x158] sm:$0xff] }
 0x213   : > { %13426 = vmatpush3.bf16.msra.mxu0 %v16451_v13  ;;  %13682 = vmatpush3.bf16.msra.mxu1 %v16335_v26  ;;  %v9240_v26 = vld [vmem:[%s17683_s3 + $0x468] sm:$0xff]  ;;  %v4271_v17 = vld [vmem:[#allocation3 + $0x152] sm:$0xff] }
 0x214   : > { %11287 = vmatprep.mubr.f32.mxu0 %v16086_v57  ;;  %11735 = vmatprep.mubr.f32.mxu1 %v3885_v55  ;;  %v3887_v57 = vld [vmem:[#allocation3 + $0x168] sm:$0xff]  ;;  %v16493_v8 = vpack.c.bf16 %v9240_v26, %v9239_v60  ;;  %v4277_v55 = vld [vmem:[#allocation3 + $0x19a] sm:$0xff] }
 0x215   : > { %13428 = vmatprep.subr.bf16.mxu0 %v16465_v23  ;;  %13684 = vmatprep.subr.bf16.mxu1 %v16349_v28  ;;  %v4533_v60 = vld [vmem:[%s17685_s5 + $0x68] sm:$0xff] }
 0x216   : > { %11288 = vmatmul.mubr.f32.gmra.mrb[24].mxu0 %v16092_v3  ;;  %11736 = vmatmul.mubr.f32.gmra.mrb[24].mxu1 %v3886_v7  ;;  %v3888_v3 = vld [vmem:[#allocation3 + $0x170] sm:$0xff]  ;;  %v4278_v7 = vld [vmem:[#allocation3 + $0x1a2] sm:$0xff] }
 0x217   : > { %13430 = vmatpush3.bf16.msra.mxu0 %v16465_v23  ;;  %13686 = vmatpush3.bf16.msra.mxu1 %v16349_v28  ;;  %v2487_v28 = vld [vmem:[#allocation3 + $0x4a] sm:$0xff] }
 0x218   : > { %11290 = vmatprep.mubr.f32.mxu0 %v16106_v54  ;;  %11738 = vmatprep.mubr.f32.mxu1 %v3887_v57  ;;  %v16506_v54 = vpack.c.bf16 %v9242_v30, %v9241_v58  ;;  %v16623_v30 = vld [vmem:[%s17684_s4] ss:$0 sm:$0xff] }
 0x219   : > { %13432 = vmatprep.subr.bf16.mxu0 %v16479_v27  ;;  %13688 = vmatprep.subr.bf16.mxu1 %v16363_v42 }
 0x21a   : > { %11291 = vmatmul.mubr.f32.gmra.mrb[26].mxu0 %v16112_v40  ;;  %11739 = vmatmul.mubr.f32.gmra.mrb[26].mxu1 %v3888_v3  ;;  %v4520_v40 = vld [vmem:[%s17685_s5] sm:$0xff]  ;;  %v5075_v3 = vld [vmem:[#allocation4 + $0x80] sm:$0xff] }
 0x21b   : > { %13434 = vmatpush3.bf16.msra.mxu0 %v16479_v27  ;;  %13690 = vmatpush3.bf16.msra.mxu1 %v16363_v42  ;;  %v4523_v42 = vld [vmem:[%s17685_s5 + $0x18] sm:$0xff] }
 0x21c   : > { %11293 = vmatprep.mubr.f32.mxu0 %v16128_v32  ;;  %11741 = vmatprep.mubr.f32.mxu1 %v16114_v12  ;;  %v4521_v32 = vld [vmem:[%s17685_s5 + $0x8] sm:$0xff]  ;;  %v14971_v12 = vld [vmem:[#allocation3] sm:$0xff] }
 0x21d   : > { %13436 = vmatprep.subr.bf16.mxu0 %v16493_v8  ;;  %13692 = vmatprep.subr.bf16.mxu1 %v16377_v37 }
 0x21e   : > { %11294 = vmatmul.mubr.f32.gmra.mrb[28].mxu0 %v16134_v5  ;;  %11742 = vmatmul.mubr.f32.gmra.mrb[28].mxu1 %v16136_v16  ;;  %v16523_v5 = vpack.c.bf16 %v4521_v32, %v4520_v40  ;;  %v2485_v16 = vld [vmem:[#allocation3 + $0x32] sm:$0xff] }
 0x21f   : > { %13438 = vmatpush3.bf16.msra.mxu0 %v16493_v8  ;;  %13694 = vmatpush3.bf16.msra.mxu1 %v16377_v37  ;;  %v2489_v37 = vld [vmem:[#allocation3 + $0x62] sm:$0xff] }
 0x220   : > { %11296 = vmatprep.mubr.f32.mxu0 %v16150_v38  ;;  %13440 = vmatprep.subr.bf16.mxu0 %v16506_v54  ;;  %v2486_v38 = vld [vmem:[#allocation3 + $0x3a] sm:$0xff] }
 0x221   : > { %11744 = vmatprep.mubr.f32.mxu1 %v14971_v12  ;;  %13696 = vmatprep.subr.bf16.mxu1 %v16391_v24 }
 0x222   : > { %11297 = vmatmul.mubr.f32.gmra.mrb[30].mxu0 %v16156_v49  ;;  %11745 = vmatmul.mubr.f32.gmra.mrb[30].mxu1 %v14971_v12  ;;  %v4522_v49 = vld [vmem:[%s17685_s5 + $0x10] sm:$0xff] }
 0x223   : > { %13442 = vmatpush3.bf16.msra.mxu0 %v16506_v54  ;;  %13698 = vmatpush3.bf16.msra.mxu1 %v16391_v24  ;;  %v4524_v24 = vld [vmem:[%s17685_s5 + $0x20] sm:$0xff] }
 0x224   : > { %11331 = vmatprep.mubr.f32.mxu0 %v2485_v16  ;;  %11779 = vmatprep.mubr.f32.mxu1 %v16170_v50  ;;  %v2488_v50 = vld [vmem:[#allocation3 + $0x52] sm:$0xff] }
 0x225   : > { %13700 = vmatprep.subr.bf16.mxu1 %v16409_v22  ;;  %13732 = vmatprep.subr.bf16.mxu0 %v16523_v5 }
 0x226   : > { %11332 = vmatmul.mubr.f32.vlgmr.msra.gmra.mrb[16].mxu0 %v2486_v38  ;;  %11780 = vmatmul.mubr.f32.vlgmr.msra.gmra.mrb[16].mxu1 %v16176_v63  ;;  %v16542_v63 = vpack.c.bf16 %v4523_v42, %v4522_v49  ;;  %v5078_v49 = vld [vmem:[#allocation4 + $0x98] sm:$0xff] }
 0x227   : > { %13702 = vmatpush3.bf16.msra.mxu1 %v16409_v22  ;;  %11334 = vmatprep.mubr.f32.mxu0 %v2487_v28  ;;  %v4082_v22 = vld [vmem:[#allocation3 + $0x181] sm:$0xff] }
 0x228   : > { %11782 = vmatprep.mubr.f32.mxu1 %v16190_v59  ;;  %13704 = vmatprep.subr.bf16.mxu1 %v16423_v56  ;;  %v2491_v59 = vld [vmem:[#allocation3 + $0x7a] sm:$0xff] }
 0x229   : > { %13734 = vmatpush3.bf16.msra.mxu0 %v16523_v5  ;;  %v5077_v28 = vld [vmem:[#allocation4 + $0x90] sm:$0xff] }
 0x22a   : > { %11335 = vmatmul.mubr.f32.gmra.mrb[18].mxu0 %v2488_v50  ;;  %11783 = vmatmul.mubr.f32.gmra.mrb[18].mxu1 %v16196_v9  ;;  %v4525_v9 = vld [vmem:[%s17685_s5 + $0x28] sm:$0xff] }
 0x22b   : > { %13706 = vmatpush3.bf16.msra.mxu1 %v16423_v56  ;;  %11337 = vmatprep.mubr.f32.mxu0 %v2489_v37  ;;  %v4085_v56 = vld [vmem:[#allocation3 + $0x1a1] sm:$0xff] }
 0x22c   : > { %11785 = vmatprep.mubr.f32.mxu1 %v16210_v29  ;;  %13708 = vmatprep.subr.bf16.mxu1 %v16437_v20  ;;  %v2492_v29 = vld [vmem:[#allocation3 + $0x82] sm:$0xff] }
 0x22d   : > { %13736 = vmatprep.subr.bf16.mxu0 %v16542_v63 }
 0x22e   : > { %11338 = vmatmul.mubr.f32.gmra.mrb[20].mxu0 %v2490_v15  ;;  %11786 = vmatmul.mubr.f32.gmra.mrb[20].mxu1 %v16216_v47  ;;  %v16560_v47 = vpack.c.bf16 %v4525_v9, %v4524_v24  ;;  %v16629_v24 = vpack.c.bf16 %v5078_v49, %v5077_v28 }
 0x22f   : > { %13710 = vmatpush3.bf16.msra.mxu1 %v16437_v20  ;;  %11340 = vmatprep.mubr.f32.mxu0 %v2491_v59  ;;  %v4263_v20 = vld [vmem:[#allocation3 + $0xf2] sm:$0xff] }
 0x230   : > { %11788 = vmatprep.mubr.f32.mxu1 %v16230_v61  ;;  %13712 = vmatprep.subr.bf16.mxu1 %v16451_v13  ;;  %v2495_v61 = vld [vmem:[#allocation3 + $0xaa] sm:$0xff] }
 0x231   : > { %13738 = vmatpush3.bf16.msra.mxu0 %v16542_v63 }
 0x232   : > { %11341 = vmatmul.mubr.f32.gmra.mrb[22].mxu0 %v2492_v29  ;;  %11789 = vmatmul.mubr.f32.gmra.mrb[22].mxu1 %v16236_v21  ;;  %v4527_v21 = vld [vmem:[%s17685_s5 + $0x38] sm:$0xff] }
 0x233   : > { %13714 = vmatpush3.bf16.msra.mxu1 %v16451_v13  ;;  %11343 = vmatprep.mubr.f32.mxu0 %v2493_v0  ;;  %v4267_v13 = vld [vmem:[#allocation3 + $0x122] sm:$0xff]  ;;  %v5080_v0 = vld [vmem:[#allocation4 + $0xa8] sm:$0xff] }
 0x234   : > { %11791 = vmatprep.mubr.f32.mxu1 %v16250_v6  ;;  %13716 = vmatprep.subr.bf16.mxu1 %v16465_v23  ;;  %v2496_v6 = vld [vmem:[#allocation3 + $0xb2] sm:$0xff] }
 0x235   : > { %13740 = vmatprep.subr.bf16.mxu0 %v16560_v47 }
 0x236   : > { %11344 = vmatmul.mubr.f32.gmra.mrb[24].mxu0 %v2494_v4  ;;  %11792 = vmatmul.mubr.f32.gmra.mrb[24].mxu1 %v16256_v31  ;;  %v13743_v31 = vpack.c.bf16 %v4527_v21, %v4526_v33 }
 0x237   : > { %13718 = vmatpush3.bf16.msra.mxu1 %v16465_v23  ;;  %11346 = vmatprep.mubr.f32.mxu0 %v2495_v61  ;;  %v4272_v23 = vld [vmem:[#allocation3 + $0x15a] sm:$0xff] }
 0x238   : > { %11794 = vmatprep.mubr.f32.mxu1 %v16270_v14  ;;  %13720 = vmatprep.subr.bf16.mxu1 %v16479_v27  ;;  %v4084_v14 = vld [vmem:[#allocation3 + $0x199] sm:$0xff] }
 0x239   : > { %13742 = vmatpush3.bf16.msra.mxu0 %v16560_v47 }
 0x23a   : > { %11347 = vmatmul.mubr.f32.gmra.mrb[26].mxu0 %v2496_v6  ;;  %11795 = vmatmul.mubr.f32.gmra.mrb[26].mxu1 %v16276_v52  ;;  %v4529_v52 = vld [vmem:[%s17685_s5 + $0x48] sm:$0xff] }
 0x23b   : > { %13722 = vmatpush3.bf16.msra.mxu1 %v16479_v27  ;;  %11349 = vmatprep.mubr.f32.mxu0 %v2497_v39  ;;  %v13747_v62 = vpack.c.bf16 %v4529_v52, %v4528_v25  ;;  %v4532_v27 = vld [vmem:[%s17685_s5 + $0x60] sm:$0xff] }
 0x23c   : > { %11797 = vmatprep.mubr.f32.mxu1 %v4082_v22  ;;  %13724 = vmatprep.subr.bf16.mxu1 %v16493_v8  ;;  %v13755_v26 = vpack.c.bf16 %v4533_v60, %v4532_v27 }
 0x23d   : > { %13744 = vmatprep.subr.bf16.mxu0 %v13743_v31 }
 0x23e   : > { %11350 = vmatmul.mubr.f32.gmra.mrb[28].mxu0 %v2498_v11  ;;  %11798 = vmatmul.mubr.f32.gmra.mrb[28].mxu1 %v4083_v2  ;;  %v5081_v2 = vld [vmem:[#allocation4 + $0xb0] sm:$0xff] }
 0x23f   : > { %13726 = vmatpush3.bf16.msra.mxu1 %v16493_v8  ;;  %11352 = vmatprep.mubr.f32.mxu0 %v2499_v44  ;;  %v5076_v8 = vld [vmem:[#allocation4 + $0x88] sm:$0xff] }
 0x240   : > { %11800 = vmatprep.mubr.f32.mxu1 %v4084_v14  ;;  %13728 = vmatprep.subr.bf16.mxu1 %v16506_v54  ;;  %v16616_v58 = vpack.c.bf16 %v5076_v8, %v5075_v3  ;;  %v5082_v14 = vld [vmem:[#allocation4 + $0xb8] sm:$0xff] }
 0x241   : > { %13746 = vmatpush3.bf16.msra.mxu0 %v13743_v31 }
 0x242   : > { %11353 = vmatmul.mubr.f32.gmra.mrb[30].mxu0 %v2500_v1  ;;  %11801 = vmatmul.mubr.f32.gmra.mrb[30].mxu1 %v4085_v56 }
 0x243   : > { %13730 = vmatpush3.bf16.msra.mxu1 %v16506_v54  ;;  %11835 = vmatprep.mubr.f32.mxu1 %v4263_v20 }
 0x244   : > { %13748 = vmatprep.subr.bf16.mxu0 %v13747_v62  ;;  %13764 = vmatprep.subr.bf16.mxu1 %v16523_v5 }
 0x245   : > { %13750 = vmatpush3.bf16.msra.mxu0 %v13747_v62 }
 0x246   : > { %11836 = vmatmul.mubr.f32.vlgmr.msra.gmra.mrb[16].mxu1 %v4264_v46  ;;  %13752 = vmatprep.subr.bf16.mxu0 %v13751_v48  ;;  %v5084_v46 = vld [vmem:[#allocation4 + $0xc8] sm:$0xff] }
 0x247   : > { %11838 = vmatprep.mubr.f32.mxu1 %v4265_v45  ;;  %13766 = vmatpush3.bf16.msra.mxu1 %v16523_v5 }
 0x248   : > { %13768 = vmatprep.subr.bf16.mxu1 %v16542_v63 }
 0x249   : > { %13754 = vmatpush3.bf16.msra.mxu0 %v13751_v48 }
 0x24a   : > { %11839 = vmatmul.mubr.f32.gmra.mrb[18].mxu1 %v4266_v10  ;;  %13756 = vmatprep.subr.bf16.mxu0 %v13755_v26 }
 0x24b   : > { %11841 = vmatprep.mubr.f32.mxu1 %v4267_v13  ;;  %13770 = vmatpush3.bf16.msra.mxu1 %v16542_v63 }
 0x24c   : > { %13772 = vmatprep.subr.bf16.mxu1 %v16560_v47 }
 0x24d   : > { %13758 = vmatpush3.bf16.msra.mxu0 %v13755_v26 }
 0x24e   : > { %11842 = vmatmul.mubr.f32.gmra.mrb[20].mxu1 %v4268_v41 }
 0x24f   : > { %11844 = vmatprep.mubr.f32.mxu1 %v4269_v34  ;;  %13774 = vmatpush3.bf16.msra.mxu1 %v16560_v47  ;;  %v5079_v47 = vld [vmem:[#allocation4 + $0xa0] sm:$0xff] }
 0x250   : > { %13776 = vmatprep.subr.bf16.mxu1 %v13743_v31  ;;  %v16635_v39 = vpack.c.bf16 %v5080_v0, %v5079_v47 }
 0x252   : > { %11845 = vmatmul.mubr.f32.gmra.mrb[22].mxu1 %v4270_v51 }
 0x253   : > { %11847 = vmatprep.mubr.f32.mxu1 %v4271_v17  ;;  %13778 = vmatpush3.bf16.msra.mxu1 %v13743_v31 }
 0x254   : > { %13780 = vmatprep.subr.bf16.mxu1 %v13747_v62 }
 0x256   : > { %11848 = vmatmul.mubr.f32.gmra.mrb[24].mxu1 %v4272_v23 }
 0x257   : > { %11850 = vmatprep.mubr.f32.mxu1 %v4273_v53  ;;  %13782 = vmatpush3.bf16.msra.mxu1 %v13747_v62  ;;  %v16641_v62 = vpack.c.bf16 %v5082_v14, %v5081_v2 }
 0x258   : > { %13784 = vmatprep.subr.bf16.mxu1 %v13751_v48 }
 0x25a   : > { %11851 = vmatmul.mubr.f32.gmra.mrb[26].mxu1 %v4274_v36 }
 0x25b   : > { %11853 = vmatprep.mubr.f32.mxu1 %v16402_v43  ;;  %13786 = vmatpush3.bf16.msra.mxu1 %v13751_v48  ;;  %v4534_v43 = vld [vmem:[%s17685_s5 + $0x70] sm:$0xff] }
 0x25c   : > { %13788 = vmatprep.subr.bf16.mxu1 %v13755_v26  ;;  %v5083_v48 = vld [vmem:[#allocation4 + $0xc0] sm:$0xff] }
 0x25d   : > { %v16647_v17 = vpack.c.bf16 %v5084_v46, %v5083_v48 }
 0x25e   : > { %11854 = vmatmul.mubr.f32.gmra.mrb[28].mxu1 %v16407_v35  ;;  %v4535_v35 = vld [vmem:[%s17685_s5 + $0x78] sm:$0xff] }
 0x25f   : > { %11856 = vmatprep.mubr.f32.mxu1 %v4277_v55  ;;  %13790 = vmatpush3.bf16.msra.mxu1 %v13755_v26  ;;  %v13759_v57 = vpack.c.bf16 %v4535_v35, %v4534_v43 }
 0x261   : > { %13760 = vmatprep.subr.bf16.mxu0 %v13759_v57  ;;  %13792 = vmatprep.subr.bf16.mxu1 %v13759_v57 }
 0x262   : > { %11857 = vmatmul.mubr.f32.gmra.mrb[30].mxu1 %v4278_v7  ;;  %13762 = vmatpush3.bf16.msra.mxu0 %v13759_v57 }
 0x263   : > { %13794 = vmatpush3.bf16.msra.mxu1 %v13759_v57  ;;  %13796 = vmatprep.subr.bf16.mxu0 %v16616_v58 }
 0x264   : > { %14084 = vmatprep.subr.bf16.mxu1 %v16616_v58 }
 0x2f9   : > { %v11333_v54 = vpop.f32.mrb[16].mxu0 }
 0x2fa   : > { %v2686_v40 = vadd.f32 %v11333_v54, %v16623_v30  ;;  %v2584_v32 = vpop.f32.mrb[17].mxu0 }
 0x2fb   : > { %v2685_v12 = vadd.f32 %v16623_v30, %v2584_v32 }
 0x2fc   : > { %v2702_v5 = vmul.f32 0.1, %v2686_v40 }
 0x2fd   : > { %v2701_v16 = vmul.f32 0.1, %v2685_v12  ;;  %v11336_v38 = vpop.f32.mrb[18].mxu0 }
 0x2fe   : > { %v2688_v42 = vadd.f32 %v11336_v38, %v16623_v30  ;;  %v2594_v50 = vpop.f32.mrb[19].mxu0  ;;  %v2718_v15 = vmax.f32 %v2686_v40, %v2702_v5 }
 0x2ff   : > { %v2717_v63 = vmax.f32 %v2685_v12, %v2701_v16  ;;  %v2687_v37 = vadd.f32 %v16623_v30, %v2594_v50 }
 0x300   : > { %v2704_v59 = vmul.f32 0.1, %v2688_v42 }
 0x301   : > { %v2703_v9 = vmul.f32 0.1, %v2687_v37  ;;  %v11339_v29 = vpop.f32.mrb[20].mxu0  ;;  %11891 = vmatprep.mubr.f32.mxu0 %v2717_v63 }
 0x302   : > { %v2690_v4 = vadd.f32 %v11339_v29, %v16623_v30  ;;  %v2604_v61 = vpop.f32.mrb[21].mxu0  ;;  %11892 = vmatmul.mubr.f32.vlgmr.msra.gmra.mrb[32].mxu0 %v2718_v15  ;;  %v2720_v6 = vmax.f32 %v2688_v42, %v2704_v59 }
 0x303   : > { %v2719_v33 = vmax.f32 %v2687_v37, %v2703_v9  ;;  %v2689_v21 = vadd.f32 %v16623_v30, %v2604_v61  ;;  %13798 = vmatpush3.bf16.msra.mxu0 %v16616_v58 }
 0x304   : > { %v2706_v31 = vmul.f32 0.1, %v2690_v4  ;;  %13800 = vmatprep.subr.bf16.mxu0 %v16629_v24 }
 0x305   : > { %v2705_v22 = vmul.f32 0.1, %v2689_v21  ;;  %v11342_v11 = vpop.f32.mrb[22].mxu0  ;;  %11894 = vmatprep.mubr.f32.mxu0 %v2719_v33 }
 0x306   : > { %v2692_v25 = vadd.f32 %v11342_v11, %v16623_v30  ;;  %v2614_v52 = vpop.f32.mrb[23].mxu0  ;;  %11895 = vmatmul.mubr.f32.gmra.mrb[34].mxu0 %v2720_v6  ;;  %v2722_v18 = vmax.f32 %v2690_v4, %v2706_v31 }
 0x307   : > { %v2721_v44 = vmax.f32 %v2689_v21, %v2705_v22  ;;  %v2691_v56 = vadd.f32 %v16623_v30, %v2614_v52  ;;  %13802 = vmatpush3.bf16.msra.mxu0 %v16629_v24 }
 0x308   : > { %v2708_v19 = vmul.f32 0.1, %v2692_v25  ;;  %13804 = vmatprep.subr.bf16.mxu0 %v16635_v39 }
 0x309   : > { %v2707_v1 = vmul.f32 0.1, %v2691_v56  ;;  %v11345_v20 = vpop.f32.mrb[24].mxu0  ;;  %11897 = vmatprep.mubr.f32.mxu0 %v2721_v44 }
 0x30a   : > { %v2694_v45 = vadd.f32 %v11345_v20, %v16623_v30  ;;  %v2624_v10 = vpop.f32.mrb[25].mxu0  ;;  %11898 = vmatmul.mubr.f32.gmra.mrb[36].mxu0 %v2722_v18  ;;  %v2724_v34 = vmax.f32 %v2692_v25, %v2708_v19 }
 0x30b   : > { %v2723_v13 = vmax.f32 %v2691_v56, %v2707_v1  ;;  %v2693_v41 = vadd.f32 %v16623_v30, %v2624_v10  ;;  %13806 = vmatpush3.bf16.msra.mxu0 %v16635_v39 }
 0x30c   : > { %v2710_v51 = vmul.f32 0.1, %v2694_v45  ;;  %13808 = vmatprep.subr.bf16.mxu0 %v16641_v62 }
 0x30d   : > { %v2709_v23 = vmul.f32 0.1, %v2693_v41  ;;  %v11348_v53 = vpop.f32.mrb[26].mxu0  ;;  %11900 = vmatprep.mubr.f32.mxu0 %v2723_v13 }
 0x30e   : > { %v2696_v36 = vadd.f32 %v11348_v53, %v16623_v30  ;;  %v2634_v55 = vpop.f32.mrb[27].mxu0  ;;  %11901 = vmatmul.mubr.f32.gmra.mrb[38].mxu0 %v2724_v34  ;;  %v2726_v60 = vmax.f32 %v2694_v45, %v2710_v51 }
 0x30f   : > { %v2725_v7 = vmax.f32 %v2693_v41, %v2709_v23  ;;  %v2695_v27 = vadd.f32 %v16623_v30, %v2634_v55  ;;  %13810 = vmatpush3.bf16.msra.mxu0 %v16641_v62 }
 0x310   : > { %v2712_v26 = vmul.f32 0.1, %v2696_v36  ;;  %13812 = vmatprep.subr.bf16.mxu0 %v16647_v17 }
 0x311   : > { %v2711_v43 = vmul.f32 0.1, %v2695_v27  ;;  %v11351_v35 = vpop.f32.mrb[28].mxu0  ;;  %11903 = vmatprep.mubr.f32.mxu0 %v2725_v7 }
 0x312   : > { %v2698_v57 = vadd.f32 %v11351_v35, %v16623_v30  ;;  %v2644_v3 = vpop.f32.mrb[29].mxu0  ;;  %11904 = vmatmul.mubr.f32.gmra.mrb[40].mxu0 %v2726_v60  ;;  %v2728_v40 = vmax.f32 %v2696_v36, %v2712_v26 }
 0x313   : > { %v2727_v8 = vmax.f32 %v2695_v27, %v2711_v43  ;;  %v2697_v54 = vadd.f32 %v16623_v30, %v2644_v3  ;;  %13814 = vmatpush3.bf16.msra.mxu0 %v16647_v17 }
 0x314   : > { %v2714_v32 = vmul.f32 0.1, %v2698_v57 }
 0x315   : > { %v2713_v12 = vmul.f32 0.1, %v2697_v54  ;;  %v11354_v5 = vpop.f32.mrb[30].mxu0  ;;  %11906 = vmatprep.mubr.f32.mxu0 %v2727_v8 }
 0x316   : > { %v2700_v16 = vadd.f32 %v11354_v5, %v16623_v30  ;;  %v2654_v38 = vpop.f32.mrb[31].mxu0  ;;  %11907 = vmatmul.mubr.f32.gmra.mrb[42].mxu0 %v2728_v40  ;;  %v2730_v42 = vmax.f32 %v2698_v57, %v2714_v32 }
 0x317   : > { %v2729_v28 = vmax.f32 %v2697_v54, %v2713_v12  ;;  %v2699_v49 = vadd.f32 %v16623_v30, %v2654_v38 }
 0x318   : > { %v2716_v50 = vmul.f32 0.1, %v2700_v16 }
 0x319   : > { %v2715_v63 = vmul.f32 0.1, %v2699_v49  ;;  %v11837_v37 = vpop.f32.mrb[16].mxu1  ;;  %11909 = vmatprep.mubr.f32.mxu0 %v2729_v28 }
 0x31a   : > { %v4457_v15 = vadd.f32 %v11837_v37, %v16623_v30  ;;  %v4361_v59 = vpop.f32.mrb[17].mxu1  ;;  %11910 = vmatmul.mubr.f32.gmra.mrb[44].mxu0 %v2730_v42  ;;  %v2732_v47 = vmax.f32 %v2700_v16, %v2716_v50 }
 0x31b   : > { %v2731_v9 = vmax.f32 %v2699_v49, %v2715_v63  ;;  %v4456_v29 = vadd.f32 %v16623_v30, %v4361_v59 }
 0x31c   : > { %v4473_v0 = vmul.f32 0.1, %v4457_v15 }
 0x31d   : > { %v4472_v4 = vmul.f32 0.1, %v4456_v29  ;;  %v11840_v61 = vpop.f32.mrb[18].mxu1  ;;  %11912 = vmatprep.mubr.f32.mxu0 %v2731_v9 }
 0x31e   : > { %v4459_v33 = vadd.f32 %v11840_v61, %v16623_v30  ;;  %v4371_v21 = vpop.f32.mrb[19].mxu1  ;;  %11913 = vmatmul.mubr.f32.gmra.mrb[46].mxu0 %v2732_v47  ;;  %v4489_v22 = vmax.f32 %v4457_v15, %v4473_v0  ;;  %v5087_v0 = vld [vmem:[#allocation4 + $0xe0] sm:$0xff] }
 0x31f   : > { %v4488_v6 = vmax.f32 %v4456_v29, %v4472_v4  ;;  %v4458_v31 = vadd.f32 %v16623_v30, %v4371_v21  ;;  %v5086_v29 = vld [vmem:[#allocation4 + $0xd8] sm:$0xff]  ;;  %v5088_v4 = vld [vmem:[#allocation4 + $0xe8] sm:$0xff] }
 0x320   : > { %v4475_v11 = vmul.f32 0.1, %v4459_v33  ;;  %v13819_v61 = vpack.c.bf16 %v5088_v4, %v5087_v0 }
 0x321   : > { %v4474_v2 = vmul.f32 0.1, %v4458_v31  ;;  %v11843_v14 = vpop.f32.mrb[20].mxu1  ;;  %11947 = vmatprep.mubr.f32.mxu1 %v4488_v6  ;;  %v5058_v6 = vld [vmem:[#allocation3 + $0x1] sm:$0xff] }
 0x322   : > { %v4461_v25 = vadd.f32 %v11843_v14, %v16623_v30  ;;  %v4381_v52 = vpop.f32.mrb[21].mxu1  ;;  %11948 = vmatmul.mubr.f32.vlgmr.msra.gmra.mrb[32].mxu1 %v4489_v22  ;;  %v4491_v18 = vmax.f32 %v4459_v33, %v4475_v11  ;;  %v5090_v33 = vld [vmem:[#allocation4 + $0xf8] sm:$0xff]  ;;  %12003 = vmatprep.mubr.f32.mxu0 %v5058_v6  ;;  %v5042_v22 = vld [vmem:[#allocation4] sm:$0xff]  ;;  %v5043_v11 = vld [vmem:[#allocation4 + $0x8] sm:$0xff] }
 0x323   : > { %v4490_v44 = vmax.f32 %v4458_v31, %v4474_v2  ;;  %v4460_v56 = vadd.f32 %v16623_v30, %v4381_v52  ;;  %14086 = vmatpush3.bf16.msra.mxu1 %v16616_v58  ;;  %v5059_v31 = vld [vmem:[#allocation3 + $0x9] sm:$0xff]  ;;  %v16683_v2 = vpack.c.bf16 %v5043_v11, %v5042_v22  ;;  %v5044_v14 = vld [vmem:[#allocation4 + $0x10] sm:$0xff] }
 0x324   : > { %v4477_v19 = vmul.f32 0.1, %v4461_v25  ;;  %14088 = vmatprep.subr.bf16.mxu1 %v16629_v24 }
 0x325   : > { %v4476_v1 = vmul.f32 0.1, %v4460_v56  ;;  %v11846_v20 = vpop.f32.mrb[22].mxu1  ;;  %11950 = vmatprep.mubr.f32.mxu1 %v4490_v44  ;;  %v5046_v44 = vld [vmem:[#allocation4 + $0x20] sm:$0xff] }
 0x326   : > { %v4463_v48 = vadd.f32 %v11846_v20, %v16623_v30  ;;  %v4391_v46 = vpop.f32.mrb[23].mxu1  ;;  %11951 = vmatmul.mubr.f32.gmra.mrb[34].mxu1 %v4491_v18  ;;  %v4493_v13 = vmax.f32 %v4461_v25, %v4477_v19  ;;  %v5045_v25 = vld [vmem:[#allocation4 + $0x18] sm:$0xff]  ;;  %v5048_v19 = vld [vmem:[#allocation4 + $0x30] sm:$0xff] }
 0x327   : > { %v4492_v45 = vmax.f32 %v4460_v56, %v4476_v1  ;;  %v4462_v10 = vadd.f32 %v16623_v30, %v4391_v46  ;;  %14090 = vmatpush3.bf16.msra.mxu1 %v16629_v24  ;;  %v16688_v52 = vpack.c.bf16 %v5045_v25, %v5044_v14  ;;  %v5047_v56 = vld [vmem:[#allocation4 + $0x28] sm:$0xff]  ;;  %v5049_v1 = vld [vmem:[#allocation4 + $0x38] sm:$0xff] }
 0x328   : > { %v4479_v41 = vmul.f32 0.1, %v4463_v48  ;;  %14092 = vmatprep.subr.bf16.mxu1 %v16635_v39  ;;  %v16692_v18 = vpack.c.bf16 %v5047_v56, %v5046_v44  ;;  %v16696_v20 = vpack.c.bf16 %v5049_v1, %v5048_v19  ;;  %v5051_v46 = vld [vmem:[#allocation4 + $0x48] sm:$0xff] }
 0x329   : > { %v4478_v58 = vmul.f32 0.1, %v4462_v10  ;;  %v11849_v34 = vpop.f32.mrb[24].mxu1  ;;  %11953 = vmatprep.mubr.f32.mxu1 %v4492_v45 }
 0x32a   : > { %v4465_v51 = vadd.f32 %v11849_v34, %v16623_v30  ;;  %v4401_v23 = vpop.f32.mrb[25].mxu1  ;;  %11954 = vmatmul.mubr.f32.gmra.mrb[36].mxu1 %v4493_v13  ;;  %v4495_v55 = vmax.f32 %v4463_v48, %v4479_v41  ;;  %v5050_v48 = vld [vmem:[#allocation4 + $0x40] sm:$0xff]  ;;  %v5053_v13 = vld [vmem:[#allocation4 + $0x58] sm:$0xff]  ;;  %v5055_v34 = vld [vmem:[#allocation4 + $0x68] sm:$0xff] }
 0x32b   : > { %v4494_v53 = vmax.f32 %v4462_v10, %v4478_v58  ;;  %v4464_v36 = vadd.f32 %v16623_v30, %v4401_v23  ;;  %14094 = vmatpush3.bf16.msra.mxu1 %v16635_v39  ;;  %v16700_v45 = vpack.c.bf16 %v5051_v46, %v5050_v48  ;;  %v5052_v10 = vld [vmem:[#allocation4 + $0x50] sm:$0xff]  ;;  %v5054_v58 = vld [vmem:[#allocation4 + $0x60] sm:$0xff] }
 0x32c   : > { %v4481_v7 = vmul.f32 0.1, %v4465_v51  ;;  %14096 = vmatprep.subr.bf16.mxu1 %v16641_v62  ;;  %v16704_v41 = vpack.c.bf16 %v5053_v13, %v5052_v10  ;;  %v5056_v23 = vld [vmem:[#allocation4 + $0x70] sm:$0xff] }
 0x32d   : > { %v4480_v24 = vmul.f32 0.1, %v4464_v36  ;;  %v11852_v27 = vpop.f32.mrb[26].mxu1  ;;  %11956 = vmatprep.mubr.f32.mxu1 %v4494_v53  ;;  %v5057_v53 = vld [vmem:[#allocation4 + $0x78] sm:$0xff] }
 0x32e   : > { %v4467_v60 = vadd.f32 %v11852_v27, %v16623_v30  ;;  %v4411_v26 = vpop.f32.mrb[27].mxu1  ;;  %11957 = vmatmul.mubr.f32.gmra.mrb[38].mxu1 %v4495_v55  ;;  %v4497_v57 = vmax.f32 %v4465_v51, %v4481_v7  ;;  %v16708_v51 = vpack.c.bf16 %v5055_v34, %v5054_v58  ;;  %v5398_v55 = vld [vmem:[#allocation4 + $0x100] sm:$0xff]  ;;  %v5399_v7 = vld [vmem:[#allocation4 + $0x108] sm:$0xff]  ;;  %v16722_v27 = vld [vmem:[%s17686_s6] ss:$0 sm:$0xff] }
 0x32f   : > { %v4496_v43 = vmax.f32 %v4464_v36, %v4480_v24  ;;  %v4466_v35 = vadd.f32 %v16623_v30, %v4411_v26  ;;  %14098 = vmatpush3.bf16.msra.mxu1 %v16641_v62  ;;  %v16712_v36 = vpack.c.bf16 %v5057_v53, %v5056_v23  ;;  %v16716_v24 = vpack.c.bf16 %v5399_v7, %v5398_v55 }
 0x330   : > { %v4483_v3 = vmul.f32 0.1, %v4467_v60  ;;  %14100 = vmatprep.subr.bf16.mxu1 %v16647_v17 }
 0x331   : > { %v4482_v39 = vmul.f32 0.1, %v4466_v35  ;;  %v11855_v8 = vpop.f32.mrb[28].mxu1  ;;  %11959 = vmatprep.mubr.f32.mxu1 %v4496_v43 }
 0x332   : > { %v4469_v54 = vadd.f32 %v11855_v8, %v16623_v30  ;;  %v4421_v40 = vpop.f32.mrb[29].mxu1  ;;  %11960 = vmatmul.mubr.f32.gmra.mrb[40].mxu1 %v4497_v57  ;;  %v4499_v5 = vmax.f32 %v4467_v60, %v4483_v3 }
 0x333   : > { %v4498_v32 = vmax.f32 %v4466_v35, %v4482_v39  ;;  %v4468_v12 = vadd.f32 %v16623_v30, %v4421_v40  ;;  %14102 = vmatpush3.bf16.msra.mxu1 %v16647_v17  ;;  %v5085_v17 = vld [vmem:[#allocation4 + $0xd0] sm:$0xff] }
 0x334   : > { %v4485_v16 = vmul.f32 0.1, %v4469_v54  ;;  %v13815_v47 = vpack.c.bf16 %v5086_v29, %v5085_v17 }
 0x335   : > { %v4484_v38 = vmul.f32 0.1, %v4468_v12  ;;  %v11858_v62 = vpop.f32.mrb[30].mxu1  ;;  %11962 = vmatprep.mubr.f32.mxu1 %v4498_v32 }
 0x336   : > { %v4471_v28 = vadd.f32 %v11858_v62, %v16623_v30  ;;  %v4431_v49 = vpop.f32.mrb[31].mxu1  ;;  %11963 = vmatmul.mubr.f32.gmra.mrb[42].mxu1 %v4499_v5  ;;  %v4501_v63 = vmax.f32 %v4469_v54, %v4485_v16  ;;  %13816 = vmatprep.subr.bf16.mxu0 %v13815_v47 }
 0x337   : > { %v4500_v42 = vmax.f32 %v4468_v12, %v4484_v38  ;;  %v4470_v50 = vadd.f32 %v16623_v30, %v4431_v49  ;;  %14104 = vmatprep.subr.bf16.mxu1 %v13815_v47  ;;  %13818 = vmatpush3.bf16.msra.mxu0 %v13815_v47  ;;  %v5089_v30 = vld [vmem:[#allocation4 + $0xf0] sm:$0xff] }
 0x338   : > { %v4487_v37 = vmul.f32 0.1, %v4471_v28  ;;  %14106 = vmatpush3.bf16.msra.mxu1 %v13815_v47  ;;  %13820 = vmatprep.subr.bf16.mxu0 %v13819_v61  ;;  %v13823_v21 = vpack.c.bf16 %v5090_v33, %v5089_v30 }
 0x339   : > { %v4486_v15 = vmul.f32 0.1, %v4470_v50  ;;  %11965 = vmatprep.mubr.f32.mxu1 %v4500_v42  ;;  %14108 = vmatprep.subr.bf16.mxu1 %v13819_v61 }
 0x33a   : > { %11966 = vmatmul.mubr.f32.gmra.mrb[44].mxu1 %v4501_v63  ;;  %v4503_v9 = vmax.f32 %v4471_v28, %v4487_v37 }
 0x33b   : > { %v4502_v59 = vmax.f32 %v4470_v50, %v4486_v15  ;;  %13822 = vmatpush3.bf16.msra.mxu0 %v13819_v61 }
 0x33c   : > { %14110 = vmatpush3.bf16.msra.mxu1 %v13819_v61  ;;  %13824 = vmatprep.subr.bf16.mxu0 %v13823_v21 }
 0x33d   : > { %11968 = vmatprep.mubr.f32.mxu1 %v4502_v59  ;;  %14112 = vmatprep.subr.bf16.mxu1 %v13823_v21 }
 0x33e   : > { %11969 = vmatmul.mubr.f32.gmra.mrb[46].mxu1 %v4503_v9 }
 0x33f   : > { %13826 = vmatpush3.bf16.msra.mxu0 %v13823_v21 }
 0x340   : > { %14114 = vmatpush3.bf16.msra.mxu1 %v13823_v21  ;;  %13828 = vmatprep.subr.bf16.mxu0 %v16683_v2 }
 0x341   : > { %14116 = vmatprep.subr.bf16.mxu1 %v16683_v2 }
 0x342   : > { %12004 = vmatmul.mubr.f32.vlgmr.msra.gmra.mrb[48].mxu0 %v5059_v31 }
 0x343   : > { %13830 = vmatpush3.bf16.msra.mxu0 %v16683_v2 }
 0x344   : > { %13832 = vmatprep.subr.bf16.mxu0 %v16688_v52 }
 0x347   : > { %13834 = vmatpush3.bf16.msra.mxu0 %v16688_v52 }
 0x348   : > { %13836 = vmatprep.subr.bf16.mxu0 %v16692_v18 }
 0x34b   : > { %13838 = vmatpush3.bf16.msra.mxu0 %v16692_v18 }
 0x34c   : > { %13840 = vmatprep.subr.bf16.mxu0 %v16696_v20 }
 0x34f   : > { %13842 = vmatpush3.bf16.msra.mxu0 %v16696_v20 }
 0x350   : > { %13844 = vmatprep.subr.bf16.mxu0 %v16700_v45 }
 0x353   : > { %13846 = vmatpush3.bf16.msra.mxu0 %v16700_v45 }
 0x354   : > { %13848 = vmatprep.subr.bf16.mxu0 %v16704_v41 }
 0x357   : > { %13850 = vmatpush3.bf16.msra.mxu0 %v16704_v41 }
 0x358   : > { %13852 = vmatprep.subr.bf16.mxu0 %v16708_v51 }
 0x35b   : > { %13854 = vmatpush3.bf16.msra.mxu0 %v16708_v51 }
 0x35c   : > { %13856 = vmatprep.subr.bf16.mxu0 %v16712_v36 }
 0x35f   : > { %13858 = vmatpush3.bf16.msra.mxu0 %v16712_v36 }
 0x360   : > { %13860 = vmatprep.subr.bf16.mxu0 %v16716_v24 }
 0x3d5   : > { %v11893_v60 = vpop.f32.mrb[32].mxu0 }
 0x3d6   : > { %v4631_v26 = vadd.f32 %v11893_v60, %v16722_v27  ;;  %v4625_v43 = vpop.f32.mrb[33].mxu0 }
 0x3d7   : > { %v4626_v35 = vadd.f32 %v16722_v27, %v4625_v43 }
 0x3d8   : > { %v4705_v57 = vmul.f32 0.1, %v4631_v26 }
 0x3d9   : > { %v4704_v3 = vmul.f32 0.1, %v4626_v35  ;;  %v11896_v39 = vpop.f32.mrb[34].mxu0 }
 0x3da   : > { %v4721_v8 = vmax.f32 %v4631_v26, %v4705_v57  ;;  %v4641_v54 = vadd.f32 %v11896_v39, %v16722_v27  ;;  %v4635_v40 = vpop.f32.mrb[35].mxu0 }
 0x3db   : > { %v4720_v32 = vmax.f32 %v4626_v35, %v4704_v3  ;;  %v4636_v12 = vadd.f32 %v16722_v27, %v4635_v40 }
 0x3dc   : > { %4978 = vst [vmem:[#allocation3 + $0x21] sm:$0xff] %v4721_v8  ;;  %v4707_v5 = vmul.f32 0.1, %v4641_v54 }
 0x3dd   : > { %4977 = vst [vmem:[#allocation3 + $0x19] sm:$0xff] %v4720_v32  ;;  %v4706_v16 = vmul.f32 0.1, %v4636_v12  ;;  %v11899_v38 = vpop.f32.mrb[36].mxu0  ;;  %12006 = vmatprep.mubr.f32.mxu0 %v4720_v32 }
 0x3de   : > { %v4723_v62 = vmax.f32 %v4641_v54, %v4707_v5  ;;  %v4651_v28 = vadd.f32 %v11899_v38, %v16722_v27  ;;  %v4645_v49 = vpop.f32.mrb[37].mxu0  ;;  %12007 = vmatmul.mubr.f32.gmra.mrb[50].mxu0 %v4721_v8  ;;  %v5400_v5 = vld [vmem:[#allocation4 + $0x110] sm:$0xff] }
 0x3df   : > { %v4722_v42 = vmax.f32 %v4636_v12, %v4706_v16  ;;  %v4646_v50 = vadd.f32 %v16722_v27, %v4645_v49  ;;  %v5401_v16 = vld [vmem:[#allocation4 + $0x118] sm:$0xff] }
 0x3e0   : > { %4980 = vst [vmem:[#allocation3 + $0x39] sm:$0xff] %v4723_v62  ;;  %v4709_v63 = vmul.f32 0.1, %v4651_v28 }
 0x3e1   : > { %4979 = vst [vmem:[#allocation3 + $0x31] sm:$0xff] %v4722_v42  ;;  %v4708_v37 = vmul.f32 0.1, %v4646_v50  ;;  %v11902_v15 = vpop.f32.mrb[38].mxu0  ;;  %12009 = vmatprep.mubr.f32.mxu0 %v4722_v42 }
 0x3e2   : > { %v4725_v59 = vmax.f32 %v4651_v28, %v4709_v63  ;;  %v4661_v9 = vadd.f32 %v11902_v15, %v16722_v27  ;;  %v4655_v17 = vpop.f32.mrb[39].mxu0  ;;  %12010 = vmatmul.mubr.f32.gmra.mrb[52].mxu0 %v4723_v62  ;;  %v14972_v28 = vld [vmem:[#allocation3] sm:$0xff]  ;;  %v16742_v63 = vpack.c.bf16 %v5401_v16, %v5400_v5 }
 0x3e3   : > { %v4724_v29 = vmax.f32 %v4646_v50, %v4708_v37  ;;  %v4656_v47 = vadd.f32 %v16722_v27, %v4655_v17  ;;  %v5402_v17 = vld [vmem:[#allocation4 + $0x120] sm:$0xff] }
 0x3e4   : > { %4982 = vst [vmem:[#allocation3 + $0x51] sm:$0xff] %v4725_v59  ;;  %v4711_v0 = vmul.f32 0.1, %v4661_v9 }
 0x3e5   : > { %4981 = vst [vmem:[#allocation3 + $0x49] sm:$0xff] %v4724_v29  ;;  %v4710_v4 = vmul.f32 0.1, %v4656_v47  ;;  %v11905_v61 = vpop.f32.mrb[40].mxu0  ;;  %12012 = vmatprep.mubr.f32.mxu0 %v4724_v29  ;;  %v5403_v29 = vld [vmem:[#allocation4 + $0x128] sm:$0xff] }
 0x3e6   : > { %v4727_v30 = vmax.f32 %v4661_v9, %v4711_v0  ;;  %v4671_v33 = vadd.f32 %v11905_v61, %v16722_v27  ;;  %v4665_v21 = vpop.f32.mrb[41].mxu0  ;;  %12013 = vmatmul.mubr.f32.gmra.mrb[54].mxu0 %v4725_v59  ;;  %v16745_v9 = vld [vmem:[#allocation3 + $0x18] sm:$0xff] }
 0x3e7   : > { %v4726_v6 = vmax.f32 %v4656_v47, %v4710_v4  ;;  %v4666_v31 = vadd.f32 %v16722_v27, %v4665_v21  ;;  %v16755_v21 = vpack.c.bf16 %v5403_v29, %v5402_v17 }
 0x3e8   : > { %4984 = vst [vmem:[#allocation3 + $0x69] sm:$0xff] %v4727_v30  ;;  %v4713_v22 = vmul.f32 0.1, %v4671_v33 }
 0x3e9   : > { %4983 = vst [vmem:[#allocation3 + $0x61] sm:$0xff] %v4726_v6  ;;  %v4712_v11 = vmul.f32 0.1, %v4666_v31  ;;  %v11908_v14 = vpop.f32.mrb[42].mxu0  ;;  %12015 = vmatprep.mubr.f32.mxu0 %v4726_v6 }
 0x3ea   : > { %v4729_v25 = vmax.f32 %v4671_v33, %v4713_v22  ;;  %v4681_v44 = vadd.f32 %v11908_v14, %v16722_v27  ;;  %v4675_v56 = vpop.f32.mrb[43].mxu0  ;;  %12016 = vmatmul.mubr.f32.gmra.mrb[56].mxu0 %v4727_v30  ;;  %v16752_v33 = vld [vmem:[#allocation3 + $0x20] sm:$0xff]  ;;  %v16759_v22 = vld [vmem:[#allocation3 + $0x30] sm:$0xff]  ;;  %v5405_v14 = vld [vmem:[#allocation4 + $0x138] sm:$0xff] }
 0x3eb   : > { %v4728_v19 = vmax.f32 %v4666_v31, %v4712_v11  ;;  %v4676_v1 = vadd.f32 %v16722_v27, %v4675_v56  ;;  %v5404_v11 = vld [vmem:[#allocation4 + $0x130] sm:$0xff] }
 0x3ec   : > { %4986 = vst [vmem:[#allocation3 + $0x81] sm:$0xff] %v4729_v25  ;;  %v4715_v48 = vmul.f32 0.1, %v4681_v44 }
 0x3ed   : > { %4985 = vst [vmem:[#allocation3 + $0x79] sm:$0xff] %v4728_v19  ;;  %v4714_v46 = vmul.f32 0.1, %v4676_v1  ;;  %v11911_v10 = vpop.f32.mrb[44].mxu0  ;;  %12018 = vmatprep.mubr.f32.mxu0 %v4728_v19 }
 0x3ee   : > { %v4731_v13 = vmax.f32 %v4681_v44, %v4715_v48  ;;  %v4691_v58 = vadd.f32 %v11911_v10, %v16722_v27  ;;  %v4685_v34 = vpop.f32.mrb[45].mxu0  ;;  %12019 = vmatmul.mubr.f32.gmra.mrb[58].mxu0 %v4729_v25  ;;  %v16766_v48 = vld [vmem:[#allocation3 + $0x38] sm:$0xff] }
 0x3ef   : > { %v4730_v23 = vmax.f32 %v4676_v1, %v4714_v46  ;;  %v4686_v53 = vadd.f32 %v16722_v27, %v4685_v34  ;;  %v16769_v46 = vpack.c.bf16 %v5405_v14, %v5404_v11  ;;  %v5406_v34 = vld [vmem:[#allocation4 + $0x140] sm:$0xff] }
 0x3f0   : > { %4988 = vst [vmem:[#allocation3 + $0x99] sm:$0xff] %v4731_v13  ;;  %v4717_v55 = vmul.f32 0.1, %v4691_v58 }
 0x3f1   : > { %4987 = vst [vmem:[#allocation3 + $0x91] sm:$0xff] %v4730_v23  ;;  %v4716_v7 = vmul.f32 0.1, %v4686_v53  ;;  %v11914_v60 = vpop.f32.mrb[46].mxu0  ;;  %12021 = vmatprep.mubr.f32.mxu0 %v4730_v23  ;;  %v5407_v23 = vld [vmem:[#allocation4 + $0x148] sm:$0xff] }
 0x3f2   : > { %v4733_v26 = vmax.f32 %v4691_v58, %v4717_v55  ;;  %v4701_v43 = vadd.f32 %v11914_v60, %v16722_v27  ;;  %v4695_v35 = vpop.f32.mrb[47].mxu0  ;;  %12022 = vmatmul.mubr.f32.gmra.mrb[60].mxu0 %v4731_v13  ;;  %v16773_v58 = vld [vmem:[#allocation3 + $0x48] sm:$0xff] }
 0x3f3   : > { %v4732_v57 = vmax.f32 %v4686_v53, %v4716_v7  ;;  %v4696_v3 = vadd.f32 %v16722_v27, %v4695_v35  ;;  %v16783_v35 = vpack.c.bf16 %v5407_v23, %v5406_v34  ;;  %v5592_v34 = vld [vmem:[#allocation4 + $0x180] sm:$0xff]  ;;  %v5593_v23 = vld [vmem:[#allocation4 + $0x188] sm:$0xff] }
 0x3f4   : > { %4990 = vst [vmem:[#allocation3 + $0xb1] sm:$0xff] %v4733_v26  ;;  %v4719_v39 = vmul.f32 0.1, %v4701_v43 }
 0x3f5   : > { %4989 = vst [vmem:[#allocation3 + $0xa9] sm:$0xff] %v4732_v57  ;;  %v4718_v8 = vmul.f32 0.1, %v4696_v3  ;;  %v11949_v54 = vpop.f32.mrb[32].mxu1  ;;  %12024 = vmatprep.mubr.f32.mxu0 %v4732_v57 }
 0x3f6   : > { %v4735_v40 = vmax.f32 %v4701_v43, %v4719_v39  ;;  %v4840_v32 = vadd.f32 %v11949_v54, %v16722_v27  ;;  %v4834_v12 = vpop.f32.mrb[33].mxu1  ;;  %12025 = vmatmul.mubr.f32.gmra.mrb[62].mxu0 %v4733_v26  ;;  %v16780_v43 = vld [vmem:[#allocation3 + $0x50] sm:$0xff]  ;;  %v16787_v39 = vld [vmem:[#allocation3 + $0x60] sm:$0xff]  ;;  %v5409_v54 = vld [vmem:[#allocation4 + $0x158] sm:$0xff] }
 0x3f7   : > { %v4734_v38 = vmax.f32 %v4696_v3, %v4718_v8  ;;  %v4835_v62 = vadd.f32 %v16722_v27, %v4834_v12  ;;  %12059 = vmatprep.mubr.f32.mxu0 %v14972_v28  ;;  %v5408_v8 = vld [vmem:[#allocation4 + $0x150] sm:$0xff] }
 0x3f8   : > { %4992 = vst [vmem:[#allocation3 + $0xc9] sm:$0xff] %v4735_v40  ;;  %v4914_v49 = vmul.f32 0.1, %v4840_v32 }
 0x3f9   : > { %4991 = vst [vmem:[#allocation3 + $0xc1] sm:$0xff] %v4734_v38  ;;  %v4913_v42 = vmul.f32 0.1, %v4835_v62  ;;  %v11952_v50 = vpop.f32.mrb[34].mxu1  ;;  %12507 = vmatprep.mubr.f32.mxu1 %v4734_v38  ;;  %v16794_v38 = vld [vmem:[#allocation3 + $0x68] sm:$0xff] }
 0x3fa   : > { %v4930_v37 = vmax.f32 %v4840_v32, %v4914_v49  ;;  %v4850_v15 = vadd.f32 %v11952_v50, %v16722_v27  ;;  %v4844_v59 = vpop.f32.mrb[35].mxu1  ;;  %12060 = vmatmul.mubr.f32.vlgmr.msra.gmra.mrb[48].mxu0 %v14972_v28  ;;  %12508 = vmatmul.mubr.f32.vlgmr.msra.gmra.mrb[48].mxu1 %v4735_v40  ;;  %v5410_v50 = vld [vmem:[#allocation4 + $0x160] sm:$0xff] }
 0x3fb   : > { %v4929_v47 = vmax.f32 %v4835_v62, %v4913_v42  ;;  %v4845_v0 = vadd.f32 %v16722_v27, %v4844_v59  ;;  %14118 = vmatpush3.bf16.msra.mxu1 %v16683_v2  ;;  %12062 = vmatprep.mubr.f32.mxu0 %v16745_v9  ;;  %v16797_v62 = vpack.c.bf16 %v5409_v54, %v5408_v8  ;;  %v16801_v42 = vld [vmem:[#allocation3 + $0x78] sm:$0xff]  ;;  %v5594_v8 = vld [vmem:[#allocation4 + $0x190] sm:$0xff]  ;;  %v5595_v54 = vld [vmem:[#allocation4 + $0x198] sm:$0xff] }
 0x3fc   : > { %5010 = vst [vmem:[#allocation3 + $0xe1] sm:$0xff] %v4930_v37  ;;  %v4916_v4 = vmul.f32 0.1, %v4850_v15  ;;  %13862 = vmatpush3.bf16.msra.mxu0 %v16716_v24  ;;  %14120 = vmatprep.subr.bf16.mxu1 %v16688_v52 }
 0x3fd   : > { %5009 = vst [vmem:[#allocation3 + $0xd9] sm:$0xff] %v4929_v47  ;;  %v4915_v61 = vmul.f32 0.1, %v4845_v0  ;;  %v11955_v30 = vpop.f32.mrb[36].mxu1  ;;  %12510 = vmatprep.mubr.f32.mxu1 %v4929_v47  ;;  %13864 = vmatprep.subr.bf16.mxu0 %v16742_v63 }
 0x3fe   : > { %v4932_v6 = vmax.f32 %v4850_v15, %v4916_v4  ;;  %v4860_v2 = vadd.f32 %v11955_v30, %v16722_v27  ;;  %v4854_v31 = vpop.f32.mrb[37].mxu1  ;;  %12063 = vmatmul.mubr.f32.gmra.mrb[50].mxu0 %v16752_v33  ;;  %12511 = vmatmul.mubr.f32.gmra.mrb[50].mxu1 %v4930_v37  ;;  %v5411_v37 = vld [vmem:[#allocation4 + $0x168] sm:$0xff] }
 0x3ff   : > { %v4931_v25 = vmax.f32 %v4845_v0, %v4915_v61  ;;  %v4855_v44 = vadd.f32 %v16722_v27, %v4854_v31  ;;  %14122 = vmatpush3.bf16.msra.mxu1 %v16688_v52  ;;  %12065 = vmatprep.mubr.f32.mxu0 %v16759_v22  ;;  %v16808_v0 = vld [vmem:[#allocation3 + $0x80] sm:$0xff]  ;;  %v16811_v4 = vpack.c.bf16 %v5411_v37, %v5410_v50  ;;  %v5413_v31 = vld [vmem:[#allocation4 + $0x178] sm:$0xff]  ;;  %v16873_v50 = vld [vmem:[#allocation3 + $0x32] sm:$0xff] }
 0x400   : > { %5012 = vst [vmem:[#allocation3 + $0xf9] sm:$0xff] %v4932_v6  ;;  %v4918_v56 = vmul.f32 0.1, %v4860_v2  ;;  %13866 = vmatpush3.bf16.msra.mxu0 %v16742_v63  ;;  %14124 = vmatprep.subr.bf16.mxu1 %v16692_v18  ;;  %v5598_v37 = vld [vmem:[#allocation4 + $0x1b0] sm:$0xff] }
 0x401   : > { %5011 = vst [vmem:[#allocation3 + $0xf1] sm:$0xff] %v4931_v25  ;;  %v4917_v19 = vmul.f32 0.1, %v4855_v44  ;;  %v11958_v1 = vpop.f32.mrb[38].mxu1  ;;  %12513 = vmatprep.mubr.f32.mxu1 %v4931_v25  ;;  %13868 = vmatprep.subr.bf16.mxu0 %v16755_v21 }
 0x402   : > { %v4934_v10 = vmax.f32 %v4860_v2, %v4918_v56  ;;  %v4870_v52 = vadd.f32 %v11958_v1, %v16722_v27  ;;  %v4864_v13 = vpop.f32.mrb[39].mxu1  ;;  %12066 = vmatmul.mubr.f32.gmra.mrb[52].mxu0 %v16766_v48  ;;  %12514 = vmatmul.mubr.f32.gmra.mrb[52].mxu1 %v4932_v6  ;;  %v16815_v6 = vld [vmem:[#allocation3 + $0x90] sm:$0xff]  ;;  %v5412_v2 = vld [vmem:[#allocation4 + $0x170] sm:$0xff] }
 0x403   : > { %v4933_v53 = vmax.f32 %v4855_v44, %v4917_v19  ;;  %v4865_v55 = vadd.f32 %v16722_v27, %v4864_v13  ;;  %14126 = vmatpush3.bf16.msra.mxu1 %v16692_v18  ;;  %12068 = vmatprep.mubr.f32.mxu0 %v16773_v58  ;;  %v16822_v19 = vld [vmem:[#allocation3 + $0x98] sm:$0xff]  ;;  %v16825_v1 = vpack.c.bf16 %v5413_v31, %v5412_v2  ;;  %v16829_v13 = vld [vmem:[#allocation3 + $0xa8] sm:$0xff] }
 0x404   : > { %5014 = vst [vmem:[#allocation3 + $0x111] sm:$0xff] %v4934_v10  ;;  %v4920_v7 = vmul.f32 0.1, %v4870_v52  ;;  %13870 = vmatpush3.bf16.msra.mxu0 %v16755_v21  ;;  %14128 = vmatprep.subr.bf16.mxu1 %v16696_v20  ;;  %v16901_v31 = vld [vmem:[#allocation3 + $0x52] sm:$0xff] }
 0x405   : > { %5013 = vst [vmem:[#allocation3 + $0x109] sm:$0xff] %v4933_v53  ;;  %v4919_v60 = vmul.f32 0.1, %v4865_v55  ;;  %v11961_v26 = vpop.f32.mrb[40].mxu1  ;;  %12516 = vmatprep.mubr.f32.mxu1 %v4933_v53  ;;  %13872 = vmatprep.subr.bf16.mxu0 %v16769_v46 }
 0x406   : > { %v4936_v57 = vmax.f32 %v4870_v52, %v4920_v7  ;;  %v4880_v18 = vadd.f32 %v11961_v26, %v16722_v27  ;;  %v4874_v3 = vpop.f32.mrb[41].mxu1  ;;  %12069 = vmatmul.mubr.f32.gmra.mrb[54].mxu0 %v16780_v43  ;;  %12517 = vmatmul.mubr.f32.gmra.mrb[54].mxu1 %v4934_v10  ;;  %v16836_v26 = vld [vmem:[#allocation3 + $0xb0] sm:$0xff] }
 0x407   : > { %v4935_v40 = vmax.f32 %v4865_v55, %v4919_v60  ;;  %v4875_v32 = vadd.f32 %v16722_v27, %v4874_v3  ;;  %14130 = vmatpush3.bf16.msra.mxu1 %v16696_v20  ;;  %12071 = vmatprep.mubr.f32.mxu0 %v16787_v39 }
 0x408   : > { %5016 = vst [vmem:[#allocation3 + $0x129] sm:$0xff] %v4936_v57  ;;  %v4922_v12 = vmul.f32 0.1, %v4880_v18  ;;  %13874 = vmatpush3.bf16.msra.mxu0 %v16769_v46  ;;  %14132 = vmatprep.subr.bf16.mxu1 %v16700_v45 }
 0x409   : > { %5015 = vst [vmem:[#allocation3 + $0x121] sm:$0xff] %v4935_v40  ;;  %v4921_v5 = vmul.f32 0.1, %v4875_v32  ;;  %v11964_v16 = vpop.f32.mrb[42].mxu1  ;;  %12519 = vmatprep.mubr.f32.mxu1 %v4935_v40  ;;  %13876 = vmatprep.subr.bf16.mxu0 %v16783_v35  ;;  %v5382_v40 = vld [vmem:[#allocation3 + $0xa] sm:$0xff] }
 0x40a   : > { %v4938_v28 = vmax.f32 %v4880_v18, %v4922_v12  ;;  %v4890_v20 = vadd.f32 %v11964_v16, %v16722_v27  ;;  %v4884_v49 = vpop.f32.mrb[43].mxu1  ;;  %12072 = vmatmul.mubr.f32.gmra.mrb[56].mxu0 %v16794_v38  ;;  %12520 = vmatmul.mubr.f32.gmra.mrb[56].mxu1 %v4936_v57  ;;  %v5381_v57 = vld [vmem:[#allocation3 + $0x2] sm:$0xff]  ;;  %v16839_v18 = vpack.c.bf16 %v5593_v23, %v5592_v34  ;;  %v5597_v16 = vld [vmem:[#allocation4 + $0x1a8] sm:$0xff] }
 0x40b   : > { %v4937_v15 = vmax.f32 %v4875_v32, %v4921_v5  ;;  %v4885_v59 = vadd.f32 %v16722_v27, %v4884_v49  ;;  %14134 = vmatpush3.bf16.msra.mxu1 %v16700_v45  ;;  %12074 = vmatprep.mubr.f32.mxu0 %v16801_v42  ;;  %v16849_v32 = vld [vmem:[#allocation3 + $0xc8] sm:$0xff]  ;;  %v16852_v12 = vpack.c.bf16 %v5595_v54, %v5594_v8  ;;  %v5596_v5 = vld [vmem:[#allocation4 + $0x1a0] sm:$0xff]  ;;  %v5605_v34 = vld [vmem:[#allocation4 + $0x1e8] sm:$0xff] }
 0x40c   : > { %5018 = vst [vmem:[#allocation3 + $0x141] sm:$0xff] %v4938_v28  ;;  %v4924_v17 = vmul.f32 0.1, %v4890_v20  ;;  %13878 = vmatpush3.bf16.msra.mxu0 %v16783_v35  ;;  %14136 = vmatprep.subr.bf16.mxu1 %v16704_v41  ;;  %v16865_v49 = vld [vmem:[#allocation3 + $0x22] sm:$0xff]  ;;  %v16899_v2 = vld [vmem:[#allocation3 + $0x110] sm:$0xff]  ;;  %v16955_v8 = vld [vmem:[#allocation3 + $0x9a] sm:$0xff] }
 0x40d   : > { %5017 = vst [vmem:[#allocation3 + $0x139] sm:$0xff] %v4937_v15  ;;  %v4923_v29 = vmul.f32 0.1, %v4885_v59  ;;  %v11967_v47 = vpop.f32.mrb[44].mxu1  ;;  %12522 = vmatprep.mubr.f32.mxu1 %v4937_v15  ;;  %13880 = vmatprep.subr.bf16.mxu0 %v16797_v62  ;;  %v5599_v15 = vld [vmem:[#allocation4 + $0x1b8] sm:$0xff] }
 0x40e   : > { %v4940_v61 = vmax.f32 %v4890_v20, %v4924_v17  ;;  %v4900_v45 = vadd.f32 %v11967_v47, %v16722_v27  ;;  %v4894_v30 = vpop.f32.mrb[45].mxu1  ;;  %12075 = vmatmul.mubr.f32.gmra.mrb[58].mxu0 %v16808_v0  ;;  %12523 = vmatmul.mubr.f32.gmra.mrb[58].mxu1 %v4938_v28  ;;  %v16859_v28 = vld [vmem:[#allocation3 + $0xd8] sm:$0xff]  ;;  %v16863_v20 = vld [vmem:[#allocation3 + $0xe0] sm:$0xff]  ;;  %v16891_v47 = vld [vmem:[#allocation3 + $0x4a] sm:$0xff] }
 0x40f   : > { %v4939_v11 = vmax.f32 %v4885_v59, %v4923_v29  ;;  %v4895_v14 = vadd.f32 %v16722_v27, %v4894_v30  ;;  %14138 = vmatpush3.bf16.msra.mxu1 %v16704_v41  ;;  %12077 = vmatprep.mubr.f32.mxu0 %v16815_v6  ;;  %v16877_v59 = vld [vmem:[#allocation3 + $0xf0] sm:$0xff]  ;;  %v16881_v17 = vld [vmem:[#allocation3 + $0xf8] sm:$0xff]  ;;  %v16895_v30 = vld [vmem:[#allocation3 + $0x108] sm:$0xff] }
 0x410   : > { %5020 = vst [vmem:[#allocation3 + $0x159] sm:$0xff] %v4940_v61  ;;  %v4926_v25 = vmul.f32 0.1, %v4900_v45  ;;  %13882 = vmatpush3.bf16.msra.mxu0 %v16797_v62  ;;  %14140 = vmatprep.subr.bf16.mxu1 %v16708_v51  ;;  %v16883_v29 = vld [vmem:[#allocation3 + $0x3a] sm:$0xff]  ;;  %v16963_v54 = vld [vmem:[#allocation3 + $0xaa] sm:$0xff] }
 0x411   : > { %5019 = vst [vmem:[#allocation3 + $0x151] sm:$0xff] %v4939_v11  ;;  %v4925_v44 = vmul.f32 0.1, %v4895_v14  ;;  %v11970_v56 = vpop.f32.mrb[46].mxu1  ;;  %12525 = vmatprep.mubr.f32.mxu1 %v4939_v11  ;;  %13884 = vmatprep.subr.bf16.mxu0 %v16811_v4  ;;  %v16909_v11 = vld [vmem:[#allocation3 + $0x62] sm:$0xff] }
 0x412   : > { %v4942_v10 = vmax.f32 %v4900_v45, %v4926_v25  ;;  %v4910_v41 = vadd.f32 %v11970_v56, %v16722_v27  ;;  %v4904_v52 = vpop.f32.mrb[47].mxu1  ;;  %12078 = vmatmul.mubr.f32.gmra.mrb[60].mxu0 %v16822_v19  ;;  %12526 = vmatmul.mubr.f32.gmra.mrb[60].mxu1 %v4940_v61  ;;  %v5600_v61 = vld [vmem:[#allocation4 + $0x1c0] sm:$0xff]  ;;  %v5601_v45 = vld [vmem:[#allocation4 + $0x1c8] sm:$0xff]  ;;  %v5603_v25 = vld [vmem:[#allocation4 + $0x1d8] sm:$0xff] }
 0x413   : > { %v4941_v53 = vmax.f32 %v4895_v14, %v4925_v44  ;;  %v4905_v55 = vadd.f32 %v16722_v27, %v4904_v52  ;;  %14142 = vmatpush3.bf16.msra.mxu1 %v16708_v51  ;;  %12080 = vmatprep.mubr.f32.mxu0 %v16829_v13  ;;  %v16842_v51 = vld [vmem:[#allocation3 + $0xc0] sm:$0xff]  ;;  %v16917_v56 = vld [vmem:[#allocation3 + $0x128] sm:$0xff]  ;;  %v5604_v52 = vld [vmem:[#allocation4 + $0x1e0] sm:$0xff] }
 0x414   : > { %5022 = vst [vmem:[#allocation3 + $0x171] sm:$0xff] %v4942_v10  ;;  %v4928_v7 = vmul.f32 0.1, %v4910_v41  ;;  %13886 = vmatpush3.bf16.msra.mxu0 %v16811_v4  ;;  %14144 = vmatprep.subr.bf16.mxu1 %v16712_v36  ;;  %v5602_v14 = vld [vmem:[#allocation4 + $0x1d0] sm:$0xff]  ;;  %v16931_v23 = vld [vmem:[#allocation3 + $0x138] sm:$0xff] }
 0x415   : > { %5021 = vst [vmem:[#allocation3 + $0x169] sm:$0xff] %v4941_v53  ;;  %v4927_v60 = vmul.f32 0.1, %v4905_v55  ;;  %12528 = vmatprep.mubr.f32.mxu1 %v4941_v53  ;;  %13888 = vmatprep.subr.bf16.mxu0 %v16825_v1  ;;  %v16913_v44 = vld [vmem:[#allocation3 + $0x120] sm:$0xff] }
 0x416   : > { %v4944_v27 = vmax.f32 %v4910_v41, %v4928_v7  ;;  %12081 = vmatmul.mubr.f32.gmra.mrb[62].mxu0 %v16836_v26  ;;  %12529 = vmatmul.mubr.f32.gmra.mrb[62].mxu1 %v4942_v10  ;;  %v16919_v10 = vld [vmem:[#allocation3 + $0x6a] sm:$0xff]  ;;  %v16927_v41 = vld [vmem:[#allocation3 + $0x7a] sm:$0xff]  ;;  %v16945_v7 = vld [vmem:[#allocation3 + $0x92] sm:$0xff] }
 0x417   : > { %v4943_v3 = vmax.f32 %v4905_v55, %v4927_v60  ;;  %14146 = vmatpush3.bf16.msra.mxu1 %v16712_v36  ;;  %12563 = vmatprep.mubr.f32.mxu1 %v16842_v51  ;;  %v16855_v36 = vld [vmem:[#allocation3 + $0x1a] sm:$0xff]  ;;  %v16937_v55 = vld [vmem:[#allocation3 + $0x82] sm:$0xff] }
 0x418   : > { %5024 = vst [vmem:[#allocation3 + $0x189] sm:$0xff] %v4944_v27  ;;  %13890 = vmatpush3.bf16.msra.mxu0 %v16825_v1  ;;  %12115 = vmatprep.mubr.f32.mxu0 %v5381_v57  ;;  %v16935_v53 = vld [vmem:[#allocation3 + $0x140] sm:$0xff]  ;;  %v5607_v57 = vld [vmem:[#allocation4 + $0x1f8] sm:$0xff]  ;;  %v16949_v27 = vld [vmem:[#allocation3 + $0x150] sm:$0xff] }
 0x419   : > { %5023 = vst [vmem:[#allocation3 + $0x181] sm:$0xff] %v4943_v3  ;;  %14148 = vmatprep.subr.bf16.mxu1 %v16716_v24  ;;  %13892 = vmatprep.subr.bf16.mxu0 %v16839_v18  ;;  %v5606_v60 = vld [vmem:[#allocation4 + $0x1f0] sm:$0xff]  ;;  %v16953_v3 = vld [vmem:[#allocation3 + $0x158] sm:$0xff] }
 0x41a   : > { %12564 = vmatmul.mubr.f32.vlgmr.msra.gmra.mrb[48].mxu1 %v16849_v32 }
 0x41b   : > { %12116 = vmatmul.mubr.f32.vlgmr.msra.gmra.mrb[48].mxu0 %v5382_v40  ;;  %14150 = vmatpush3.bf16.msra.mxu1 %v16716_v24  ;;  %v16869_v24 = vpack.c.bf16 %v5597_v16, %v5596_v5  ;;  %v5786_v40 = vld [vmem:[#allocation4 + $0x200] sm:$0xff]  ;;  %v5787_v5 = vld [vmem:[#allocation4 + $0x208] sm:$0xff] }
 0x41c   : > { %12118 = vmatprep.mubr.f32.mxu0 %v16855_v36  ;;  %13894 = vmatpush3.bf16.msra.mxu0 %v16839_v18  ;;  %v16967_v16 = vld [vmem:[#allocation3 + $0x168] sm:$0xff] }
 0x41d   : > { %12566 = vmatprep.mubr.f32.mxu1 %v16859_v28  ;;  %14152 = vmatprep.subr.bf16.mxu1 %v16742_v63 }
 0x41e   : > { %13896 = vmatprep.subr.bf16.mxu0 %v16852_v12  ;;  %12567 = vmatmul.mubr.f32.gmra.mrb[50].mxu1 %v16863_v20 }
 0x41f   : > { %12119 = vmatmul.mubr.f32.gmra.mrb[50].mxu0 %v16865_v49  ;;  %14154 = vmatpush3.bf16.msra.mxu1 %v16742_v63  ;;  %v16887_v63 = vpack.c.bf16 %v5599_v15, %v5598_v37  ;;  %v16971_v37 = vld [vmem:[#allocation3 + $0x170] sm:$0xff] }
 0x420   : > { %12121 = vmatprep.mubr.f32.mxu0 %v16873_v50  ;;  %13898 = vmatpush3.bf16.msra.mxu0 %v16852_v12  ;;  %v16973_v15 = vld [vmem:[#allocation3 + $0xb2] sm:$0xff] }
 0x421   : > { %12569 = vmatprep.mubr.f32.mxu1 %v16877_v59  ;;  %14156 = vmatprep.subr.bf16.mxu1 %v16755_v21 }
 0x422   : > { %13900 = vmatprep.subr.bf16.mxu0 %v16869_v24  ;;  %12570 = vmatmul.mubr.f32.gmra.mrb[52].mxu1 %v16881_v17 }
 0x423   : > { %12122 = vmatmul.mubr.f32.gmra.mrb[52].mxu0 %v16883_v29  ;;  %14158 = vmatpush3.bf16.msra.mxu1 %v16755_v21  ;;  %v16905_v21 = vpack.c.bf16 %v5601_v45, %v5600_v61  ;;  %v5788_v61 = vld [vmem:[#allocation4 + $0x210] sm:$0xff]  ;;  %v5789_v45 = vld [vmem:[#allocation4 + $0x218] sm:$0xff] }
 0x424   : > { %12124 = vmatprep.mubr.f32.mxu0 %v16891_v47  ;;  %13902 = vmatpush3.bf16.msra.mxu0 %v16869_v24 }
 0x425   : > { %12572 = vmatprep.mubr.f32.mxu1 %v16895_v30  ;;  %14160 = vmatprep.subr.bf16.mxu1 %v16769_v46 }
 0x426   : > { %13904 = vmatprep.subr.bf16.mxu0 %v16887_v63  ;;  %12573 = vmatmul.mubr.f32.gmra.mrb[54].mxu1 %v16899_v2 }
 0x427   : > { %12125 = vmatmul.mubr.f32.gmra.mrb[54].mxu0 %v16901_v31  ;;  %14162 = vmatpush3.bf16.msra.mxu1 %v16769_v46  ;;  %v16923_v46 = vpack.c.bf16 %v5603_v25, %v5602_v14  ;;  %v16983_v14 = vld [vmem:[#allocation3 + $0xc2] sm:$0xff]  ;;  %v16987_v25 = vld [vmem:[#allocation3 + $0xca] sm:$0xff] }
 0x428   : > { %12127 = vmatprep.mubr.f32.mxu0 %v16909_v11  ;;  %13906 = vmatpush3.bf16.msra.mxu0 %v16887_v63 }
 0x429   : > { %12575 = vmatprep.mubr.f32.mxu1 %v16913_v44  ;;  %14164 = vmatprep.subr.bf16.mxu1 %v16783_v35 }
 0x42a   : > { %13908 = vmatprep.subr.bf16.mxu0 %v16905_v21  ;;  %12576 = vmatmul.mubr.f32.gmra.mrb[56].mxu1 %v16917_v56 }
 0x42b   : > { %12128 = vmatmul.mubr.f32.gmra.mrb[56].mxu0 %v16919_v10  ;;  %14166 = vmatpush3.bf16.msra.mxu1 %v16783_v35  ;;  %v16941_v35 = vpack.c.bf16 %v5605_v34, %v5604_v52  ;;  %v16991_v52 = vpack.c.bf16 %v5789_v45, %v5788_v61  ;;  %v16997_v34 = vld [vmem:[#allocation3 + $0xda] sm:$0xff]  ;;  %v17029_v61 = vld [vmem:[#allocation3 + $0x112] sm:$0xff]  ;;  %v17039_v45 = vld [vmem:[#allocation3 + $0x122] sm:$0xff] }
 0x42c   : > { %12130 = vmatprep.mubr.f32.mxu0 %v16927_v41  ;;  %13910 = vmatpush3.bf16.msra.mxu0 %v16905_v21 }
 0x42d   : > { %12578 = vmatprep.mubr.f32.mxu1 %v16931_v23  ;;  %14168 = vmatprep.subr.bf16.mxu1 %v16797_v62 }
 0x42e   : > { %13912 = vmatprep.subr.bf16.mxu0 %v16923_v46  ;;  %12579 = vmatmul.mubr.f32.gmra.mrb[58].mxu1 %v16935_v53 }
 0x42f   : > { %12131 = vmatmul.mubr.f32.gmra.mrb[58].mxu0 %v16937_v55  ;;  %14170 = vmatpush3.bf16.msra.mxu1 %v16797_v62  ;;  %v16959_v62 = vpack.c.bf16 %v5607_v57, %v5606_v60  ;;  %v17001_v60 = vld [vmem:[#allocation3 + $0xe2] sm:$0xff]  ;;  %v17011_v57 = vld [vmem:[#allocation3 + $0xf2] sm:$0xff] }
 0x430   : > { %12133 = vmatprep.mubr.f32.mxu0 %v16945_v7  ;;  %13914 = vmatpush3.bf16.msra.mxu0 %v16923_v46 }
 0x431   : > { %12581 = vmatprep.mubr.f32.mxu1 %v16949_v27  ;;  %14172 = vmatprep.subr.bf16.mxu1 %v16811_v4 }
 0x432   : > { %13916 = vmatprep.subr.bf16.mxu0 %v16941_v35  ;;  %12582 = vmatmul.mubr.f32.gmra.mrb[60].mxu1 %v16953_v3 }
 0x433   : > { %12134 = vmatmul.mubr.f32.gmra.mrb[60].mxu0 %v16955_v8  ;;  %14174 = vmatpush3.bf16.msra.mxu1 %v16811_v4  ;;  %v16977_v4 = vpack.c.bf16 %v5787_v5, %v5786_v40  ;;  %v17015_v40 = vld [vmem:[#allocation3 + $0xfa] sm:$0xff]  ;;  %v17025_v5 = vld [vmem:[#allocation3 + $0x10a] sm:$0xff] }
 0x434   : > { %12136 = vmatprep.mubr.f32.mxu0 %v16963_v54  ;;  %13918 = vmatpush3.bf16.msra.mxu0 %v16941_v35 }
 0x435   : > { %12584 = vmatprep.mubr.f32.mxu1 %v16967_v16  ;;  %14176 = vmatprep.subr.bf16.mxu1 %v16825_v1 }
 0x436   : > { %13920 = vmatprep.subr.bf16.mxu0 %v16959_v62  ;;  %12585 = vmatmul.mubr.f32.gmra.mrb[62].mxu1 %v16971_v37 }
 0x437   : > { %12137 = vmatmul.mubr.f32.gmra.mrb[62].mxu0 %v16973_v15  ;;  %14178 = vmatpush3.bf16.msra.mxu1 %v16825_v1  ;;  %v5790_v1 = vld [vmem:[#allocation4 + $0x220] sm:$0xff] }
 0x438   : > { %13922 = vmatpush3.bf16.msra.mxu0 %v16959_v62  ;;  %12171 = vmatprep.mubr.f32.mxu0 %v16745_v9  ;;  %v5791_v9 = vld [vmem:[#allocation4 + $0x228] sm:$0xff] }
 0x439   : > { %12619 = vmatprep.mubr.f32.mxu1 %v16983_v14  ;;  %14180 = vmatprep.subr.bf16.mxu1 %v16839_v18 }
 0x43a   : > { %13924 = vmatprep.subr.bf16.mxu0 %v16977_v4  ;;  %12620 = vmatmul.mubr.f32.vlgmr.msra.gmra.mrb[48].mxu1 %v16987_v25 }
 0x43b   : > { %12172 = vmatmul.mubr.f32.vlgmr.msra.gmra.mrb[48].mxu0 %v16752_v33  ;;  %14182 = vmatpush3.bf16.msra.mxu1 %v16839_v18  ;;  %v17005_v33 = vpack.c.bf16 %v5791_v9, %v5790_v1  ;;  %v5793_v18 = vld [vmem:[#allocation4 + $0x238] sm:$0xff]  ;;  %v17053_v9 = vld [vmem:[#allocation3 + $0x13a] sm:$0xff] }
 0x43c   : > { %12174 = vmatprep.mubr.f32.mxu0 %v16759_v22  ;;  %13926 = vmatpush3.bf16.msra.mxu0 %v16977_v4  ;;  %v5792_v22 = vld [vmem:[#allocation4 + $0x230] sm:$0xff]  ;;  %v17043_v1 = vld [vmem:[#allocation3 + $0x12a] sm:$0xff] }
 0x43d   : > { %12622 = vmatprep.mubr.f32.mxu1 %v16997_v34  ;;  %14184 = vmatprep.subr.bf16.mxu1 %v16852_v12 }
 0x43e   : > { %13928 = vmatprep.subr.bf16.mxu0 %v16991_v52  ;;  %12623 = vmatmul.mubr.f32.gmra.mrb[50].mxu1 %v17001_v60 }
 0x43f   : > { %12175 = vmatmul.mubr.f32.gmra.mrb[50].mxu0 %v16766_v48  ;;  %14186 = vmatpush3.bf16.msra.mxu1 %v16852_v12  ;;  %v17019_v48 = vpack.c.bf16 %v5793_v18, %v5792_v22  ;;  %v5795_v12 = vld [vmem:[#allocation4 + $0x248] sm:$0xff]  ;;  %v17057_v22 = vld [vmem:[#allocation3 + $0x142] sm:$0xff] }
 0x440   : > { %12177 = vmatprep.mubr.f32.mxu0 %v16773_v58  ;;  %13930 = vmatpush3.bf16.msra.mxu0 %v16991_v52  ;;  %v5794_v58 = vld [vmem:[#allocation4 + $0x240] sm:$0xff] }
 0x441   : > { %12625 = vmatprep.mubr.f32.mxu1 %v17011_v57  ;;  %14188 = vmatprep.subr.bf16.mxu1 %v16869_v24  ;;  %v17067_v18 = vld [vmem:[#allocation3 + $0x152] sm:$0xff] }
 0x442   : > { %13932 = vmatprep.subr.bf16.mxu0 %v17005_v33  ;;  %12626 = vmatmul.mubr.f32.gmra.mrb[52].mxu1 %v17015_v40 }
 0x443   : > { %12178 = vmatmul.mubr.f32.gmra.mrb[52].mxu0 %v16780_v43  ;;  %14190 = vmatpush3.bf16.msra.mxu1 %v16869_v24  ;;  %v17033_v43 = vpack.c.bf16 %v5795_v12, %v5794_v58  ;;  %v5797_v24 = vld [vmem:[#allocation4 + $0x258] sm:$0xff]  ;;  %v17071_v58 = vld [vmem:[#allocation3 + $0x15a] sm:$0xff] }
 0x444   : > { %12180 = vmatprep.mubr.f32.mxu0 %v16787_v39  ;;  %13934 = vmatpush3.bf16.msra.mxu0 %v17005_v33  ;;  %v5796_v39 = vld [vmem:[#allocation4 + $0x250] sm:$0xff]  ;;  %v17081_v12 = vld [vmem:[#allocation3 + $0x16a] sm:$0xff] }
 0x445   : > { %12628 = vmatprep.mubr.f32.mxu1 %v17025_v5  ;;  %14192 = vmatprep.subr.bf16.mxu1 %v16887_v63 }
 0x446   : > { %13936 = vmatprep.subr.bf16.mxu0 %v17019_v48  ;;  %12629 = vmatmul.mubr.f32.gmra.mrb[54].mxu1 %v17029_v61 }
 0x447   : > { %12181 = vmatmul.mubr.f32.gmra.mrb[54].mxu0 %v16794_v38  ;;  %14194 = vmatpush3.bf16.msra.mxu1 %v16887_v63  ;;  %v17047_v38 = vpack.c.bf16 %v5797_v24, %v5796_v39  ;;  %v5799_v63 = vld [vmem:[#allocation4 + $0x268] sm:$0xff]  ;;  %v5983_v24 = vld [vmem:[#allocation4 + $0x298] sm:$0xff] }
 0x448   : > { %12183 = vmatprep.mubr.f32.mxu0 %v16801_v42  ;;  %13938 = vmatpush3.bf16.msra.mxu0 %v17019_v48  ;;  %v5798_v42 = vld [vmem:[#allocation4 + $0x260] sm:$0xff] }
 0x449   : > { %12631 = vmatprep.mubr.f32.mxu1 %v17039_v45  ;;  %14196 = vmatprep.subr.bf16.mxu1 %v16905_v21  ;;  %v17085_v39 = vld [vmem:[#allocation3 + $0x172] sm:$0xff] }
 0x44a   : > { %13940 = vmatprep.subr.bf16.mxu0 %v17033_v43  ;;  %12632 = vmatmul.mubr.f32.gmra.mrb[56].mxu1 %v17043_v1 }
 0x44b   : > { %12184 = vmatmul.mubr.f32.gmra.mrb[56].mxu0 %v16808_v0  ;;  %14198 = vmatpush3.bf16.msra.mxu1 %v16905_v21  ;;  %v17061_v0 = vpack.c.bf16 %v5799_v63, %v5798_v42  ;;  %v5801_v21 = vld [vmem:[#allocation4 + $0x278] sm:$0xff] }
 0x44c   : > { %12186 = vmatprep.mubr.f32.mxu0 %v16815_v6  ;;  %13942 = vmatpush3.bf16.msra.mxu0 %v17033_v43  ;;  %v5800_v6 = vld [vmem:[#allocation4 + $0x270] sm:$0xff] }
 0x44d   : > { %12634 = vmatprep.mubr.f32.mxu1 %v17053_v9  ;;  %14200 = vmatprep.subr.bf16.mxu1 %v16923_v46  ;;  %v5770_v42 = vld [vmem:[#allocation3 + $0x21] sm:$0xff] }
 0x44e   : > { %13944 = vmatprep.subr.bf16.mxu0 %v17047_v38  ;;  %12635 = vmatmul.mubr.f32.gmra.mrb[58].mxu1 %v17057_v22 }
 0x44f   : > { %12187 = vmatmul.mubr.f32.gmra.mrb[58].mxu0 %v16822_v19  ;;  %14202 = vmatpush3.bf16.msra.mxu1 %v16923_v46  ;;  %v17075_v19 = vpack.c.bf16 %v5801_v21, %v5800_v6  ;;  %v5981_v46 = vld [vmem:[#allocation4 + $0x288] sm:$0xff]  ;;  %v5986_v21 = vld [vmem:[#allocation4 + $0x2b0] sm:$0xff] }
 0x450   : > { %12189 = vmatprep.mubr.f32.mxu0 %v16829_v13  ;;  %13946 = vmatpush3.bf16.msra.mxu0 %v17047_v38  ;;  %v5980_v13 = vld [vmem:[#allocation4 + $0x280] sm:$0xff]  ;;  %v5985_v6 = vld [vmem:[#allocation4 + $0x2a8] sm:$0xff] }
 0x451   : > { %12637 = vmatprep.mubr.f32.mxu1 %v17067_v18  ;;  %14204 = vmatprep.subr.bf16.mxu1 %v16941_v35 }
 0x452   : > { %13948 = vmatprep.subr.bf16.mxu0 %v17061_v0  ;;  %12638 = vmatmul.mubr.f32.gmra.mrb[60].mxu1 %v17071_v58 }
 0x453   : > { %12190 = vmatmul.mubr.f32.gmra.mrb[60].mxu0 %v16836_v26  ;;  %14206 = vmatpush3.bf16.msra.mxu1 %v16941_v35  ;;  %v17089_v26 = vpack.c.bf16 %v5981_v46, %v5980_v13  ;;  %v5982_v35 = vld [vmem:[#allocation4 + $0x290] sm:$0xff]  ;;  %v5987_v13 = vld [vmem:[#allocation4 + $0x2b8] sm:$0xff]  ;;  %v5988_v46 = vld [vmem:[#allocation4 + $0x2c0] sm:$0xff] }
 0x454   : > { %12192 = vmatprep.mubr.f32.mxu0 %v16842_v51  ;;  %13950 = vmatpush3.bf16.msra.mxu0 %v17061_v0  ;;  %v5769_v51 = vld [vmem:[#allocation3 + $0x19] sm:$0xff]  ;;  %v17098_v63 = vpack.c.bf16 %v5983_v24, %v5982_v35  ;;  %v5991_v24 = vld [vmem:[#allocation4 + $0x2d8] sm:$0xff] }
 0x455   : > { %12640 = vmatprep.mubr.f32.mxu1 %v17081_v12  ;;  %14208 = vmatprep.subr.bf16.mxu1 %v16959_v62  ;;  %v5990_v35 = vld [vmem:[#allocation4 + $0x2d0] sm:$0xff] }
 0x456   : > { %13952 = vmatprep.subr.bf16.mxu0 %v17075_v19  ;;  %12641 = vmatmul.mubr.f32.gmra.mrb[62].mxu1 %v17085_v39 }
 0x457   : > { %12193 = vmatmul.mubr.f32.gmra.mrb[62].mxu0 %v16849_v32  ;;  %14210 = vmatpush3.bf16.msra.mxu1 %v16959_v62  ;;  %v17101_v32 = vld [vmem:[#allocation3 + $0x31] sm:$0xff] }
 0x458   : > { %13954 = vmatpush3.bf16.msra.mxu0 %v17075_v19  ;;  %12227 = vmatprep.mubr.f32.mxu0 %v5769_v51  ;;  %v5984_v62 = vld [vmem:[#allocation4 + $0x2a0] sm:$0xff]  ;;  %v5989_v51 = vld [vmem:[#allocation4 + $0x2c8] sm:$0xff] }
 0x459   : > { %12675 = vmatprep.mubr.f32.mxu1 %v16859_v28  ;;  %14212 = vmatprep.subr.bf16.mxu1 %v16977_v4  ;;  %v17107_v28 = vld [vmem:[#allocation3 + $0x39] sm:$0xff] }
 0x45a   : > { %13956 = vmatprep.subr.bf16.mxu0 %v17089_v26  ;;  %12676 = vmatmul.mubr.f32.vlgmr.msra.gmra.mrb[48].mxu1 %v16863_v20  ;;  %v17111_v20 = vpack.c.bf16 %v5985_v6, %v5984_v62  ;;  %v5993_v62 = vld [vmem:[#allocation4 + $0x2e8] sm:$0xff]  ;;  %v5994_v6 = vld [vmem:[#allocation4 + $0x2f0] sm:$0xff] }
 0x45b   : > { %12228 = vmatmul.mubr.f32.vlgmr.msra.gmra.mrb[48].mxu0 %v5770_v42  ;;  %14214 = vmatpush3.bf16.msra.mxu1 %v16977_v4  ;;  %v17115_v4 = vld [vmem:[#allocation3 + $0x49] sm:$0xff] }
 0x45c   : > { %12230 = vmatprep.mubr.f32.mxu0 %v17101_v32  ;;  %13958 = vmatpush3.bf16.msra.mxu0 %v17089_v26  ;;  %v5992_v42 = vld [vmem:[#allocation4 + $0x2e0] sm:$0xff] }
 0x45d   : > { %12678 = vmatprep.mubr.f32.mxu1 %v16877_v59  ;;  %14216 = vmatprep.subr.bf16.mxu1 %v16991_v52  ;;  %v17121_v59 = vld [vmem:[#allocation3 + $0x51] sm:$0xff] }
 0x45e   : > { %13960 = vmatprep.subr.bf16.mxu0 %v17098_v63  ;;  %12679 = vmatmul.mubr.f32.gmra.mrb[50].mxu1 %v16881_v17  ;;  %v17125_v17 = vpack.c.bf16 %v5987_v13, %v5986_v21  ;;  %v5995_v21 = vld [vmem:[#allocation4 + $0x2f8] sm:$0xff]  ;;  %v6174_v13 = vld [vmem:[#allocation4 + $0x300] sm:$0xff] }
 0x45f   : > { %12231 = vmatmul.mubr.f32.gmra.mrb[50].mxu0 %v17107_v28  ;;  %14218 = vmatpush3.bf16.msra.mxu1 %v16991_v52  ;;  %v17129_v52 = vld [vmem:[#allocation3 + $0x61] sm:$0xff] }
 0x460   : > { %12233 = vmatprep.mubr.f32.mxu0 %v17115_v4  ;;  %13962 = vmatpush3.bf16.msra.mxu0 %v17098_v63 }
 0x461   : > { %12681 = vmatprep.mubr.f32.mxu1 %v16895_v30  ;;  %14220 = vmatprep.subr.bf16.mxu1 %v17005_v33  ;;  %v17135_v30 = vld [vmem:[#allocation3 + $0x69] sm:$0xff] }
 0x462   : > { %13964 = vmatprep.subr.bf16.mxu0 %v17111_v20  ;;  %12682 = vmatmul.mubr.f32.gmra.mrb[52].mxu1 %v16899_v2  ;;  %v17139_v2 = vpack.c.bf16 %v5989_v51, %v5988_v46  ;;  %v6175_v46 = vld [vmem:[#allocation4 + $0x308] sm:$0xff]  ;;  %v17195_v51 = vld [vmem:[#allocation3 + $0xc9] sm:$0xff] }
 0x463   : > { %12234 = vmatmul.mubr.f32.gmra.mrb[52].mxu0 %v17121_v59  ;;  %14222 = vmatpush3.bf16.msra.mxu1 %v17005_v33  ;;  %v17143_v33 = vld [vmem:[#allocation3 + $0x79] sm:$0xff] }
 0x464   : > { %12236 = vmatprep.mubr.f32.mxu0 %v17129_v52  ;;  %13966 = vmatpush3.bf16.msra.mxu0 %v17111_v20 }
 0x465   : > { %12684 = vmatprep.mubr.f32.mxu1 %v16913_v44  ;;  %14224 = vmatprep.subr.bf16.mxu1 %v17019_v48  ;;  %v17149_v44 = vld [vmem:[#allocation3 + $0x81] sm:$0xff] }
 0x466   : > { %13968 = vmatprep.subr.bf16.mxu0 %v17125_v17  ;;  %12685 = vmatmul.mubr.f32.gmra.mrb[54].mxu1 %v16917_v56  ;;  %v17153_v56 = vpack.c.bf16 %v5991_v24, %v5990_v35  ;;  %v6176_v35 = vld [vmem:[#allocation4 + $0x310] sm:$0xff]  ;;  %v6177_v24 = vld [vmem:[#allocation4 + $0x318] sm:$0xff] }
 0x467   : > { %12237 = vmatmul.mubr.f32.gmra.mrb[54].mxu0 %v17135_v30  ;;  %14226 = vmatpush3.bf16.msra.mxu1 %v17019_v48  ;;  %v17157_v48 = vld [vmem:[#allocation3 + $0x91] sm:$0xff] }
 0x468   : > { %12239 = vmatprep.mubr.f32.mxu0 %v17143_v33  ;;  %13970 = vmatpush3.bf16.msra.mxu0 %v17125_v17 }
 0x469   : > { %12687 = vmatprep.mubr.f32.mxu1 %v16931_v23  ;;  %14228 = vmatprep.subr.bf16.mxu1 %v17033_v43  ;;  %v17163_v23 = vld [vmem:[#allocation3 + $0x99] sm:$0xff] }
 0x46a   : > { %13972 = vmatprep.subr.bf16.mxu0 %v17139_v2  ;;  %12688 = vmatmul.mubr.f32.gmra.mrb[56].mxu1 %v16935_v53  ;;  %v17167_v53 = vpack.c.bf16 %v5993_v62, %v5992_v42  ;;  %v17205_v42 = vld [vmem:[#allocation3 + $0xd9] sm:$0xff]  ;;  %v17209_v62 = vld [vmem:[#allocation3 + $0xe1] sm:$0xff] }
 0x46b   : > { %12240 = vmatmul.mubr.f32.gmra.mrb[56].mxu0 %v17149_v44  ;;  %14230 = vmatpush3.bf16.msra.mxu1 %v17033_v43  ;;  %v17171_v43 = vld [vmem:[#allocation3 + $0xa9] sm:$0xff] }
 0x46c   : > { %12242 = vmatprep.mubr.f32.mxu0 %v17157_v48  ;;  %13974 = vmatpush3.bf16.msra.mxu0 %v17139_v2 }
 0x46d   : > { %12690 = vmatprep.mubr.f32.mxu1 %v16949_v27  ;;  %14232 = vmatprep.subr.bf16.mxu1 %v17047_v38  ;;  %v17177_v27 = vld [vmem:[#allocation3 + $0xb1] sm:$0xff] }
 0x46e   : > { %13976 = vmatprep.subr.bf16.mxu0 %v17153_v56  ;;  %12691 = vmatmul.mubr.f32.gmra.mrb[58].mxu1 %v16953_v3  ;;  %v17181_v3 = vpack.c.bf16 %v5995_v21, %v5994_v6  ;;  %v17213_v6 = vpack.c.bf16 %v6177_v24, %v6176_v35  ;;  %v17219_v21 = vld [vmem:[#allocation3 + $0xf1] sm:$0xff]  ;;  %v17247_v24 = vld [vmem:[#allocation3 + $0x121] sm:$0xff] }
 0x46f   : > { %12243 = vmatmul.mubr.f32.gmra.mrb[58].mxu0 %v17163_v23  ;;  %14234 = vmatpush3.bf16.msra.mxu1 %v17047_v38  ;;  %v17185_v38 = vld [vmem:[#allocation3 + $0xc1] sm:$0xff]  ;;  %v17237_v35 = vld [vmem:[#allocation3 + $0x111] sm:$0xff] }
 0x470   : > { %12245 = vmatprep.mubr.f32.mxu0 %v17171_v43  ;;  %13978 = vmatpush3.bf16.msra.mxu0 %v17153_v56 }
 0x471   : > { %12693 = vmatprep.mubr.f32.mxu1 %v16967_v16  ;;  %14236 = vmatprep.subr.bf16.mxu1 %v17061_v0  ;;  %v17189_v16 = vld [vmem:[#allocation3 + $0x180] sm:$0xff] }
 0x472   : > { %13980 = vmatprep.subr.bf16.mxu0 %v17167_v53  ;;  %12694 = vmatmul.mubr.f32.gmra.mrb[60].mxu1 %v16971_v37  ;;  %v17193_v37 = vld [vmem:[#allocation3 + $0x188] sm:$0xff] }
 0x473   : > { %12246 = vmatmul.mubr.f32.gmra.mrb[60].mxu0 %v17177_v27  ;;  %14238 = vmatpush3.bf16.msra.mxu1 %v17061_v0  ;;  %v17199_v0 = vpack.c.bf16 %v6175_v46, %v6174_v13  ;;  %v17223_v13 = vld [vmem:[#allocation3 + $0xf9] sm:$0xff]  ;;  %v17233_v46 = vld [vmem:[#allocation3 + $0x109] sm:$0xff] }
 0x474   : > { %12248 = vmatprep.mubr.f32.mxu0 %v17185_v38  ;;  %13982 = vmatpush3.bf16.msra.mxu0 %v17167_v53 }
 0x475   : > { %12696 = vmatprep.mubr.f32.mxu1 %v17189_v16  ;;  %14240 = vmatprep.subr.bf16.mxu1 %v17075_v19 }
 0x476   : > { %13984 = vmatprep.subr.bf16.mxu0 %v17181_v3  ;;  %12697 = vmatmul.mubr.f32.gmra.mrb[62].mxu1 %v17193_v37 }
 0x477   : > { %12249 = vmatmul.mubr.f32.gmra.mrb[62].mxu0 %v17195_v51  ;;  %14242 = vmatpush3.bf16.msra.mxu1 %v17075_v19  ;;  %v6178_v19 = vld [vmem:[#allocation4 + $0x320] sm:$0xff] }
 0x478   : > { %13986 = vmatpush3.bf16.msra.mxu0 %v17181_v3  ;;  %12283 = vmatprep.mubr.f32.mxu0 %v16855_v36  ;;  %v6179_v36 = vld [vmem:[#allocation4 + $0x328] sm:$0xff] }
 0x479   : > { %12731 = vmatprep.mubr.f32.mxu1 %v17205_v42  ;;  %14244 = vmatprep.subr.bf16.mxu1 %v17089_v26 }
 0x47a   : > { %13988 = vmatprep.subr.bf16.mxu0 %v17199_v0  ;;  %12732 = vmatmul.mubr.f32.vlgmr.msra.gmra.mrb[48].mxu1 %v17209_v62 }
 0x47b   : > { %12284 = vmatmul.mubr.f32.vlgmr.msra.gmra.mrb[48].mxu0 %v16865_v49  ;;  %14246 = vmatpush3.bf16.msra.mxu1 %v17089_v26  ;;  %v17227_v49 = vpack.c.bf16 %v6179_v36, %v6178_v19  ;;  %v6181_v26 = vld [vmem:[#allocation4 + $0x338] sm:$0xff]  ;;  %v17261_v36 = vld [vmem:[#allocation3 + $0x139] sm:$0xff] }
 0x47c   : > { %12286 = vmatprep.mubr.f32.mxu0 %v16873_v50  ;;  %13990 = vmatpush3.bf16.msra.mxu0 %v17199_v0  ;;  %v6180_v50 = vld [vmem:[#allocation4 + $0x330] sm:$0xff]  ;;  %v17251_v19 = vld [vmem:[#allocation3 + $0x129] sm:$0xff] }
 0x47d   : > { %12734 = vmatprep.mubr.f32.mxu1 %v17219_v21  ;;  %14248 = vmatprep.subr.bf16.mxu1 %v17098_v63 }
 0x47e   : > { %13992 = vmatprep.subr.bf16.mxu0 %v17213_v6  ;;  %12735 = vmatmul.mubr.f32.gmra.mrb[50].mxu1 %v17223_v13 }
 0x47f   : > { %12287 = vmatmul.mubr.f32.gmra.mrb[50].mxu0 %v16883_v29  ;;  %14250 = vmatpush3.bf16.msra.mxu1 %v17098_v63  ;;  %v17241_v29 = vpack.c.bf16 %v6181_v26, %v6180_v50  ;;  %v6183_v63 = vld [vmem:[#allocation4 + $0x348] sm:$0xff]  ;;  %v17265_v50 = vld [vmem:[#allocation3 + $0x141] sm:$0xff] }
 0x480   : > { %12289 = vmatprep.mubr.f32.mxu0 %v16891_v47  ;;  %13994 = vmatpush3.bf16.msra.mxu0 %v17213_v6  ;;  %v6182_v47 = vld [vmem:[#allocation4 + $0x340] sm:$0xff] }
 0x481   : > { %12737 = vmatprep.mubr.f32.mxu1 %v17233_v46  ;;  %14252 = vmatprep.subr.bf16.mxu1 %v17111_v20  ;;  %v17275_v26 = vld [vmem:[#allocation3 + $0x151] sm:$0xff] }
 0x482   : > { %13996 = vmatprep.subr.bf16.mxu0 %v17227_v49  ;;  %12738 = vmatmul.mubr.f32.gmra.mrb[52].mxu1 %v17237_v35 }
 0x483   : > { %12290 = vmatmul.mubr.f32.gmra.mrb[52].mxu0 %v16901_v31  ;;  %14254 = vmatpush3.bf16.msra.mxu1 %v17111_v20  ;;  %v17255_v31 = vpack.c.bf16 %v6183_v63, %v6182_v47  ;;  %v6185_v20 = vld [vmem:[#allocation4 + $0x358] sm:$0xff]  ;;  %v17279_v47 = vld [vmem:[#allocation3 + $0x159] sm:$0xff] }
 0x484   : > { %12292 = vmatprep.mubr.f32.mxu0 %v16909_v11  ;;  %13998 = vmatpush3.bf16.msra.mxu0 %v17227_v49  ;;  %v6184_v11 = vld [vmem:[#allocation4 + $0x350] sm:$0xff]  ;;  %v17289_v63 = vld [vmem:[#allocation3 + $0x169] sm:$0xff] }
 0x485   : > { %12740 = vmatprep.mubr.f32.mxu1 %v17247_v24  ;;  %14256 = vmatprep.subr.bf16.mxu1 %v17125_v17 }
 0x486   : > { %14000 = vmatprep.subr.bf16.mxu0 %v17241_v29  ;;  %12741 = vmatmul.mubr.f32.gmra.mrb[54].mxu1 %v17251_v19 }
 0x487   : > { %12293 = vmatmul.mubr.f32.gmra.mrb[54].mxu0 %v16919_v10  ;;  %14258 = vmatpush3.bf16.msra.mxu1 %v17125_v17  ;;  %v17269_v10 = vpack.c.bf16 %v6185_v20, %v6184_v11  ;;  %v6187_v17 = vld [vmem:[#allocation4 + $0x368] sm:$0xff]  ;;  %v17303_v20 = vld [vmem:[#allocation3 + $0x181] sm:$0xff] }
 0x488   : > { %12295 = vmatprep.mubr.f32.mxu0 %v16927_v41  ;;  %14002 = vmatpush3.bf16.msra.mxu0 %v17241_v29  ;;  %v6186_v41 = vld [vmem:[#allocation4 + $0x360] sm:$0xff] }
 0x489   : > { %12743 = vmatprep.mubr.f32.mxu1 %v17261_v36  ;;  %14260 = vmatprep.subr.bf16.mxu1 %v17139_v2  ;;  %v17293_v11 = vld [vmem:[#allocation3 + $0x171] sm:$0xff] }
 0x48a   : > { %14004 = vmatprep.subr.bf16.mxu0 %v17255_v31  ;;  %12744 = vmatmul.mubr.f32.gmra.mrb[56].mxu1 %v17265_v50 }
 0x48b   : > { %12296 = vmatmul.mubr.f32.gmra.mrb[56].mxu0 %v16937_v55  ;;  %14262 = vmatpush3.bf16.msra.mxu1 %v17139_v2  ;;  %v17283_v55 = vpack.c.bf16 %v6187_v17, %v6186_v41  ;;  %v6189_v2 = vld [vmem:[#allocation4 + $0x378] sm:$0xff] }
 0x48c   : > { %12298 = vmatprep.mubr.f32.mxu0 %v16945_v7  ;;  %14006 = vmatpush3.bf16.msra.mxu0 %v17255_v31  ;;  %v6188_v7 = vld [vmem:[#allocation4 + $0x370] sm:$0xff]  ;;  %v17307_v41 = vld [vmem:[#allocation3 + $0x189] sm:$0xff] }
 0x48d   : > { %12746 = vmatprep.mubr.f32.mxu1 %v17275_v26  ;;  %14264 = vmatprep.subr.bf16.mxu1 %v17153_v56  ;;  %v6371_v17 = vld [vmem:[#allocation4 + $0x398] sm:$0xff] }
 0x48e   : > { %14008 = vmatprep.subr.bf16.mxu0 %v17269_v10  ;;  %12747 = vmatmul.mubr.f32.gmra.mrb[58].mxu1 %v17279_v47 }
 0x48f   : > { %12299 = vmatmul.mubr.f32.gmra.mrb[58].mxu0 %v16955_v8  ;;  %14266 = vmatpush3.bf16.msra.mxu1 %v17153_v56  ;;  %v17297_v8 = vpack.c.bf16 %v6189_v2, %v6188_v7  ;;  %v6369_v56 = vld [vmem:[#allocation4 + $0x388] sm:$0xff] }
 0x490   : > { %12301 = vmatprep.mubr.f32.mxu0 %v16963_v54  ;;  %14010 = vmatpush3.bf16.msra.mxu0 %v17269_v10  ;;  %v6368_v54 = vld [vmem:[#allocation4 + $0x380] sm:$0xff]  ;;  %v6158_v7 = vld [vmem:[#allocation3 + $0x38] sm:$0xff] }
 0x491   : > { %12749 = vmatprep.mubr.f32.mxu1 %v17289_v63  ;;  %14268 = vmatprep.subr.bf16.mxu1 %v17167_v53 }
 0x492   : > { %14012 = vmatprep.subr.bf16.mxu0 %v17283_v55  ;;  %12750 = vmatmul.mubr.f32.gmra.mrb[60].mxu1 %v17293_v11 }
 0x493   : > { %12302 = vmatmul.mubr.f32.gmra.mrb[60].mxu0 %v16973_v15  ;;  %14270 = vmatpush3.bf16.msra.mxu1 %v17167_v53  ;;  %v17311_v15 = vpack.c.bf16 %v6369_v56, %v6368_v54  ;;  %v6370_v53 = vld [vmem:[#allocation4 + $0x390] sm:$0xff]  ;;  %v6373_v54 = vld [vmem:[#allocation4 + $0x3a8] sm:$0xff] }
 0x494   : > { %12304 = vmatprep.mubr.f32.mxu0 %v16983_v14  ;;  %14014 = vmatpush3.bf16.msra.mxu0 %v17283_v55  ;;  %v6157_v14 = vld [vmem:[#allocation3 + $0x30] sm:$0xff]  ;;  %v17320_v2 = vpack.c.bf16 %v6371_v17, %v6370_v53  ;;  %v6374_v56 = vld [vmem:[#allocation4 + $0x3b0] sm:$0xff]  ;;  %v6377_v17 = vld [vmem:[#allocation4 + $0x3c8] sm:$0xff] }
 0x495   : > { %12752 = vmatprep.mubr.f32.mxu1 %v17303_v20  ;;  %14272 = vmatprep.subr.bf16.mxu1 %v17181_v3  ;;  %v6376_v53 = vld [vmem:[#allocation4 + $0x3c0] sm:$0xff] }
 0x496   : > { %14016 = vmatprep.subr.bf16.mxu0 %v17297_v8  ;;  %12753 = vmatmul.mubr.f32.gmra.mrb[62].mxu1 %v17307_v41 }
 0x497   : > { %12305 = vmatmul.mubr.f32.gmra.mrb[62].mxu0 %v16987_v25  ;;  %14274 = vmatpush3.bf16.msra.mxu1 %v17181_v3  ;;  %v6159_v25 = vld [vmem:[#allocation3 + $0x48] sm:$0xff]  ;;  %v6372_v3 = vld [vmem:[#allocation4 + $0x3a0] sm:$0xff] }
 0x498   : > { %14018 = vmatpush3.bf16.msra.mxu0 %v17297_v8  ;;  %12339 = vmatprep.mubr.f32.mxu0 %v6157_v14  ;;  %v6375_v14 = vld [vmem:[#allocation4 + $0x3b8] sm:$0xff] }
 0x499   : > { %12787 = vmatprep.mubr.f32.mxu1 %v16997_v34  ;;  %14276 = vmatprep.subr.bf16.mxu1 %v17199_v0  ;;  %v6160_v34 = vld [vmem:[#allocation3 + $0x50] sm:$0xff] }
 0x49a   : > { %14020 = vmatprep.subr.bf16.mxu0 %v17311_v15  ;;  %12788 = vmatmul.mubr.f32.vlgmr.msra.gmra.mrb[48].mxu1 %v17001_v60  ;;  %v17328_v60 = vpack.c.bf16 %v6373_v54, %v6372_v3  ;;  %v6380_v3 = vld [vmem:[#allocation4 + $0x3e0] sm:$0xff]  ;;  %v6381_v54 = vld [vmem:[#allocation4 + $0x3e8] sm:$0xff] }
 0x49b   : > { %12340 = vmatmul.mubr.f32.vlgmr.msra.gmra.mrb[48].mxu0 %v6158_v7  ;;  %14278 = vmatpush3.bf16.msra.mxu1 %v17199_v0  ;;  %v6161_v0 = vld [vmem:[#allocation3 + $0x60] sm:$0xff] }
 0x49c   : > { %12342 = vmatprep.mubr.f32.mxu0 %v6159_v25  ;;  %14022 = vmatpush3.bf16.msra.mxu0 %v17311_v15  ;;  %v6378_v7 = vld [vmem:[#allocation4 + $0x3d0] sm:$0xff]  ;;  %v6379_v25 = vld [vmem:[#allocation4 + $0x3d8] sm:$0xff] }
 0x49d   : > { %12790 = vmatprep.mubr.f32.mxu1 %v17011_v57  ;;  %14280 = vmatprep.subr.bf16.mxu1 %v17213_v6  ;;  %v6162_v57 = vld [vmem:[#allocation3 + $0x68] sm:$0xff] }
 0x49e   : > { %14024 = vmatprep.subr.bf16.mxu0 %v17320_v2  ;;  %12791 = vmatmul.mubr.f32.gmra.mrb[50].mxu1 %v17015_v40  ;;  %v17336_v40 = vpack.c.bf16 %v6375_v14, %v6374_v56  ;;  %v6562_v56 = vld [vmem:[#allocation4 + $0x400] sm:$0xff]  ;;  %v6563_v14 = vld [vmem:[#allocation4 + $0x408] sm:$0xff] }
 0x49f   : > { %12343 = vmatmul.mubr.f32.gmra.mrb[50].mxu0 %v6160_v34  ;;  %14282 = vmatpush3.bf16.msra.mxu1 %v17213_v6  ;;  %v6163_v6 = vld [vmem:[#allocation3 + $0x78] sm:$0xff]  ;;  %v6382_v34 = vld [vmem:[#allocation4 + $0x3f0] sm:$0xff] }
 0x4a0   : > { %12345 = vmatprep.mubr.f32.mxu0 %v6161_v0  ;;  %14026 = vmatpush3.bf16.msra.mxu0 %v17320_v2  ;;  %v6383_v0 = vld [vmem:[#allocation4 + $0x3f8] sm:$0xff] }
 0x4a1   : > { %12793 = vmatprep.mubr.f32.mxu1 %v17025_v5  ;;  %14284 = vmatprep.subr.bf16.mxu1 %v17227_v49  ;;  %v6164_v5 = vld [vmem:[#allocation3 + $0x80] sm:$0xff] }
 0x4a2   : > { %14028 = vmatprep.subr.bf16.mxu0 %v17328_v60  ;;  %12794 = vmatmul.mubr.f32.gmra.mrb[52].mxu1 %v17029_v61  ;;  %v17344_v61 = vpack.c.bf16 %v6377_v17, %v6376_v53  ;;  %v6565_v53 = vld [vmem:[#allocation4 + $0x418] sm:$0xff]  ;;  %v7935_v17 = vld [vmem:[#allocation3 + $0xf0] sm:$0xff] }
 0x4a3   : > { %12346 = vmatmul.mubr.f32.gmra.mrb[52].mxu0 %v6162_v57  ;;  %14286 = vmatpush3.bf16.msra.mxu1 %v17227_v49  ;;  %v6165_v49 = vld [vmem:[#allocation3 + $0x90] sm:$0xff]  ;;  %v17372_v57 = vld [vmem:[#allocation3 + $0x182] sm:$0xff] }
 0x4a4   : > { %12348 = vmatprep.mubr.f32.mxu0 %v6163_v6  ;;  %14030 = vmatpush3.bf16.msra.mxu0 %v17328_v60  ;;  %v6564_v6 = vld [vmem:[#allocation4 + $0x410] sm:$0xff] }
 0x4a5   : > { %12796 = vmatprep.mubr.f32.mxu1 %v17039_v45  ;;  %14288 = vmatprep.subr.bf16.mxu1 %v17241_v29  ;;  %v6166_v45 = vld [vmem:[#allocation3 + $0x98] sm:$0xff] }
 0x4a6   : > { %14032 = vmatprep.subr.bf16.mxu0 %v17336_v40  ;;  %12797 = vmatmul.mubr.f32.gmra.mrb[54].mxu1 %v17043_v1  ;;  %v17352_v1 = vpack.c.bf16 %v6379_v25, %v6378_v7  ;;  %v6567_v7 = vld [vmem:[#allocation4 + $0x428] sm:$0xff]  ;;  %v7938_v25 = vld [vmem:[#allocation3 + $0x110] sm:$0xff] }
 0x4a7   : > { %12349 = vmatmul.mubr.f32.gmra.mrb[54].mxu0 %v6164_v5  ;;  %14290 = vmatpush3.bf16.msra.mxu1 %v17241_v29  ;;  %v6167_v29 = vld [vmem:[#allocation3 + $0xa8] sm:$0xff]  ;;  %v7936_v5 = vld [vmem:[#allocation3 + $0xf8] sm:$0xff] }
 0x4a8   : > { %12351 = vmatprep.mubr.f32.mxu0 %v6165_v49  ;;  %14034 = vmatpush3.bf16.msra.mxu0 %v17336_v40  ;;  %v17387_v49 = vpack.c.bf16 %v6565_v53, %v6564_v6  ;;  %v6551_v6 = vld [vmem:[#allocation3 + $0x7a] sm:$0xff] }
 0x4a9   : > { %12799 = vmatprep.mubr.f32.mxu1 %v17053_v9  ;;  %14292 = vmatprep.subr.bf16.mxu1 %v17255_v31  ;;  %v6168_v9 = vld [vmem:[#allocation3 + $0xb0] sm:$0xff]  ;;  %v8586_v53 = vld [vmem:[%s17689_s9 + $0x40] sm:$0xff] }
 0x4aa   : > { %14036 = vmatprep.subr.bf16.mxu0 %v17344_v61  ;;  %12800 = vmatmul.mubr.f32.gmra.mrb[56].mxu1 %v17057_v22  ;;  %v17360_v22 = vpack.c.bf16 %v6381_v54, %v6380_v3  ;;  %v7942_v54 = vld [vmem:[#allocation3 + $0x140] sm:$0xff] }
 0x4ab   : > { %12352 = vmatmul.mubr.f32.gmra.mrb[56].mxu0 %v6166_v45  ;;  %14294 = vmatpush3.bf16.msra.mxu1 %v17255_v31  ;;  %v6169_v31 = vld [vmem:[#allocation3 + $0xc0] sm:$0xff] }
 0x4ac   : > { %12354 = vmatprep.mubr.f32.mxu0 %v6167_v29  ;;  %14038 = vmatpush3.bf16.msra.mxu0 %v17344_v61  ;;  %v7940_v29 = vld [vmem:[#allocation3 + $0x128] sm:$0xff] }
 0x4ad   : > { %12802 = vmatprep.mubr.f32.mxu1 %v17067_v18  ;;  %14296 = vmatprep.subr.bf16.mxu1 %v17269_v10  ;;  %v6170_v18 = vld [vmem:[#allocation3 + $0xc8] sm:$0xff] }
 0x4ae   : > { %14040 = vmatprep.subr.bf16.mxu0 %v17352_v1  ;;  %12803 = vmatmul.mubr.f32.gmra.mrb[58].mxu1 %v17071_v58  ;;  %v17368_v58 = vpack.c.bf16 %v6383_v0, %v6382_v34  ;;  %v7946_v0 = vld [vmem:[#allocation3 + $0x170] sm:$0xff] }
 0x4af   : > { %12355 = vmatmul.mubr.f32.gmra.mrb[58].mxu0 %v6168_v9  ;;  %14298 = vmatpush3.bf16.msra.mxu1 %v17269_v10  ;;  %v6171_v10 = vld [vmem:[#allocation3 + $0xd8] sm:$0xff] }
 0x4b0   : > { %12357 = vmatprep.mubr.f32.mxu0 %v6169_v31  ;;  %14042 = vmatpush3.bf16.msra.mxu0 %v17352_v1  ;;  %v7944_v31 = vld [vmem:[#allocation3 + $0x158] sm:$0xff] }
 0x4b1   : > { %12805 = vmatprep.mubr.f32.mxu1 %v17081_v12  ;;  %14300 = vmatprep.subr.bf16.mxu1 %v17283_v55  ;;  %v17376_v12 = vld [vmem:[#allocation3 + $0x18a] sm:$0xff] }
 0x4b2   : > { %14044 = vmatprep.subr.bf16.mxu0 %v17360_v22  ;;  %12806 = vmatmul.mubr.f32.gmra.mrb[60].mxu1 %v17085_v39  ;;  %v6172_v39 = vld [vmem:[#allocation3 + $0xe0] sm:$0xff] }
 0x4b3   : > { %12358 = vmatmul.mubr.f32.gmra.mrb[60].mxu0 %v6170_v18  ;;  %14302 = vmatpush3.bf16.msra.mxu1 %v17283_v55  ;;  %v17380_v55 = vpack.c.bf16 %v6563_v14, %v6562_v56  ;;  %v6549_v14 = vld [vmem:[#allocation3 + $0x62] sm:$0xff] }
 0x4b4   : > { %12360 = vmatprep.mubr.f32.mxu0 %v6171_v10  ;;  %14046 = vmatpush3.bf16.msra.mxu0 %v17360_v22  ;;  %v8582_v10 = vld [vmem:[%s17689_s9 + $0x20] sm:$0xff] }
 0x4b5   : > { %12808 = vmatprep.mubr.f32.mxu1 %v17372_v57  ;;  %14304 = vmatprep.subr.bf16.mxu1 %v17297_v8 }
 0x4b6   : > { %14048 = vmatprep.subr.bf16.mxu0 %v17368_v58  ;;  %12809 = vmatmul.mubr.f32.gmra.mrb[62].mxu1 %v17376_v12 }
 0x4b7   : > { %12361 = vmatmul.mubr.f32.gmra.mrb[62].mxu0 %v6172_v39  ;;  %14306 = vmatpush3.bf16.msra.mxu1 %v17297_v8  ;;  %v6566_v8 = vld [vmem:[#allocation4 + $0x420] sm:$0xff] }
 0x4b8   : > { %14050 = vmatpush3.bf16.msra.mxu0 %v17368_v58  ;;  %12395 = vmatprep.mubr.f32.mxu0 %v17101_v32  ;;  %v7937_v32 = vld [vmem:[#allocation3 + $0x108] sm:$0xff]  ;;  %v17395_v45 = vpack.c.bf16 %v6567_v7, %v6566_v8  ;;  %v8584_v39 = vld [vmem:[%s17689_s9 + $0x30] sm:$0xff] }
 0x4b9   : > { %12843 = vmatprep.mubr.f32.mxu1 %v7935_v17  ;;  %14308 = vmatprep.subr.bf16.mxu1 %v17311_v15  ;;  %v6555_v7 = vld [vmem:[#allocation3 + $0xaa] sm:$0xff] }
 0x4ba   : > { %14052 = vmatprep.subr.bf16.mxu0 %v17380_v55  ;;  %12844 = vmatmul.mubr.f32.vlgmr.msra.gmra.mrb[48].mxu1 %v7936_v5  ;;  %v6553_v5 = vld [vmem:[#allocation3 + $0x92] sm:$0xff] }
 0x4bb   : > { %12396 = vmatmul.mubr.f32.vlgmr.msra.gmra.mrb[48].mxu0 %v17107_v28  ;;  %14310 = vmatpush3.bf16.msra.mxu1 %v17311_v15  ;;  %v6568_v28 = vld [vmem:[#allocation4 + $0x430] sm:$0xff]  ;;  %v6569_v15 = vld [vmem:[#allocation4 + $0x438] sm:$0xff] }
 0x4bc   : > { %12398 = vmatprep.mubr.f32.mxu0 %v17115_v4  ;;  %14054 = vmatpush3.bf16.msra.mxu0 %v17380_v55  ;;  %v7939_v4 = vld [vmem:[#allocation3 + $0x120] sm:$0xff]  ;;  %v17403_v3 = vpack.c.bf16 %v6569_v15, %v6568_v28  ;;  %v8324_v15 = vld [vmem:[#allocation3 + $0x112] sm:$0xff] }
 0x4bd   : > { %12846 = vmatprep.mubr.f32.mxu1 %v7937_v32  ;;  %14312 = vmatprep.subr.bf16.mxu1 %v17320_v2  ;;  %v8142_v32 = vld [vmem:[#allocation3 + $0x199] sm:$0xff] }
 0x4be   : > { %14056 = vmatprep.subr.bf16.mxu0 %v17387_v49  ;;  %12847 = vmatmul.mubr.f32.gmra.mrb[50].mxu1 %v7938_v25  ;;  %v8143_v25 = vld [vmem:[#allocation3 + $0x1a1] sm:$0xff] }
 0x4bf   : > { %12399 = vmatmul.mubr.f32.gmra.mrb[50].mxu0 %v17121_v59  ;;  %14314 = vmatpush3.bf16.msra.mxu1 %v17320_v2  ;;  %v6570_v59 = vld [vmem:[#allocation4 + $0x440] sm:$0xff]  ;;  %v6571_v2 = vld [vmem:[#allocation4 + $0x448] sm:$0xff] }
 0x4c0   : > { %12401 = vmatprep.mubr.f32.mxu0 %v17129_v52  ;;  %14058 = vmatpush3.bf16.msra.mxu0 %v17387_v49  ;;  %v7941_v52 = vld [vmem:[#allocation3 + $0x138] sm:$0xff]  ;;  %v17411_v9 = vpack.c.bf16 %v6571_v2, %v6570_v59  ;;  %v8328_v59 = vld [vmem:[#allocation3 + $0x142] sm:$0xff] }
 0x4c1   : > { %12849 = vmatprep.mubr.f32.mxu1 %v7939_v4  ;;  %14316 = vmatprep.subr.bf16.mxu1 %v17328_v60  ;;  %v8322_v28 = vld [vmem:[#allocation3 + $0xfa] sm:$0xff]  ;;  %v8325_v4 = vld [vmem:[#allocation3 + $0x122] sm:$0xff]  ;;  %v8329_v2 = vld [vmem:[#allocation3 + $0x152] sm:$0xff] }
 0x4c2   : > { %14060 = vmatprep.subr.bf16.mxu0 %v17395_v45  ;;  %12850 = vmatmul.mubr.f32.gmra.mrb[52].mxu1 %v7940_v29  ;;  %v8326_v29 = vld [vmem:[#allocation3 + $0x12a] sm:$0xff] }
 0x4c3   : > { %12402 = vmatmul.mubr.f32.gmra.mrb[52].mxu0 %v17135_v30  ;;  %14318 = vmatpush3.bf16.msra.mxu1 %v17328_v60  ;;  %v6572_v30 = vld [vmem:[#allocation4 + $0x450] sm:$0xff]  ;;  %v6573_v60 = vld [vmem:[#allocation4 + $0x458] sm:$0xff] }
 0x4c4   : > { %12404 = vmatprep.mubr.f32.mxu0 %v17143_v33  ;;  %14062 = vmatpush3.bf16.msra.mxu0 %v17395_v45  ;;  %v7943_v33 = vld [vmem:[#allocation3 + $0x150] sm:$0xff]  ;;  %v17419_v34 = vpack.c.bf16 %v6573_v60, %v6572_v30  ;;  %v8335_v30 = vld [vmem:[#allocation3 + $0x19a] sm:$0xff]  ;;  %v8336_v60 = vld [vmem:[#allocation3 + $0x1a2] sm:$0xff] }
 0x4c5   : > { %12852 = vmatprep.mubr.f32.mxu1 %v7941_v52  ;;  %14320 = vmatprep.subr.bf16.mxu1 %v17336_v40  ;;  %v8330_v52 = vld [vmem:[#allocation3 + $0x15a] sm:$0xff] }
 0x4c6   : > { %14064 = vmatprep.subr.bf16.mxu0 %v17403_v3  ;;  %12853 = vmatmul.mubr.f32.gmra.mrb[54].mxu1 %v7942_v54  ;;  %v8331_v54 = vld [vmem:[#allocation3 + $0x16a] sm:$0xff] }
 0x4c7   : > { %12405 = vmatmul.mubr.f32.gmra.mrb[54].mxu0 %v17149_v44  ;;  %14322 = vmatpush3.bf16.msra.mxu1 %v17336_v40  ;;  %v6574_v44 = vld [vmem:[#allocation4 + $0x460] sm:$0xff]  ;;  %v6575_v40 = vld [vmem:[#allocation4 + $0x468] sm:$0xff] }
 0x4c8   : > { %12407 = vmatprep.mubr.f32.mxu0 %v17157_v48  ;;  %14066 = vmatpush3.bf16.msra.mxu0 %v17403_v3  ;;  %v7945_v48 = vld [vmem:[#allocation3 + $0x168] sm:$0xff]  ;;  %v17427_v18 = vpack.c.bf16 %v6575_v40, %v6574_v44  ;;  %v17567_v40 = vld [vmem:[%s17688_s8] ss:$0 sm:$0xff] }
 0x4c9   : > { %12855 = vmatprep.mubr.f32.mxu1 %v7943_v33  ;;  %14324 = vmatprep.subr.bf16.mxu1 %v17344_v61  ;;  %v8590_v33 = vld [vmem:[%s17689_s9 + $0x60] sm:$0xff] }
 0x4ca   : > { %14068 = vmatprep.subr.bf16.mxu0 %v17411_v9  ;;  %12856 = vmatmul.mubr.f32.gmra.mrb[56].mxu1 %v7944_v31  ;;  %v8591_v31 = vld [vmem:[%s17689_s9 + $0x68] sm:$0xff] }
 0x4cb   : > { %12408 = vmatmul.mubr.f32.gmra.mrb[56].mxu0 %v17163_v23  ;;  %14326 = vmatpush3.bf16.msra.mxu1 %v17344_v61  ;;  %v6576_v23 = vld [vmem:[#allocation4 + $0x470] sm:$0xff]  ;;  %v6577_v61 = vld [vmem:[#allocation4 + $0x478] sm:$0xff] }
 0x4cc   : > { %12410 = vmatprep.mubr.f32.mxu0 %v17171_v43  ;;  %14070 = vmatpush3.bf16.msra.mxu0 %v17411_v9  ;;  %v17437_v43 = vpack.c.bf16 %v6577_v61, %v6576_v23 }
 0x4cd   : > { %12858 = vmatprep.mubr.f32.mxu1 %v7945_v48  ;;  %14328 = vmatprep.subr.bf16.mxu1 %v17352_v1 }
 0x4ce   : > { %14072 = vmatprep.subr.bf16.mxu0 %v17419_v34  ;;  %12859 = vmatmul.mubr.f32.gmra.mrb[58].mxu1 %v7946_v0 }
 0x4cf   : > { %12411 = vmatmul.mubr.f32.gmra.mrb[58].mxu0 %v17177_v27  ;;  %14330 = vmatpush3.bf16.msra.mxu1 %v17352_v1  ;;  %v8578_v27 = vld [vmem:[%s17689_s9] sm:$0xff]  ;;  %v8581_v1 = vld [vmem:[%s17689_s9 + $0x18] sm:$0xff] }
 0x4d0   : > { %12413 = vmatprep.mubr.f32.mxu0 %v17185_v38  ;;  %14074 = vmatpush3.bf16.msra.mxu0 %v17419_v34  ;;  %v8579_v38 = vld [vmem:[%s17689_s9 + $0x8] sm:$0xff] }
 0x4d1   : > { %12861 = vmatprep.mubr.f32.mxu1 %v17189_v16  ;;  %14332 = vmatprep.subr.bf16.mxu1 %v17360_v22  ;;  %v14973_v16 = vld [vmem:[#allocation3] sm:$0xff] }
 0x4d2   : > { %14076 = vmatprep.subr.bf16.mxu0 %v17427_v18  ;;  %12862 = vmatmul.mubr.f32.gmra.mrb[60].mxu1 %v17193_v37  ;;  %v17451_v37 = vpack.c.bf16 %v8579_v38, %v8578_v27 }
 0x4d3   : > { %12414 = vmatmul.mubr.f32.gmra.mrb[60].mxu0 %v17195_v51  ;;  %14334 = vmatpush3.bf16.msra.mxu1 %v17360_v22  ;;  %v6545_v51 = vld [vmem:[#allocation3 + $0x32] sm:$0xff]  ;;  %v6546_v22 = vld [vmem:[#allocation3 + $0x3a] sm:$0xff] }
 0x4d4   : > { %12416 = vmatprep.mubr.f32.mxu0 %v17205_v42  ;;  %14078 = vmatpush3.bf16.msra.mxu0 %v17427_v18  ;;  %v8580_v42 = vld [vmem:[%s17689_s9 + $0x10] sm:$0xff] }
 0x4d5   : > { %12864 = vmatprep.mubr.f32.mxu1 %v14973_v16  ;;  %14336 = vmatprep.subr.bf16.mxu1 %v17368_v58 }
 0x4d6   : > { %14080 = vmatprep.subr.bf16.mxu0 %v17437_v43  ;;  %12865 = vmatmul.mubr.f32.gmra.mrb[62].mxu1 %v14973_v16 }
 0x4d7   : > { %12417 = vmatmul.mubr.f32.gmra.mrb[62].mxu0 %v17209_v62  ;;  %14338 = vmatpush3.bf16.msra.mxu1 %v17368_v58  ;;  %v17466_v62 = vpack.c.bf16 %v8581_v1, %v8580_v42  ;;  %v6547_v58 = vld [vmem:[#allocation3 + $0x4a] sm:$0xff] }
 0x4d8   : > { %14082 = vmatpush3.bf16.msra.mxu0 %v17437_v43  ;;  %12451 = vmatprep.mubr.f32.mxu0 %v6545_v51 }
 0x4d9   : > { %12899 = vmatprep.mubr.f32.mxu1 %v17219_v21  ;;  %14340 = vmatprep.subr.bf16.mxu1 %v17380_v55  ;;  %v8583_v21 = vld [vmem:[%s17689_s9 + $0x28] sm:$0xff] }
 0x4da   : > { %12900 = vmatmul.mubr.f32.vlgmr.msra.gmra.mrb[48].mxu1 %v17223_v13  ;;  %14372 = vmatprep.subr.bf16.mxu0 %v17451_v37  ;;  %v6548_v13 = vld [vmem:[#allocation3 + $0x52] sm:$0xff]  ;;  %v17480_v56 = vpack.c.bf16 %v8583_v21, %v8582_v10 }
 0x4db   : > { %12452 = vmatmul.mubr.f32.vlgmr.msra.gmra.mrb[48].mxu0 %v6546_v22  ;;  %14342 = vmatpush3.bf16.msra.mxu1 %v17380_v55 }
 0x4dc   : > { %12454 = vmatprep.mubr.f32.mxu0 %v6547_v58  ;;  %12902 = vmatprep.mubr.f32.mxu1 %v17233_v46  ;;  %v8585_v46 = vld [vmem:[%s17689_s9 + $0x38] sm:$0xff] }
 0x4dd   : > { %14344 = vmatprep.subr.bf16.mxu1 %v17387_v49  ;;  %14374 = vmatpush3.bf16.msra.mxu0 %v17451_v37  ;;  %v17494_v55 = vpack.c.bf16 %v8585_v46, %v8584_v39 }
 0x4de   : > { %12903 = vmatmul.mubr.f32.gmra.mrb[50].mxu1 %v17237_v35  ;;  %14376 = vmatprep.subr.bf16.mxu0 %v17466_v62  ;;  %v6550_v35 = vld [vmem:[#allocation3 + $0x6a] sm:$0xff] }
 0x4df   : > { %12455 = vmatmul.mubr.f32.gmra.mrb[50].mxu0 %v6548_v13  ;;  %14346 = vmatpush3.bf16.msra.mxu1 %v17387_v49  ;;  %v8588_v49 = vld [vmem:[%s17689_s9 + $0x50] sm:$0xff] }
 0x4e0   : > { %12457 = vmatprep.mubr.f32.mxu0 %v6549_v14  ;;  %12905 = vmatprep.mubr.f32.mxu1 %v17247_v24  ;;  %v8587_v24 = vld [vmem:[%s17689_s9 + $0x48] sm:$0xff] }
 0x4e1   : > { %14348 = vmatprep.subr.bf16.mxu1 %v17395_v45  ;;  %14378 = vmatpush3.bf16.msra.mxu0 %v17466_v62  ;;  %v17508_v17 = vpack.c.bf16 %v8587_v24, %v8586_v53 }
 0x4e2   : > { %12906 = vmatmul.mubr.f32.gmra.mrb[52].mxu1 %v17251_v19  ;;  %14380 = vmatprep.subr.bf16.mxu0 %v17480_v56  ;;  %v6552_v19 = vld [vmem:[#allocation3 + $0x82] sm:$0xff] }
 0x4e3   : > { %12458 = vmatmul.mubr.f32.gmra.mrb[52].mxu0 %v6550_v35  ;;  %14350 = vmatpush3.bf16.msra.mxu1 %v17395_v45  ;;  %v6560_v45 = vld [vmem:[#allocation3 + $0xe2] sm:$0xff] }
 0x4e4   : > { %12460 = vmatprep.mubr.f32.mxu0 %v6551_v6  ;;  %12908 = vmatprep.mubr.f32.mxu1 %v17261_v36  ;;  %v8589_v36 = vld [vmem:[%s17689_s9 + $0x58] sm:$0xff] }
 0x4e5   : > { %14352 = vmatprep.subr.bf16.mxu1 %v17403_v3  ;;  %14382 = vmatpush3.bf16.msra.mxu0 %v17480_v56  ;;  %v17522_v8 = vpack.c.bf16 %v8589_v36, %v8588_v49 }
 0x4e6   : > { %12909 = vmatmul.mubr.f32.gmra.mrb[54].mxu1 %v17265_v50  ;;  %14384 = vmatprep.subr.bf16.mxu0 %v17494_v55  ;;  %v6554_v50 = vld [vmem:[#allocation3 + $0x9a] sm:$0xff] }
 0x4e7   : > { %12461 = vmatmul.mubr.f32.gmra.mrb[54].mxu0 %v6552_v19  ;;  %14354 = vmatpush3.bf16.msra.mxu1 %v17403_v3  ;;  %v8327_v3 = vld [vmem:[#allocation3 + $0x13a] sm:$0xff] }
 0x4e8   : > { %12463 = vmatprep.mubr.f32.mxu0 %v6553_v5  ;;  %12911 = vmatprep.mubr.f32.mxu1 %v17275_v26  ;;  %v6556_v26 = vld [vmem:[#allocation3 + $0xb2] sm:$0xff] }
 0x4e9   : > { %14356 = vmatprep.subr.bf16.mxu1 %v17411_v9  ;;  %14386 = vmatpush3.bf16.msra.mxu0 %v17494_v55 }
 0x4ea   : > { %12912 = vmatmul.mubr.f32.gmra.mrb[56].mxu1 %v17279_v47  ;;  %14388 = vmatprep.subr.bf16.mxu0 %v17508_v17  ;;  %v6557_v47 = vld [vmem:[#allocation3 + $0xc2] sm:$0xff] }
 0x4eb   : > { %12464 = vmatmul.mubr.f32.gmra.mrb[56].mxu0 %v6554_v50  ;;  %14358 = vmatpush3.bf16.msra.mxu1 %v17411_v9  ;;  %v8332_v9 = vld [vmem:[#allocation3 + $0x172] sm:$0xff] }
 0x4ec   : > { %12466 = vmatprep.mubr.f32.mxu0 %v6555_v7  ;;  %12914 = vmatprep.mubr.f32.mxu1 %v17289_v63  ;;  %v6558_v63 = vld [vmem:[#allocation3 + $0xca] sm:$0xff] }
 0x4ed   : > { %14360 = vmatprep.subr.bf16.mxu1 %v17419_v34  ;;  %14390 = vmatpush3.bf16.msra.mxu0 %v17508_v17 }
 0x4ee   : > { %12915 = vmatmul.mubr.f32.gmra.mrb[58].mxu1 %v17293_v11  ;;  %14392 = vmatprep.subr.bf16.mxu0 %v17522_v8  ;;  %v6559_v11 = vld [vmem:[#allocation3 + $0xda] sm:$0xff] }
 0x4ef   : > { %12467 = vmatmul.mubr.f32.gmra.mrb[58].mxu0 %v6556_v26  ;;  %14362 = vmatpush3.bf16.msra.mxu1 %v17419_v34  ;;  %v14395_v34 = vpack.c.bf16 %v8591_v31, %v8590_v33 }
 0x4f0   : > { %12469 = vmatprep.mubr.f32.mxu0 %v6557_v47  ;;  %12917 = vmatprep.mubr.f32.mxu1 %v17303_v20  ;;  %v8321_v20 = vld [vmem:[#allocation3 + $0xf2] sm:$0xff] }
 0x4f1   : > { %14364 = vmatprep.subr.bf16.mxu1 %v17427_v18  ;;  %14394 = vmatpush3.bf16.msra.mxu0 %v17522_v8 }
 0x4f2   : > { %12918 = vmatmul.mubr.f32.gmra.mrb[60].mxu1 %v17307_v41  ;;  %v8323_v41 = vld [vmem:[#allocation3 + $0x10a] sm:$0xff]  ;;  %14396 = vmatprep.subr.bf16.mxu0 %v14395_v34 }
 0x4f3   : > { %12470 = vmatmul.mubr.f32.gmra.mrb[60].mxu0 %v6558_v63  ;;  %14366 = vmatpush3.bf16.msra.mxu1 %v17427_v18 }
 0x4f4   : > { %12472 = vmatprep.mubr.f32.mxu0 %v6559_v11  ;;  %12920 = vmatprep.mubr.f32.mxu1 %v8142_v32 }
 0x4f5   : > { %14368 = vmatprep.subr.bf16.mxu1 %v17437_v43  ;;  %14398 = vmatpush3.bf16.msra.mxu0 %v14395_v34 }
 0x4f6   : > { %12921 = vmatmul.mubr.f32.gmra.mrb[62].mxu1 %v8143_v25 }
 0x4f7   : > { %12473 = vmatmul.mubr.f32.gmra.mrb[62].mxu0 %v6560_v45  ;;  %14370 = vmatpush3.bf16.msra.mxu1 %v17437_v43 }
 0x4f8   : > { %12955 = vmatprep.mubr.f32.mxu1 %v8321_v20  ;;  %14404 = vmatprep.subr.bf16.mxu1 %v17451_v37 }
 0x4fa   : > { %12956 = vmatmul.mubr.f32.vlgmr.msra.gmra.mrb[48].mxu1 %v8322_v28 }
 0x4fb   : > { %12958 = vmatprep.mubr.f32.mxu1 %v8323_v41  ;;  %14406 = vmatpush3.bf16.msra.mxu1 %v17451_v37 }
 0x4fc   : > { %14408 = vmatprep.subr.bf16.mxu1 %v17466_v62 }
 0x4fe   : > { %12959 = vmatmul.mubr.f32.gmra.mrb[50].mxu1 %v8324_v15 }
 0x4ff   : > { %12961 = vmatprep.mubr.f32.mxu1 %v8325_v4  ;;  %14410 = vmatpush3.bf16.msra.mxu1 %v17466_v62 }
 0x500   : > { %14412 = vmatprep.subr.bf16.mxu1 %v17480_v56 }
 0x502   : > { %12962 = vmatmul.mubr.f32.gmra.mrb[52].mxu1 %v8326_v29 }
 0x503   : > { %12964 = vmatprep.mubr.f32.mxu1 %v8327_v3  ;;  %14414 = vmatpush3.bf16.msra.mxu1 %v17480_v56 }
 0x504   : > { %14416 = vmatprep.subr.bf16.mxu1 %v17494_v55 }
 0x506   : > { %12965 = vmatmul.mubr.f32.gmra.mrb[54].mxu1 %v8328_v59 }
 0x507   : > { %12967 = vmatprep.mubr.f32.mxu1 %v8329_v2  ;;  %14418 = vmatpush3.bf16.msra.mxu1 %v17494_v55 }
 0x508   : > { %14420 = vmatprep.subr.bf16.mxu1 %v17508_v17 }
 0x50a   : > { %12968 = vmatmul.mubr.f32.gmra.mrb[56].mxu1 %v8330_v52 }
 0x50b   : > { %12970 = vmatprep.mubr.f32.mxu1 %v8331_v54  ;;  %14422 = vmatpush3.bf16.msra.mxu1 %v17508_v17 }
 0x50c   : > { %14424 = vmatprep.subr.bf16.mxu1 %v17522_v8 }
 0x50e   : > { %12971 = vmatmul.mubr.f32.gmra.mrb[58].mxu1 %v8332_v9 }
 0x50f   : > { %12973 = vmatprep.mubr.f32.mxu1 %v17372_v57  ;;  %14426 = vmatpush3.bf16.msra.mxu1 %v17522_v8  ;;  %v8592_v57 = vld [vmem:[%s17689_s9 + $0x70] sm:$0xff] }
 0x510   : > { %14428 = vmatprep.subr.bf16.mxu1 %v14395_v34 }
 0x512   : > { %12974 = vmatmul.mubr.f32.gmra.mrb[60].mxu1 %v17376_v12  ;;  %v8593_v12 = vld [vmem:[%s17689_s9 + $0x78] sm:$0xff] }
 0x513   : > { %12976 = vmatprep.mubr.f32.mxu1 %v8335_v30  ;;  %14430 = vmatpush3.bf16.msra.mxu1 %v14395_v34  ;;  %v14399_v44 = vpack.c.bf16 %v8593_v12, %v8592_v57 }
 0x515   : > { %14400 = vmatprep.subr.bf16.mxu0 %v14399_v44  ;;  %14432 = vmatprep.subr.bf16.mxu1 %v14399_v44 }
 0x516   : > { %12977 = vmatmul.mubr.f32.gmra.mrb[62].mxu1 %v8336_v60  ;;  %14402 = vmatpush3.bf16.msra.mxu0 %v14399_v44 }
 0x517   : > { %14434 = vmatpush3.bf16.msra.mxu1 %v14399_v44 }
 0x5ae   : > { %v12453_v48 = vpop.f32.mrb[48].mxu0 }
 0x5af   : > { %v6746_v0 = vadd.f32 %v12453_v48, %v17567_v40  ;;  %v6644_v18 = vpop.f32.mrb[49].mxu0 }
 0x5b0   : > { %v6745_v23 = vadd.f32 %v17567_v40, %v6644_v18 }
 0x5b1   : > { %v6762_v61 = vmul.f32 0.1, %v6746_v0 }
 0x5b2   : > { %v6761_v43 = vmul.f32 0.1, %v6745_v23  ;;  %v12456_v27 = vpop.f32.mrb[50].mxu0 }
 0x5b3   : > { %v6748_v38 = vadd.f32 %v12456_v27, %v17567_v40  ;;  %v6654_v16 = vpop.f32.mrb[51].mxu0  ;;  %v6778_v42 = vmax.f32 %v6746_v0, %v6762_v61 }
 0x5b4   : > { %v6777_v37 = vmax.f32 %v6745_v23, %v6761_v43  ;;  %v6747_v51 = vadd.f32 %v17567_v40, %v6654_v16 }
 0x5b5   : > { %v6764_v1 = vmul.f32 0.1, %v6748_v38 }
 0x5b6   : > { %v6763_v22 = vmul.f32 0.1, %v6747_v51  ;;  %v12459_v62 = vpop.f32.mrb[52].mxu0  ;;  %13011 = vmatprep.mubr.f32.mxu0 %v6777_v37 }
 0x5b7   : > { %v6750_v58 = vadd.f32 %v12459_v62, %v17567_v40  ;;  %v6664_v10 = vpop.f32.mrb[53].mxu0  ;;  %13012 = vmatmul.mubr.f32.vlgmr.msra.gmra.mrb[64].mxu0 %v6778_v42  ;;  %v6780_v56 = vmax.f32 %v6748_v38, %v6764_v1 }
 0x5b8   : > { %v6779_v21 = vmax.f32 %v6747_v51, %v6763_v22  ;;  %v6749_v13 = vadd.f32 %v17567_v40, %v6664_v10 }
 0x5b9   : > { %v6766_v14 = vmul.f32 0.1, %v6750_v58 }
 0x5ba   : > { %v6765_v39 = vmul.f32 0.1, %v6749_v13  ;;  %v12462_v46 = vpop.f32.mrb[54].mxu0  ;;  %13014 = vmatprep.mubr.f32.mxu0 %v6779_v21 }
 0x5bb   : > { %v6752_v35 = vadd.f32 %v12462_v46, %v17567_v40  ;;  %v6674_v55 = vpop.f32.mrb[55].mxu0  ;;  %13015 = vmatmul.mubr.f32.gmra.mrb[66].mxu0 %v6780_v56  ;;  %v6782_v24 = vmax.f32 %v6750_v58, %v6766_v14 }
 0x5bc   : > { %v6781_v6 = vmax.f32 %v6749_v13, %v6765_v39  ;;  %v6751_v53 = vadd.f32 %v17567_v40, %v6674_v55 }
 0x5bd   : > { %v6768_v19 = vmul.f32 0.1, %v6752_v35 }
 0x5be   : > { %v6767_v17 = vmul.f32 0.1, %v6751_v53  ;;  %v12465_v5 = vpop.f32.mrb[56].mxu0  ;;  %13017 = vmatprep.mubr.f32.mxu0 %v6781_v6 }
 0x5bf   : > { %v6754_v49 = vadd.f32 %v12465_v5, %v17567_v40  ;;  %v6684_v36 = vpop.f32.mrb[57].mxu0  ;;  %13018 = vmatmul.mubr.f32.gmra.mrb[68].mxu0 %v6782_v24  ;;  %v6784_v7 = vmax.f32 %v6752_v35, %v6768_v19 }
 0x5c0   : > { %v6783_v50 = vmax.f32 %v6751_v53, %v6767_v17  ;;  %v6753_v8 = vadd.f32 %v17567_v40, %v6684_v36 }
 0x5c1   : > { %v6770_v26 = vmul.f32 0.1, %v6754_v49 }
 0x5c2   : > { %v6769_v47 = vmul.f32 0.1, %v6753_v8  ;;  %v12468_v32 = vpop.f32.mrb[58].mxu0  ;;  %13020 = vmatprep.mubr.f32.mxu0 %v6783_v50 }
 0x5c3   : > { %v6756_v63 = vadd.f32 %v12468_v32, %v17567_v40  ;;  %v6694_v11 = vpop.f32.mrb[59].mxu0  ;;  %13021 = vmatmul.mubr.f32.gmra.mrb[70].mxu0 %v6784_v7  ;;  %v6786_v20 = vmax.f32 %v6754_v49, %v6770_v26 }
 0x5c4   : > { %v6785_v25 = vmax.f32 %v6753_v8, %v6769_v47  ;;  %v6755_v45 = vadd.f32 %v17567_v40, %v6694_v11 }
 0x5c5   : > { %v6772_v28 = vmul.f32 0.1, %v6756_v63 }
 0x5c6   : > { %v6771_v41 = vmul.f32 0.1, %v6755_v45  ;;  %v12471_v15 = vpop.f32.mrb[60].mxu0  ;;  %13023 = vmatprep.mubr.f32.mxu0 %v6785_v25 }
 0x5c7   : > { %v6758_v4 = vadd.f32 %v12471_v15, %v17567_v40  ;;  %v6704_v29 = vpop.f32.mrb[61].mxu0  ;;  %13024 = vmatmul.mubr.f32.gmra.mrb[72].mxu0 %v6786_v20  ;;  %v6788_v2 = vmax.f32 %v6756_v63, %v6772_v28 }
 0x5c8   : > { %v6787_v3 = vmax.f32 %v6755_v45, %v6771_v41  ;;  %v6757_v59 = vadd.f32 %v17567_v40, %v6704_v29 }
 0x5c9   : > { %v6774_v52 = vmul.f32 0.1, %v6758_v4 }
 0x5ca   : > { %v6773_v54 = vmul.f32 0.1, %v6757_v59  ;;  %v12474_v9 = vpop.f32.mrb[62].mxu0  ;;  %13026 = vmatprep.mubr.f32.mxu0 %v6787_v3 }
 0x5cb   : > { %v6760_v30 = vadd.f32 %v12474_v9, %v17567_v40  ;;  %v6714_v60 = vpop.f32.mrb[63].mxu0  ;;  %13027 = vmatmul.mubr.f32.gmra.mrb[74].mxu0 %v6788_v2  ;;  %v6790_v34 = vmax.f32 %v6758_v4, %v6774_v52 }
 0x5cc   : > { %v6789_v33 = vmax.f32 %v6757_v59, %v6773_v54  ;;  %v6759_v31 = vadd.f32 %v17567_v40, %v6714_v60 }
 0x5cd   : > { %v6776_v57 = vmul.f32 0.1, %v6760_v30  ;;  %v12957_v12 = vpop.f32.mrb[48].mxu1 }
 0x5ce   : > { %v6775_v44 = vmul.f32 0.1, %v6759_v31  ;;  %v8515_v48 = vadd.f32 %v12957_v12, %v17567_v40  ;;  %13029 = vmatprep.mubr.f32.mxu0 %v6789_v33  ;;  %v8419_v0 = vpop.f32.mrb[49].mxu1 }
 0x5cf   : > { %v8514_v18 = vadd.f32 %v17567_v40, %v8419_v0  ;;  %13030 = vmatmul.mubr.f32.gmra.mrb[76].mxu0 %v6790_v34  ;;  %v6792_v43 = vmax.f32 %v6760_v30, %v6776_v57 }
 0x5d0   : > { %v6791_v23 = vmax.f32 %v6759_v31, %v6775_v44  ;;  %v8531_v61 = vmul.f32 0.1, %v8515_v48 }
 0x5d1   : > { %v8530_v27 = vmul.f32 0.1, %v8514_v18  ;;  %v12960_v38 = vpop.f32.mrb[50].mxu1 }
 0x5d2   : > { %v8517_v16 = vadd.f32 %v12960_v38, %v17567_v40  ;;  %13032 = vmatprep.mubr.f32.mxu0 %v6791_v23  ;;  %v8429_v37 = vpop.f32.mrb[51].mxu1  ;;  %v8547_v1 = vmax.f32 %v8515_v48, %v8531_v61 }
 0x5d3   : > { %v8546_v51 = vmax.f32 %v8514_v18, %v8530_v27  ;;  %v8516_v42 = vadd.f32 %v17567_v40, %v8429_v37  ;;  %13033 = vmatmul.mubr.f32.gmra.mrb[78].mxu0 %v6792_v43  ;;  %v17604_v18 = vld [vmem:[%s17690_s10] ss:$0 sm:$0xff] }
 0x5d4   : > { %v8533_v22 = vmul.f32 0.1, %v8517_v16 }
 0x5d5   : > { %v8532_v62 = vmul.f32 0.1, %v8516_v42  ;;  %v12963_v58 = vpop.f32.mrb[52].mxu1  ;;  %13067 = vmatprep.mubr.f32.mxu1 %v8546_v51 }
 0x5d6   : > { %v8519_v10 = vadd.f32 %v12963_v58, %v17567_v40  ;;  %v8439_v21 = vpop.f32.mrb[53].mxu1  ;;  %13068 = vmatmul.mubr.f32.vlgmr.msra.gmra.mrb[64].mxu1 %v8547_v1  ;;  %v8549_v14 = vmax.f32 %v8517_v16, %v8533_v22 }
 0x5d7   : > { %v8548_v13 = vmax.f32 %v8516_v42, %v8532_v62  ;;  %v8518_v56 = vadd.f32 %v17567_v40, %v8439_v21 }
 0x5d8   : > { %v8535_v39 = vmul.f32 0.1, %v8519_v10 }
 0x5d9   : > { %v8534_v46 = vmul.f32 0.1, %v8518_v56  ;;  %v12966_v35 = vpop.f32.mrb[54].mxu1  ;;  %13070 = vmatprep.mubr.f32.mxu1 %v8548_v13 }
 0x5da   : > { %v8521_v55 = vadd.f32 %v12966_v35, %v17567_v40  ;;  %v8449_v6 = vpop.f32.mrb[55].mxu1  ;;  %13071 = vmatmul.mubr.f32.gmra.mrb[66].mxu1 %v8549_v14  ;;  %v8551_v19 = vmax.f32 %v8519_v10, %v8535_v39 }
 0x5db   : > { %v8550_v53 = vmax.f32 %v8518_v56, %v8534_v46  ;;  %v8520_v24 = vadd.f32 %v17567_v40, %v8449_v6 }
 0x5dc   : > { %v8537_v17 = vmul.f32 0.1, %v8521_v55 }
 0x5dd   : > { %v8536_v5 = vmul.f32 0.1, %v8520_v24  ;;  %v12969_v49 = vpop.f32.mrb[56].mxu1  ;;  %13073 = vmatprep.mubr.f32.mxu1 %v8550_v53 }
 0x5de   : > { %v8523_v36 = vadd.f32 %v12969_v49, %v17567_v40  ;;  %v8459_v50 = vpop.f32.mrb[57].mxu1  ;;  %13074 = vmatmul.mubr.f32.gmra.mrb[68].mxu1 %v8551_v19  ;;  %v8553_v26 = vmax.f32 %v8521_v55, %v8537_v17 }
 0x5df   : > { %v8552_v8 = vmax.f32 %v8520_v24, %v8536_v5  ;;  %v8522_v7 = vadd.f32 %v17567_v40, %v8459_v50 }
 0x5e0   : > { %v8539_v47 = vmul.f32 0.1, %v8523_v36 }
 0x5e1   : > { %v8538_v32 = vmul.f32 0.1, %v8522_v7  ;;  %v12972_v63 = vpop.f32.mrb[58].mxu1  ;;  %13076 = vmatprep.mubr.f32.mxu1 %v8552_v8 }
 0x5e2   : > { %v8525_v11 = vadd.f32 %v12972_v63, %v17567_v40  ;;  %v8469_v25 = vpop.f32.mrb[59].mxu1  ;;  %13077 = vmatmul.mubr.f32.gmra.mrb[70].mxu1 %v8553_v26  ;;  %v8555_v28 = vmax.f32 %v8523_v36, %v8539_v47 }
 0x5e3   : > { %v8554_v45 = vmax.f32 %v8522_v7, %v8538_v32  ;;  %v8524_v20 = vadd.f32 %v17567_v40, %v8469_v25 }
 0x5e4   : > { %v8541_v41 = vmul.f32 0.1, %v8525_v11 }
 0x5e5   : > { %v8540_v15 = vmul.f32 0.1, %v8524_v20  ;;  %v12975_v4 = vpop.f32.mrb[60].mxu1  ;;  %13079 = vmatprep.mubr.f32.mxu1 %v8554_v45 }
 0x5e6   : > { %v8527_v29 = vadd.f32 %v12975_v4, %v17567_v40  ;;  %v8479_v3 = vpop.f32.mrb[61].mxu1  ;;  %13080 = vmatmul.mubr.f32.gmra.mrb[72].mxu1 %v8555_v28  ;;  %v8557_v52 = vmax.f32 %v8525_v11, %v8541_v41 }
 0x5e7   : > { %v8556_v59 = vmax.f32 %v8524_v20, %v8540_v15  ;;  %v8526_v2 = vadd.f32 %v17567_v40, %v8479_v3 }
 0x5e8   : > { %v8543_v54 = vmul.f32 0.1, %v8527_v29 }
 0x5e9   : > { %v8542_v9 = vmul.f32 0.1, %v8526_v2  ;;  %v12978_v30 = vpop.f32.mrb[62].mxu1  ;;  %13082 = vmatprep.mubr.f32.mxu1 %v8556_v59 }
 0x5ea   : > { %v8529_v60 = vadd.f32 %v12978_v30, %v17567_v40  ;;  %v8489_v33 = vpop.f32.mrb[63].mxu1  ;;  %13083 = vmatmul.mubr.f32.gmra.mrb[74].mxu1 %v8557_v52  ;;  %v8559_v57 = vmax.f32 %v8527_v29, %v8543_v54 }
 0x5eb   : > { %v8558_v31 = vmax.f32 %v8526_v2, %v8542_v9  ;;  %v8528_v34 = vadd.f32 %v17567_v40, %v8489_v33 }
 0x5ec   : > { %v8545_v12 = vmul.f32 0.1, %v8529_v60 }
 0x5ed   : > { %v8544_v44 = vmul.f32 0.1, %v8528_v34  ;;  %13085 = vmatprep.mubr.f32.mxu1 %v8558_v31 }
 0x5ee   : > { %13086 = vmatmul.mubr.f32.gmra.mrb[76].mxu1 %v8559_v57  ;;  %v8561_v0 = vmax.f32 %v8529_v60, %v8545_v12 }
 0x5ef   : > { %v8560_v48 = vmax.f32 %v8528_v34, %v8544_v44 }
 0x5f1   : > { %13088 = vmatprep.mubr.f32.mxu1 %v8560_v48 }
 0x5f2   : > { %13089 = vmatmul.mubr.f32.gmra.mrb[78].mxu1 %v8561_v0 }
 0x68a   : > { %v13013_v23 = vpop.f32.mrb[64].mxu0 }
 0x68b   : > { %v8689_v61 = vadd.f32 %v13013_v23, %v17604_v18  ;;  %v8683_v43 = vpop.f32.mrb[65].mxu0 }
 0x68c   : > { %v8684_v40 = vadd.f32 %v17604_v18, %v8683_v43 }
 0x68d   : > { %v8763_v27 = vmul.f32 0.1, %v8689_v61 }
 0x68e   : > { %v8762_v38 = vmul.f32 0.1, %v8684_v40  ;;  %v13016_v16 = vpop.f32.mrb[66].mxu0 }
 0x68f   : > { %v8779_v37 = vmax.f32 %v8689_v61, %v8763_v27  ;;  %v8699_v51 = vadd.f32 %v13016_v16, %v17604_v18  ;;  %v8693_v42 = vpop.f32.mrb[67].mxu0 }
 0x690   : > { %v8778_v1 = vmax.f32 %v8684_v40, %v8762_v38  ;;  %v8694_v22 = vadd.f32 %v17604_v18, %v8693_v42 }
 0x691   : > { %8795 = vst [vmem:[%s17613_s20 + $0x8] sm:$0xff] %v8779_v37  ;;  %v8765_v62 = vmul.f32 0.1, %v8699_v51 }
 0x692   : > { %8794 = vst [vmem:[%s17613_s20] sm:$0xff] %v8778_v1  ;;  %v8764_v58 = vmul.f32 0.1, %v8694_v22  ;;  %v13019_v10 = vpop.f32.mrb[68].mxu0 }
 0x693   : > { %v8781_v21 = vmax.f32 %v8699_v51, %v8765_v62  ;;  %v8709_v13 = vadd.f32 %v13019_v10, %v17604_v18  ;;  %v8703_v56 = vpop.f32.mrb[69].mxu0 }
 0x694   : > { %v8780_v14 = vmax.f32 %v8694_v22, %v8764_v58  ;;  %v8704_v39 = vadd.f32 %v17604_v18, %v8703_v56 }
 0x695   : > { %8797 = vst [vmem:[%s17613_s20 + $0x18] sm:$0xff] %v8781_v21  ;;  %v8767_v46 = vmul.f32 0.1, %v8709_v13 }
 0x696   : > { %8796 = vst [vmem:[%s17613_s20 + $0x10] sm:$0xff] %v8780_v14  ;;  %v8766_v35 = vmul.f32 0.1, %v8704_v39  ;;  %v13022_v55 = vpop.f32.mrb[70].mxu0 }
 0x697   : > { %v8783_v6 = vmax.f32 %v8709_v13, %v8767_v46  ;;  %v8719_v53 = vadd.f32 %v13022_v55, %v17604_v18  ;;  %v8713_v24 = vpop.f32.mrb[71].mxu0 }
 0x698   : > { %v8782_v19 = vmax.f32 %v8704_v39, %v8766_v35  ;;  %v8714_v17 = vadd.f32 %v17604_v18, %v8713_v24 }
 0x699   : > { %8799 = vst [vmem:[%s17613_s20 + $0x28] sm:$0xff] %v8783_v6  ;;  %v8769_v5 = vmul.f32 0.1, %v8719_v53 }
 0x69a   : > { %8798 = vst [vmem:[%s17613_s20 + $0x20] sm:$0xff] %v8782_v19  ;;  %v8768_v49 = vmul.f32 0.1, %v8714_v17  ;;  %v13025_v36 = vpop.f32.mrb[72].mxu0 }
 0x69b   : > { %v8785_v50 = vmax.f32 %v8719_v53, %v8769_v5  ;;  %v8729_v8 = vadd.f32 %v13025_v36, %v17604_v18  ;;  %v8723_v7 = vpop.f32.mrb[73].mxu0 }
 0x69c   : > { %v8784_v26 = vmax.f32 %v8714_v17, %v8768_v49  ;;  %v8724_v47 = vadd.f32 %v17604_v18, %v8723_v7 }
 0x69d   : > { %8801 = vst [vmem:[%s17613_s20 + $0x38] sm:$0xff] %v8785_v50  ;;  %v8771_v32 = vmul.f32 0.1, %v8729_v8 }
 0x69e   : > { %8800 = vst [vmem:[%s17613_s20 + $0x30] sm:$0xff] %v8784_v26  ;;  %v8770_v63 = vmul.f32 0.1, %v8724_v47  ;;  %v13028_v11 = vpop.f32.mrb[74].mxu0 }
 0x69f   : > { %v8787_v25 = vmax.f32 %v8729_v8, %v8771_v32  ;;  %v8739_v45 = vadd.f32 %v13028_v11, %v17604_v18  ;;  %v8733_v20 = vpop.f32.mrb[75].mxu0 }
 0x6a0   : > { %v8786_v28 = vmax.f32 %v8724_v47, %v8770_v63  ;;  %v8734_v41 = vadd.f32 %v17604_v18, %v8733_v20 }
 0x6a1   : > { %8803 = vst [vmem:[%s17613_s20 + $0x48] sm:$0xff] %v8787_v25  ;;  %v8773_v15 = vmul.f32 0.1, %v8739_v45 }
 0x6a2   : > { %8802 = vst [vmem:[%s17613_s20 + $0x40] sm:$0xff] %v8786_v28  ;;  %v8772_v4 = vmul.f32 0.1, %v8734_v41  ;;  %v13031_v29 = vpop.f32.mrb[76].mxu0 }
 0x6a3   : > { %v8789_v3 = vmax.f32 %v8739_v45, %v8773_v15  ;;  %v8749_v59 = vadd.f32 %v13031_v29, %v17604_v18  ;;  %v8743_v2 = vpop.f32.mrb[77].mxu0 }
 0x6a4   : > { %v8788_v52 = vmax.f32 %v8734_v41, %v8772_v4  ;;  %v8744_v54 = vadd.f32 %v17604_v18, %v8743_v2 }
 0x6a5   : > { %8805 = vst [vmem:[%s17613_s20 + $0x58] sm:$0xff] %v8789_v3  ;;  %v8775_v9 = vmul.f32 0.1, %v8749_v59 }
 0x6a6   : > { %8804 = vst [vmem:[%s17613_s20 + $0x50] sm:$0xff] %v8788_v52  ;;  %v8774_v30 = vmul.f32 0.1, %v8744_v54  ;;  %v13034_v60 = vpop.f32.mrb[78].mxu0 }
 0x6a7   : > { %v8791_v33 = vmax.f32 %v8749_v59, %v8775_v9  ;;  %v8759_v31 = vadd.f32 %v13034_v60, %v17604_v18  ;;  %v8753_v34 = vpop.f32.mrb[79].mxu0 }
 0x6a8   : > { %v8790_v57 = vmax.f32 %v8744_v54, %v8774_v30  ;;  %v8754_v12 = vadd.f32 %v17604_v18, %v8753_v34 }
 0x6a9   : > { %8807 = vst [vmem:[%s17613_s20 + $0x68] sm:$0xff] %v8791_v33  ;;  %v8777_v44 = vmul.f32 0.1, %v8759_v31  ;;  %v13069_v48 = vpop.f32.mrb[64].mxu1 }
 0x6aa   : > { %8806 = vst [vmem:[%s17613_s20 + $0x60] sm:$0xff] %v8790_v57  ;;  %v8776_v0 = vmul.f32 0.1, %v8754_v12  ;;  %v8898_v23 = vadd.f32 %v13069_v48, %v17604_v18  ;;  %v8892_v61 = vpop.f32.mrb[65].mxu1 }
 0x6ab   : > { %v8793_v43 = vmax.f32 %v8759_v31, %v8777_v44  ;;  %v8893_v40 = vadd.f32 %v17604_v18, %v8892_v61 }
 0x6ac   : > { %v8792_v27 = vmax.f32 %v8754_v12, %v8776_v0  ;;  %v8972_v38 = vmul.f32 0.1, %v8898_v23 }
 0x6ad   : > { %8809 = vst [vmem:[%s17613_s20 + $0x78] sm:$0xff] %v8793_v43  ;;  %v8971_v16 = vmul.f32 0.1, %v8893_v40  ;;  %v13072_v37 = vpop.f32.mrb[66].mxu1 }
 0x6ae   : > { %8808 = vst [vmem:[%s17613_s20 + $0x70] sm:$0xff] %v8792_v27  ;;  %v8988_v51 = vmax.f32 %v8898_v23, %v8972_v38  ;;  %v8908_v42 = vadd.f32 %v13072_v37, %v17604_v18  ;;  %v8902_v1 = vpop.f32.mrb[67].mxu1 }
 0x6af   : > { %v8987_v22 = vmax.f32 %v8893_v40, %v8971_v16  ;;  %v8903_v62 = vadd.f32 %v17604_v18, %v8902_v1 }
 0x6b0   : > { %9376 = vst [vmem:[%s17613_s20 + $0x88] sm:$0xff] %v8988_v51  ;;  %v8974_v58 = vmul.f32 0.1, %v8908_v42 }
 0x6b1   : > { %9375 = vst [vmem:[%s17613_s20 + $0x80] sm:$0xff] %v8987_v22  ;;  %v8973_v10 = vmul.f32 0.1, %v8903_v62  ;;  %v13075_v21 = vpop.f32.mrb[68].mxu1 }
 0x6b2   : > { %v8990_v13 = vmax.f32 %v8908_v42, %v8974_v58  ;;  %v8918_v56 = vadd.f32 %v13075_v21, %v17604_v18  ;;  %v8912_v14 = vpop.f32.mrb[69].mxu1 }
 0x6b3   : > { %v8989_v39 = vmax.f32 %v8903_v62, %v8973_v10  ;;  %v8913_v46 = vadd.f32 %v17604_v18, %v8912_v14 }
 0x6b4   : > { %9378 = vst [vmem:[%s17613_s20 + $0x98] sm:$0xff] %v8990_v13  ;;  %v8976_v35 = vmul.f32 0.1, %v8918_v56 }
 0x6b5   : > { %9377 = vst [vmem:[%s17613_s20 + $0x90] sm:$0xff] %v8989_v39  ;;  %v8975_v55 = vmul.f32 0.1, %v8913_v46  ;;  %v13078_v6 = vpop.f32.mrb[70].mxu1 }
 0x6b6   : > { %v8992_v53 = vmax.f32 %v8918_v56, %v8976_v35  ;;  %v8928_v24 = vadd.f32 %v13078_v6, %v17604_v18  ;;  %v8922_v19 = vpop.f32.mrb[71].mxu1 }
 0x6b7   : > { %v8991_v17 = vmax.f32 %v8913_v46, %v8975_v55  ;;  %v8923_v5 = vadd.f32 %v17604_v18, %v8922_v19 }
 0x6b8   : > { %9380 = vst [vmem:[%s17613_s20 + $0xa8] sm:$0xff] %v8992_v53  ;;  %v8978_v49 = vmul.f32 0.1, %v8928_v24 }
 0x6b9   : > { %9379 = vst [vmem:[%s17613_s20 + $0xa0] sm:$0xff] %v8991_v17  ;;  %v8977_v36 = vmul.f32 0.1, %v8923_v5  ;;  %v13081_v50 = vpop.f32.mrb[72].mxu1 }
 0x6ba   : > { %v8994_v8 = vmax.f32 %v8928_v24, %v8978_v49  ;;  %v8938_v7 = vadd.f32 %v13081_v50, %v17604_v18  ;;  %v8932_v26 = vpop.f32.mrb[73].mxu1 }
 0x6bb   : > { %v8993_v47 = vmax.f32 %v8923_v5, %v8977_v36  ;;  %v8933_v32 = vadd.f32 %v17604_v18, %v8932_v26 }
 0x6bc   : > { %9382 = vst [vmem:[%s17613_s20 + $0xb8] sm:$0xff] %v8994_v8  ;;  %v8980_v63 = vmul.f32 0.1, %v8938_v7 }
 0x6bd   : > { %9381 = vst [vmem:[%s17613_s20 + $0xb0] sm:$0xff] %v8993_v47  ;;  %v8979_v11 = vmul.f32 0.1, %v8933_v32  ;;  %v13084_v25 = vpop.f32.mrb[74].mxu1 }
 0x6be   : > { %v8996_v45 = vmax.f32 %v8938_v7, %v8980_v63  ;;  %v8948_v20 = vadd.f32 %v13084_v25, %v17604_v18  ;;  %v8942_v28 = vpop.f32.mrb[75].mxu1 }
 0x6bf   : > { %v8995_v41 = vmax.f32 %v8933_v32, %v8979_v11  ;;  %v8943_v15 = vadd.f32 %v17604_v18, %v8942_v28 }
 0x6c0   : > { %9384 = vst [vmem:[%s17613_s20 + $0xc8] sm:$0xff] %v8996_v45  ;;  %v8982_v4 = vmul.f32 0.1, %v8948_v20 }
 0x6c1   : > { %9383 = vst [vmem:[%s17613_s20 + $0xc0] sm:$0xff] %v8995_v41  ;;  %v8981_v29 = vmul.f32 0.1, %v8943_v15  ;;  %v13087_v3 = vpop.f32.mrb[76].mxu1 }
 0x6c2   : > { %v8998_v59 = vmax.f32 %v8948_v20, %v8982_v4  ;;  %v8958_v2 = vadd.f32 %v13087_v3, %v17604_v18  ;;  %v8952_v52 = vpop.f32.mrb[77].mxu1 }
 0x6c3   : > { %v8997_v54 = vmax.f32 %v8943_v15, %v8981_v29  ;;  %v8953_v9 = vadd.f32 %v17604_v18, %v8952_v52 }
 0x6c4   : > { %9386 = vst [vmem:[%s17613_s20 + $0xd8] sm:$0xff] %v8998_v59  ;;  %v8984_v30 = vmul.f32 0.1, %v8958_v2 }
 0x6c5   : > { %9385 = vst [vmem:[%s17613_s20 + $0xd0] sm:$0xff] %v8997_v54  ;;  %v8983_v60 = vmul.f32 0.1, %v8953_v9  ;;  %v13090_v33 = vpop.f32.mrb[78].mxu1 }
 0x6c6   : > { %v9000_v31 = vmax.f32 %v8958_v2, %v8984_v30  ;;  %v8968_v34 = vadd.f32 %v13090_v33, %v17604_v18  ;;  %v8962_v57 = vpop.f32.mrb[79].mxu1 }
 0x6c7   : > { %v8999_v12 = vmax.f32 %v8953_v9, %v8983_v60  ;;  %v8963_v44 = vadd.f32 %v17604_v18, %v8962_v57 }
 0x6c8   : > { %9388 = vst [vmem:[%s17613_s20 + $0xe8] sm:$0xff] %v9000_v31  ;;  %v8986_v48 = vmul.f32 0.1, %v8968_v34 }
 0x6c9   : > { %9387 = vst [vmem:[%s17613_s20 + $0xe0] sm:$0xff] %v8999_v12  ;;  %v8985_v0 = vmul.f32 0.1, %v8963_v44 }
 0x6ca   : > { %v9002_v23 = vmax.f32 %v8968_v34, %v8986_v48 }
 0x6cb   : > { %v9001_v61 = vmax.f32 %v8963_v44, %v8985_v0 }
 0x6cc   : > { %9390 = vst [vmem:[%s17613_s20 + $0xf8] sm:$0xff] %v9002_v23 }
 0x6cd   : > { %9389 = vst [vmem:[%s17613_s20 + $0xf0] sm:$0xff] %v9001_v61 }
 0x6ce PF: > { %s22_s17 = sadd.s32 1, %s15012_s17  }
 0x6cf   : > { %p19_p2 = scmp.ge.s32.totalorder %s22_s17, 4  }
 0x6d1   :  { %21 = sbr.rel (!%p19_p2) target bundleno = 1 (0x1), region = 122 }
 0x6d8   :  { %9041 = vsyncpa [#allocation5], 1 }
 0x6d9   :  { %9043 = vsyncpa [#allocation5 + $0x1], 1 }

</bundles_post_ra>
